<compile_context>
chip_gen: v7x
topology: tpu7x:2x2x1
jax: 0.10.0
libtpu: 0.0.40
codegen_flags: <defaults>
</compile_context>

<pallas_src>
import math
import jax
import jax.numpy as jnp
from jax import lax
from jax.experimental import pallas as pl
from jax.experimental.pallas import tpu as pltpu

FEATURE_NUM = 12


# --------------------------------------------------------------------------
# Pallas kernel: one RITS direction per grid step, full time loop inside.
# --------------------------------------------------------------------------
def _rits_kernel(v_ref, m_ref, d_ref, ev_ref, em_ref,
                 WhT_ref, bh_ref, wxd_ref, bx_ref,
                 WhistT_ref, bhist_ref, WfeatT_ref, bfeat_ref,
                 WwcaT_ref, WwcbT_ref, bwc_ref,
                 WihaT_ref, WihbT_ref, WhhT_ref, blstm_ref,
                 imp_ref, loss_ref):
    f32 = jnp.float32
    T = v_ref.shape[1]
    B = v_ref.shape[2]
    H = WhT_ref.shape[2]

    # Hoist all weights out of the time loop (loaded once per direction).
    WhT = WhT_ref[0]          # (F, H)
    bh = bh_ref[0]            # (1, H)
    wxd = wxd_ref[0]          # (1, F)  diag of temp_decay_x weight
    bx = bx_ref[0]            # (1, F)
    WhistT = WhistT_ref[0]    # (H, F)
    bhist = bhist_ref[0]      # (1, F)
    WfeatT = WfeatT_ref[0]    # (F, F)  off-diag masked
    bfeat = bfeat_ref[0]      # (1, F)
    WwcaT = WwcaT_ref[0]      # (F, F)
    WwcbT = WwcbT_ref[0]      # (F, F)
    bwc = bwc_ref[0]          # (1, F)
    WihaT = WihaT_ref[0]      # (F, 4H)
    WihbT = WihbT_ref[0]      # (F, 4H)
    WhhT = WhhT_ref[0]        # (H, 4H)
    blstm = blstm_ref[0]      # (1, 4H)  = b_ih + b_hh

    def step(t, carry):
        h, c, loss = carry
        x = v_ref[0, t]             # (B, F)
        m = m_ref[0, t]
        d = d_ref[0, t]
        truth = ev_ref[0, t]
        mask_truth = em_ref[0, t]

        # temporal decays
        gamma_h = jnp.exp(-jnp.maximum(
            jnp.dot(d, WhT, preferred_element_type=f32) + bh, 0.0))
        gamma_x = jnp.exp(-jnp.maximum(d * wxd + bx, 0.0))

        h = h * gamma_h

        # history regression
        x_h = jnp.dot(h, WhistT, preferred_element_type=f32) + bhist

        mx = m * x
        one_minus_m = 1.0 - m
        x_c = mx + one_minus_m * x_h

        # feature regression (off-diagonal weight, pre-masked in the wrapper)
        z_h = jnp.dot(x_c, WfeatT, preferred_element_type=f32) + bfeat

        # weight_combine(cat([gamma_x, m])) as two matmuls (no concat)
        alpha = (jnp.dot(gamma_x, WwcaT, preferred_element_type=f32)
                 + jnp.dot(m, WwcbT, preferred_element_type=f32) + bwc)
        c_h = alpha * z_h + (1.0 - alpha) * x_h
        c_c = mx + one_minus_m * c_h

        # fused masked-L1 loss: one reduction + one divide per step
        err = (jnp.abs(truth - x_h) + jnp.abs(truth - z_h)
               + jnp.abs(truth - c_h)) * mask_truth
        denom = jnp.sum(mask_truth, keepdims=True) + 1e-5        # (1,1)
        loss = loss + jnp.sum(err, keepdims=True) / denom        # (1,1)

        # LSTMCell on inputs = cat([c_c, m]); fused (B, 4H) gate matmuls,
        # PyTorch gate order (i, f, g, o) preserved in the packed columns.
        gates = (jnp.dot(c_c, WihaT, preferred_element_type=f32)
                 + jnp.dot(m, WihbT, preferred_element_type=f32)
                 + jnp.dot(h, WhhT, preferred_element_type=f32)
                 + blstm)
        i_g = jax.nn.sigmoid(gates[:, 0 * H:1 * H])
        f_g = jax.nn.sigmoid(gates[:, 1 * H:2 * H])
        g_g = jnp.tanh(gates[:, 2 * H:3 * H])
        o_g = jax.nn.sigmoid(gates[:, 3 * H:4 * H])

        c_new = f_g * c + i_g * g_g
        h_new = o_g * jnp.tanh(c_new)

        imp_ref[0, t] = c_c.astype(imp_ref.dtype)
        return (h_new, c_new, loss)

    h0 = jnp.zeros((B, H), f32)
    c0 = jnp.zeros((B, H), f32)
    loss0 = jnp.zeros((1, 1), f32)
    _, _, loss = lax.fori_loop(0, T, step, (h0, c0, loss0), unroll=True)
    loss_ref[0] = loss


# --------------------------------------------------------------------------
# Wrapper: run forward + backward RITS in one pallas_call (grid over dir).
# --------------------------------------------------------------------------
_WEIGHT_KEYS = ["WhT", "bh", "wxd", "bx", "WhistT", "bhist", "WfeatT", "bfeat",
                "WwcaT", "WwcbT", "bwc", "WihaT", "WihbT", "WhhT", "blstm"]


def rits_both_pallas(params_f, params_b, fdat, bdat):
    """fdat/bdat hold [B, T, F] tensors (PyTorch convention)."""
    B, T, F = fdat["values"].shape

    def stack_seq(key):
        f = jnp.transpose(fdat[key], (1, 0, 2)).astype(jnp.float32)   # [T,B,F]
        b = jnp.transpose(bdat[key], (1, 0, 2)).astype(jnp.float32)
        return jnp.stack([f, b], axis=0)                               # [2,T,B,F]

    seq_keys = ["values", "masks", "deltas", "evals", "eval_masks"]
    seq_inputs = [stack_seq(k) for k in seq_keys]

    weight_inputs = [jnp.stack([params_f[k], params_b[k]], axis=0).astype(jnp.float32)
                     for k in _WEIGHT_KEYS]

    def wspec(w):
        n = w.ndim - 1
        return pl.BlockSpec((1,) + w.shape[1:], lambda d, n=n: (d,) + (0,) * n)

    grid_spec = pltpu.PrefetchScalarGridSpec(
        num_scalar_prefetch=0,
        grid=(2,),
        in_specs=([pl.BlockSpec((1, T, B, F), lambda d: (d, 0, 0, 0))] * 5
                  + [wspec(w) for w in weight_inputs]),
        out_specs=[pl.BlockSpec((1, T, B, F), lambda d: (d, 0, 0, 0)),
                   pl.BlockSpec((1, 1, 1), lambda d: (d, 0, 0))],
        scratch_shapes=[],
    )

    imps, losses = pl.pallas_call(
        _rits_kernel,
        out_shape=(jax.ShapeDtypeStruct((2, T, B, F), jnp.float32),
                   jax.ShapeDtypeStruct((2, 1, 1), jnp.float32)),
        grid_spec=grid_spec,
        compiler_params=pltpu.CompilerParams(
            dimension_semantics=("parallel",)),
    )(*seq_inputs, *weight_inputs)

    imp_f = jnp.transpose(imps[0], (1, 0, 2))   # back to [B, T, F]
    imp_b = jnp.transpose(imps[1], (1, 0, 2))
    return losses[0, 0, 0], imp_f, losses[1, 0, 0], imp_b


# --------------------------------------------------------------------------
# BRITS: forward + backward RITS, reverse, merge (plain-JAX glue)
# --------------------------------------------------------------------------
def brits_forward(params_f, params_b, data, impute_weight, label_weight,
                  use_pallas=True):
    fdat, bdat = data["forward"], data["backward"]

    if use_pallas:
        loss_f_raw, imp_f, loss_b_raw, imp_b = rits_both_pallas(
            params_f, params_b, fdat, bdat)
    else:
        loss_f_raw, imp_f = rits_forward_ref(
            params_f, fdat["values"], fdat["masks"], fdat["deltas"],
            fdat["evals"], fdat["eval_masks"])
        loss_b_raw, imp_b = rits_forward_ref(
            params_b, bdat["values"], bdat["masks"], bdat["deltas"],
            bdat["evals"], bdat["eval_masks"])

    # y_loss == 0 in the reference module (classification head unused)
    loss_f = loss_f_raw * impute_weight + 0.0 * label_weight
    loss_b = loss_b_raw * impute_weight + 0.0 * label_weight

    imp_b_rev = imp_b[:, ::-1, :]  # reverse along time (dim 1)
    loss_c = jnp.mean(jnp.abs(imp_f - imp_b_rev)) * 0.1

    return {
        "loss": loss_f + loss_b + loss_c,
        "predictions": jnp.asarray(0.0),          # (0 + 0) / 2
        "imputations": (imp_f + imp_b_rev) / 2.0,
        "evals": fdat["evals"],
        "eval_masks": fdat["eval_masks"],
    }


# --------------------------------------------------------------------------
# Deterministic parameter initialization (matching the module's shapes/ranges)
# with LSTM gate weights packed for the fused (B, 4H) gate matmul.
# --------------------------------------------------------------------------
def init_rits_params(key, rnn_hid_size):
    F, H = FEATURE_NUM, rnn_hid_size
    ks = jax.random.split(key, 16)
    u = lambda k, shape, s: jax.random.uniform(k, shape, jnp.float32, -s, s)

    # TemporalDecay(F -> H)
    W_h = u(ks[0], (H, F), 1.0 / math.sqrt(H))
    b_h = u(ks[1], (H,), 1.0 / math.sqrt(H))
    # TemporalDecay(F -> F, diag=True)
    W_x = u(ks[2], (F, F), 1.0 / math.sqrt(F))
    b_x = u(ks[3], (F,), 1.0 / math.sqrt(F))
    # hist_reg: Linear(H, F)
    W_hist = u(ks[4], (F, H), 1.0 / math.sqrt(H))
    b_hist = u(ks[5], (F,), 1.0 / math.sqrt(H))
    # feat_reg: FeatureRegression(F)
    W_feat = u(ks[6], (F, F), 1.0 / math.sqrt(F))
    b_feat = u(ks[7], (F,), 1.0 / math.sqrt(F))
    # weight_combine: Linear(2F, F)
    W_wc = u(ks[8], (F, 2 * F), 1.0 / math.sqrt(2 * F))
    b_wc = u(ks[9], (F,), 1.0 / math.sqrt(2 * F))
    # LSTMCell(2F, H): gate order (i, f, g, o)
    s = 1.0 / math.sqrt(H)
    W_ih = u(ks[10], (4 * H, 2 * F), s)
    W_hh = u(ks[11], (4 * H, H), s)
    b_ih = u(ks[12], (4 * H,), s)
    b_hh = u(ks[13], (4 * H,), s)
    # self.out / dropout are unused in forward()

    eye = jnp.eye(F, dtype=jnp.float32)

    return {
        "WhT": W_h.T,                                   # (F, H)
        "bh": b_h.reshape(1, H),
        "wxd": jnp.diag(W_x).reshape(1, F),             # diag mask applied
        "bx": b_x.reshape(1, F),
        "WhistT": W_hist.T,                             # (H, F)
        "bhist": b_hist.reshape(1, F),
        "WfeatT": (W_feat * (1.0 - eye)).T,             # (F, F), off-diag mask
        "bfeat": b_feat.reshape(1, F),
        "WwcaT": W_wc[:, :F].T,                         # (F, F)
        "WwcbT": W_wc[:, F:].T,                         # (F, F)
        "bwc": b_wc.reshape(1, F),
        "WihaT": W_ih[:, :F].T,                         # (F, 4H) packed i|f|g|o
        "WihbT": W_ih[:, F:].T,                         # (F, 4H)
        "WhhT": W_hh.T,                                 # (H, 4H)
        "blstm": (b_ih + b_hh).reshape(1, 4 * H),       # (1, 4H)
    }


# --------------------------------------------------------------------------
# Pure-JAX reference (python loop over time) for correctness checking
# --------------------------------------------------------------------------
def rits_forward_ref(p, values, masks, deltas, evals, eval_masks):
    B, T, F = values.shape
    H = p["WhT"].shape[1]
    h = jnp.zeros((B, H), jnp.float32)
    c = jnp.zeros((B, H), jnp.float32)
    x_loss = jnp.float32(0.0)
    imps = []
    for t in range(T):
        x, m, d = values[:, t, :], masks[:, t, :], deltas[:, t, :]
        truth, mt = evals[:, t, :], eval_masks[:, t, :]
        gamma_h = jnp.exp(-jnp.maximum(d @ p["WhT"] + p["bh"], 0.0))
        gamma_x = jnp.exp(-jnp.maximum(d * p["wxd"] + p["bx"], 0.0))
        h = h * gamma_h
        x_h = h @ p["WhistT"] + p["bhist"]
        denom = jnp.sum(mt) + 1e-5
        x_loss += jnp.sum(jnp.abs(truth - x_h) * mt) / denom
        x_c = m * x + (1 - m) * x_h
        z_h = x_c @ p["WfeatT"] + p["bfeat"]
        x_loss += jnp.sum(jnp.abs(truth - z_h) * mt) / denom
        alpha = gamma_x @ p["WwcaT"] + m @ p["WwcbT"] + p["bwc"]
        c_h = alpha * z_h + (1 - alpha) * x_h
        x_loss += jnp.sum(jnp.abs(truth - c_h) * mt) / denom
        c_c = m * x + (1 - m) * c_h
        gates = c_c @ p["WihaT"] + m @ p["WihbT"] + h @ p["WhhT"] + p["blstm"]
        i_g = jax.nn.sigmoid(gates[:, 0 * H:1 * H])
        f_g = jax.nn.sigmoid(gates[:, 1 * H:2 * H])
        g_g = jnp.tanh(gates[:, 2 * H:3 * H])
        o_g = jax.nn.sigmoid(gates[:, 3 * H:4 * H])
        c = f_g * c + i_g * g_g
        h = o_g * jnp.tanh(c)
        imps.append(c_c[:, None, :])
    return x_loss, jnp.concatenate(imps, axis=1)


# --------------------------------------------------------------------------
if __name__ == "__main__":
    B, T, H, F = 4, 8, 32, FEATURE_NUM
    impute_weight, label_weight = 0.3, 1.0

    key = jax.random.PRNGKey(0)
    kp_f, kp_b, kd = jax.random.split(key, 3)
    params_f = init_rits_params(kp_f, H)
    params_b = init_rits_params(kp_b, H)

    kv, km, kdel, kev, kem = jax.random.split(kd, 5)
    values = jax.random.normal(kv, (B, T, F), jnp.float32)
    masks = (jax.random.uniform(km, (B, T, F)) > 0.3).astype(jnp.float32)
    deltas = jax.random.uniform(kdel, (B, T, F), jnp.float32, 0.0, 3.0)
    evals = jax.random.normal(kev, (B, T, F), jnp.float32)
    eval_masks = (jax.random.uniform(kem, (B, T, F)) > 0.5).astype(jnp.float32)

    rev = lambda a: a[:, ::-1, :]
    data = {
        "forward": {"values": values, "masks": masks, "deltas": deltas,
                    "evals": evals, "eval_masks": eval_masks},
        "backward": {"values": rev(values), "masks": rev(masks), "deltas": rev(deltas),
                     "evals": rev(evals), "eval_masks": rev(eval_masks)},
    }

    ret = brits_forward(params_f, params_b, data, impute_weight, label_weight)
    jax.block_until_ready(ret["loss"])
    jax.block_until_ready(ret["imputations"])

    # Correctness check against a pure-JAX reference of the same math.
    ret_ref = brits_forward(params_f, params_b, data, impute_weight, label_weight,
                            use_pallas=False)
    assert jnp.allclose(ret["loss"], ret_ref["loss"], rtol=1e-3, atol=1e-3), (
        ret["loss"], ret_ref["loss"])
    assert jnp.allclose(ret["imputations"], ret_ref["imputations"],
                        rtol=1e-3, atol=1e-3)

    print("KERNEL_OK")
</pallas_src>

<mosaic_0001>
module attributes {stable_mosaic.version = 11 : i64} {
  func.func @_rits_kernel(%arg0: i32, %arg1: memref<1x8x4x12xf32, #tpu.memory_space<vmem>>, %arg2: memref<1x8x4x12xf32, #tpu.memory_space<vmem>>, %arg3: memref<1x8x4x12xf32, #tpu.memory_space<vmem>>, %arg4: memref<1x8x4x12xf32, #tpu.memory_space<vmem>>, %arg5: memref<1x8x4x12xf32, #tpu.memory_space<vmem>>, %arg6: memref<1x12x32xf32, #tpu.memory_space<vmem>>, %arg7: memref<1x1x32xf32, #tpu.memory_space<vmem>>, %arg8: memref<1x1x12xf32, #tpu.memory_space<vmem>>, %arg9: memref<1x1x12xf32, #tpu.memory_space<vmem>>, %arg10: memref<1x32x12xf32, #tpu.memory_space<vmem>>, %arg11: memref<1x1x12xf32, #tpu.memory_space<vmem>>, %arg12: memref<1x12x12xf32, #tpu.memory_space<vmem>>, %arg13: memref<1x1x12xf32, #tpu.memory_space<vmem>>, %arg14: memref<1x12x12xf32, #tpu.memory_space<vmem>>, %arg15: memref<1x12x12xf32, #tpu.memory_space<vmem>>, %arg16: memref<1x1x12xf32, #tpu.memory_space<vmem>>, %arg17: memref<1x12x128xf32, #tpu.memory_space<vmem>>, %arg18: memref<1x12x128xf32, #tpu.memory_space<vmem>>, %arg19: memref<1x32x128xf32, #tpu.memory_space<vmem>>, %arg20: memref<1x1x128xf32, #tpu.memory_space<vmem>>, %arg21: memref<1x8x4x12xf32, #tpu.memory_space<vmem>>, %arg22: memref<1x1x1xf32, #tpu.memory_space<vmem>>) attributes {dimension_semantics = [#tpu.dimension_semantics<parallel>], iteration_bounds = array<i64: 2>, scalar_prefetch = 0 : i64, scratch_operands = 0 : i64, tpu.core_type = #tpu.core_type<tc>, window_params = [{transform_indices = @transform_0, window_bounds = array<i64: 1, 8, 4, 12>}, {transform_indices = @transform_1, window_bounds = array<i64: 1, 8, 4, 12>}, {transform_indices = @transform_2, window_bounds = array<i64: 1, 8, 4, 12>}, {transform_indices = @transform_3, window_bounds = array<i64: 1, 8, 4, 12>}, {transform_indices = @transform_4, window_bounds = array<i64: 1, 8, 4, 12>}, {transform_indices = @transform_5, window_bounds = array<i64: 1, 12, 32>}, {transform_indices = @transform_6, window_bounds = array<i64: 1, 1, 32>}, {transform_indices = @transform_7, window_bounds = array<i64: 1, 1, 12>}, {transform_indices = @transform_8, window_bounds = array<i64: 1, 1, 12>}, {transform_indices = @transform_9, window_bounds = array<i64: 1, 32, 12>}, {transform_indices = @transform_10, window_bounds = array<i64: 1, 1, 12>}, {transform_indices = @transform_11, window_bounds = array<i64: 1, 12, 12>}, {transform_indices = @transform_12, window_bounds = array<i64: 1, 1, 12>}, {transform_indices = @transform_13, window_bounds = array<i64: 1, 12, 12>}, {transform_indices = @transform_14, window_bounds = array<i64: 1, 12, 12>}, {transform_indices = @transform_15, window_bounds = array<i64: 1, 1, 12>}, {transform_indices = @transform_16, window_bounds = array<i64: 1, 12, 128>}, {transform_indices = @transform_17, window_bounds = array<i64: 1, 12, 128>}, {transform_indices = @transform_18, window_bounds = array<i64: 1, 32, 128>}, {transform_indices = @transform_19, window_bounds = array<i64: 1, 1, 128>}, {transform_indices = @transform_20, window_bounds = array<i64: 1, 8, 4, 12>}, {transform_indices = @transform_21, window_bounds = array<i64: 1, 1, 1>}]} {
    %c0 = arith.constant 0 : index
    %c0_0 = arith.constant 0 : index
    %c0_1 = arith.constant 0 : index
    %0 = vector.load %arg6[%c0, %c0_0, %c0_1] : memref<1x12x32xf32, #tpu.memory_space<vmem>>, vector<1x12x32xf32>
    %1 = vector.shape_cast %0 : vector<1x12x32xf32> to vector<12x32xf32>
    %c0_2 = arith.constant 0 : index
    %c0_3 = arith.constant 0 : index
    %c0_4 = arith.constant 0 : index
    %2 = vector.load %arg7[%c0_2, %c0_3, %c0_4] : memref<1x1x32xf32, #tpu.memory_space<vmem>>, vector<1x1x32xf32>
    %3 = vector.shape_cast %2 : vector<1x1x32xf32> to vector<1x32xf32>
    %c0_5 = arith.constant 0 : index
    %c0_6 = arith.constant 0 : index
    %c0_7 = arith.constant 0 : index
    %4 = vector.load %arg8[%c0_5, %c0_6, %c0_7] : memref<1x1x12xf32, #tpu.memory_space<vmem>>, vector<1x1x12xf32>
    %5 = vector.shape_cast %4 : vector<1x1x12xf32> to vector<1x12xf32>
    %c0_8 = arith.constant 0 : index
    %c0_9 = arith.constant 0 : index
    %c0_10 = arith.constant 0 : index
    %6 = vector.load %arg9[%c0_8, %c0_9, %c0_10] : memref<1x1x12xf32, #tpu.memory_space<vmem>>, vector<1x1x12xf32>
    %7 = vector.shape_cast %6 : vector<1x1x12xf32> to vector<1x12xf32>
    %c0_11 = arith.constant 0 : index
    %c0_12 = arith.constant 0 : index
    %c0_13 = arith.constant 0 : index
    %8 = vector.load %arg10[%c0_11, %c0_12, %c0_13] : memref<1x32x12xf32, #tpu.memory_space<vmem>>, vector<1x32x12xf32>
    %9 = vector.shape_cast %8 : vector<1x32x12xf32> to vector<32x12xf32>
    %c0_14 = arith.constant 0 : index
    %c0_15 = arith.constant 0 : index
    %c0_16 = arith.constant 0 : index
    %10 = vector.load %arg11[%c0_14, %c0_15, %c0_16] : memref<1x1x12xf32, #tpu.memory_space<vmem>>, vector<1x1x12xf32>
    %11 = vector.shape_cast %10 : vector<1x1x12xf32> to vector<1x12xf32>
    %c0_17 = arith.constant 0 : index
    %c0_18 = arith.constant 0 : index
    %c0_19 = arith.constant 0 : index
    %12 = vector.load %arg12[%c0_17, %c0_18, %c0_19] : memref<1x12x12xf32, #tpu.memory_space<vmem>>, vector<1x12x12xf32>
    %13 = vector.shape_cast %12 : vector<1x12x12xf32> to vector<12x12xf32>
    %c0_20 = arith.constant 0 : index
    %c0_21 = arith.constant 0 : index
    %c0_22 = arith.constant 0 : index
    %14 = vector.load %arg13[%c0_20, %c0_21, %c0_22] : memref<1x1x12xf32, #tpu.memory_space<vmem>>, vector<1x1x12xf32>
    %15 = vector.shape_cast %14 : vector<1x1x12xf32> to vector<1x12xf32>
    %c0_23 = arith.constant 0 : index
    %c0_24 = arith.constant 0 : index
    %c0_25 = arith.constant 0 : index
    %16 = vector.load %arg14[%c0_23, %c0_24, %c0_25] : memref<1x12x12xf32, #tpu.memory_space<vmem>>, vector<1x12x12xf32>
    %17 = vector.shape_cast %16 : vector<1x12x12xf32> to vector<12x12xf32>
    %c0_26 = arith.constant 0 : index
    %c0_27 = arith.constant 0 : index
    %c0_28 = arith.constant 0 : index
    %18 = vector.load %arg15[%c0_26, %c0_27, %c0_28] : memref<1x12x12xf32, #tpu.memory_space<vmem>>, vector<1x12x12xf32>
    %19 = vector.shape_cast %18 : vector<1x12x12xf32> to vector<12x12xf32>
    %c0_29 = arith.constant 0 : index
    %c0_30 = arith.constant 0 : index
    %c0_31 = arith.constant 0 : index
    %20 = vector.load %arg16[%c0_29, %c0_30, %c0_31] : memref<1x1x12xf32, #tpu.memory_space<vmem>>, vector<1x1x12xf32>
    %21 = vector.shape_cast %20 : vector<1x1x12xf32> to vector<1x12xf32>
    %c0_32 = arith.constant 0 : index
    %c0_33 = arith.constant 0 : index
    %c0_34 = arith.constant 0 : index
    %22 = vector.load %arg17[%c0_32, %c0_33, %c0_34] : memref<1x12x128xf32, #tpu.memory_space<vmem>>, vector<1x12x128xf32>
    %23 = vector.shape_cast %22 : vector<1x12x128xf32> to vector<12x128xf32>
    %c0_35 = arith.constant 0 : index
    %c0_36 = arith.constant 0 : index
    %c0_37 = arith.constant 0 : index
    %24 = vector.load %arg18[%c0_35, %c0_36, %c0_37] : memref<1x12x128xf32, #tpu.memory_space<vmem>>, vector<1x12x128xf32>
    %25 = vector.shape_cast %24 : vector<1x12x128xf32> to vector<12x128xf32>
    %c0_38 = arith.constant 0 : index
    %c0_39 = arith.constant 0 : index
    %c0_40 = arith.constant 0 : index
    %26 = vector.load %arg19[%c0_38, %c0_39, %c0_40] : memref<1x32x128xf32, #tpu.memory_space<vmem>>, vector<1x32x128xf32>
    %27 = vector.shape_cast %26 : vector<1x32x128xf32> to vector<32x128xf32>
    %c0_41 = arith.constant 0 : index
    %c0_42 = arith.constant 0 : index
    %c0_43 = arith.constant 0 : index
    %28 = vector.load %arg20[%c0_41, %c0_42, %c0_43] : memref<1x1x128xf32, #tpu.memory_space<vmem>>, vector<1x1x128xf32>
    %29 = vector.shape_cast %28 : vector<1x1x128xf32> to vector<1x128xf32>
    %cst = arith.constant 0.000000e+00 : f32
    %30 = vector.broadcast %cst : f32 to vector<4x32xf32>
    %cst_44 = arith.constant 0.000000e+00 : f32
    %31 = vector.broadcast %cst_44 : f32 to vector<4x32xf32>
    %cst_45 = arith.constant 0.000000e+00 : f32
    %32 = vector.broadcast %cst_45 : f32 to vector<1x1xf32>
    %c0_i32 = arith.constant 0 : i32
    %c0_46 = arith.constant 0 : index
    %33 = arith.index_cast %c0_i32 : i32 to index
    %c0_47 = arith.constant 0 : index
    %c0_48 = arith.constant 0 : index
    %34 = vector.load %arg1[%c0_46, %33, %c0_47, %c0_48] : memref<1x8x4x12xf32, #tpu.memory_space<vmem>>, vector<1x1x4x12xf32>
    %35 = vector.shape_cast %34 : vector<1x1x4x12xf32> to vector<4x12xf32>
    %c0_49 = arith.constant 0 : index
    %36 = arith.index_cast %c0_i32 : i32 to index
    %c0_50 = arith.constant 0 : index
    %c0_51 = arith.constant 0 : index
    %37 = vector.load %arg2[%c0_49, %36, %c0_50, %c0_51] : memref<1x8x4x12xf32, #tpu.memory_space<vmem>>, vector<1x1x4x12xf32>
    %38 = vector.shape_cast %37 : vector<1x1x4x12xf32> to vector<4x12xf32>
    %c0_52 = arith.constant 0 : index
    %39 = arith.index_cast %c0_i32 : i32 to index
    %c0_53 = arith.constant 0 : index
    %c0_54 = arith.constant 0 : index
    %40 = vector.load %arg3[%c0_52, %39, %c0_53, %c0_54] : memref<1x8x4x12xf32, #tpu.memory_space<vmem>>, vector<1x1x4x12xf32>
    %41 = vector.shape_cast %40 : vector<1x1x4x12xf32> to vector<4x12xf32>
    %c0_55 = arith.constant 0 : index
    %42 = arith.index_cast %c0_i32 : i32 to index
    %c0_56 = arith.constant 0 : index
    %c0_57 = arith.constant 0 : index
    %43 = vector.load %arg4[%c0_55, %42, %c0_56, %c0_57] : memref<1x8x4x12xf32, #tpu.memory_space<vmem>>, vector<1x1x4x12xf32>
    %44 = vector.shape_cast %43 : vector<1x1x4x12xf32> to vector<4x12xf32>
    %c0_58 = arith.constant 0 : index
    %45 = arith.index_cast %c0_i32 : i32 to index
    %c0_59 = arith.constant 0 : index
    %c0_60 = arith.constant 0 : index
    %46 = vector.load %arg5[%c0_58, %45, %c0_59, %c0_60] : memref<1x8x4x12xf32, #tpu.memory_space<vmem>>, vector<1x1x4x12xf32>
    %47 = vector.shape_cast %46 : vector<1x1x4x12xf32> to vector<4x12xf32>
    %cst_61 = arith.constant dense<0.000000e+00> : vector<4x32xf32>
    %48 = tpu.matmul %41, %1, %cst_61 {dimension_numbers = #tpu.dot_dimension_numbers<[1], [0], [0], [1], [0, 0, 1, 1], [], []>} : vector<4x12xf32>, vector<12x32xf32>, vector<4x32xf32> -> vector<4x32xf32>
    %49 = vector.broadcast %3 : vector<1x32xf32> to vector<4x32xf32>
    %50 = arith.addf %48, %49 : vector<4x32xf32>
    %cst_62 = arith.constant 0.000000e+00 : f32
    %51 = vector.broadcast %cst_62 : f32 to vector<4x32xf32>
    %52 = arith.maximumf %50, %51 : vector<4x32xf32>
    %cst_63 = arith.constant 0.000000e+00 : f32
    %53 = vector.broadcast %cst_63 : f32 to vector<4x32xf32>
    %54 = arith.subf %53, %52 : vector<4x32xf32>
    %55 = math.exp %54 : vector<4x32xf32>
    %56 = vector.broadcast %5 : vector<1x12xf32> to vector<4x12xf32>
    %57 = arith.mulf %41, %56 : vector<4x12xf32>
    %58 = vector.broadcast %7 : vector<1x12xf32> to vector<4x12xf32>
    %59 = arith.addf %57, %58 : vector<4x12xf32>
    %cst_64 = arith.constant 0.000000e+00 : f32
    %60 = vector.broadcast %cst_64 : f32 to vector<4x12xf32>
    %61 = arith.maximumf %59, %60 : vector<4x12xf32>
    %cst_65 = arith.constant 0.000000e+00 : f32
    %62 = vector.broadcast %cst_65 : f32 to vector<4x12xf32>
    %63 = arith.subf %62, %61 : vector<4x12xf32>
    %64 = math.exp %63 : vector<4x12xf32>
    %65 = arith.mulf %30, %55 : vector<4x32xf32>
    %cst_66 = arith.constant dense<0.000000e+00> : vector<4x12xf32>
    %66 = tpu.matmul %65, %9, %cst_66 {dimension_numbers = #tpu.dot_dimension_numbers<[1], [0], [0], [1], [0, 0, 1, 1], [], []>} : vector<4x32xf32>, vector<32x12xf32>, vector<4x12xf32> -> vector<4x12xf32>
    %67 = vector.broadcast %11 : vector<1x12xf32> to vector<4x12xf32>
    %68 = arith.addf %66, %67 : vector<4x12xf32>
    %69 = arith.mulf %38, %35 : vector<4x12xf32>
    %cst_67 = arith.constant 1.000000e+00 : f32
    %70 = vector.broadcast %cst_67 : f32 to vector<4x12xf32>
    %71 = arith.subf %70, %38 : vector<4x12xf32>
    %72 = arith.mulf %71, %68 : vector<4x12xf32>
    %73 = arith.addf %69, %72 : vector<4x12xf32>
    %cst_68 = arith.constant dense<0.000000e+00> : vector<4x12xf32>
    %74 = tpu.matmul %73, %13, %cst_68 {dimension_numbers = #tpu.dot_dimension_numbers<[1], [0], [0], [1], [0, 0, 1, 1], [], []>} : vector<4x12xf32>, vector<12x12xf32>, vector<4x12xf32> -> vector<4x12xf32>
    %75 = vector.broadcast %15 : vector<1x12xf32> to vector<4x12xf32>
    %76 = arith.addf %74, %75 : vector<4x12xf32>
    %cst_69 = arith.constant dense<0.000000e+00> : vector<4x12xf32>
    %77 = tpu.matmul %64, %17, %cst_69 {dimension_numbers = #tpu.dot_dimension_numbers<[1], [0], [0], [1], [0, 0, 1, 1], [], []>} : vector<4x12xf32>, vector<12x12xf32>, vector<4x12xf32> -> vector<4x12xf32>
    %cst_70 = arith.constant dense<0.000000e+00> : vector<4x12xf32>
    %78 = tpu.matmul %38, %19, %cst_70 {dimension_numbers = #tpu.dot_dimension_numbers<[1], [0], [0], [1], [0, 0, 1, 1], [], []>} : vector<4x12xf32>, vector<12x12xf32>, vector<4x12xf32> -> vector<4x12xf32>
    %79 = arith.addf %77, %78 : vector<4x12xf32>
    %80 = vector.broadcast %21 : vector<1x12xf32> to vector<4x12xf32>
    %81 = arith.addf %79, %80 : vector<4x12xf32>
    %82 = arith.mulf %81, %76 : vector<4x12xf32>
    %cst_71 = arith.constant 1.000000e+00 : f32
    %83 = vector.broadcast %cst_71 : f32 to vector<4x12xf32>
    %84 = arith.subf %83, %81 : vector<4x12xf32>
    %85 = arith.mulf %84, %68 : vector<4x12xf32>
    %86 = arith.addf %82, %85 : vector<4x12xf32>
    %87 = arith.mulf %71, %86 : vector<4x12xf32>
    %88 = arith.addf %69, %87 : vector<4x12xf32>
    %89 = arith.subf %44, %68 : vector<4x12xf32>
    %90 = math.absf %89 : vector<4x12xf32>
    %91 = arith.subf %44, %76 : vector<4x12xf32>
    %92 = math.absf %91 : vector<4x12xf32>
    %93 = arith.addf %90, %92 : vector<4x12xf32>
    %94 = arith.subf %44, %86 : vector<4x12xf32>
    %95 = math.absf %94 : vector<4x12xf32>
    %96 = arith.addf %93, %95 : vector<4x12xf32>
    %97 = arith.mulf %96, %47 : vector<4x12xf32>
    %98 = vector.shape_cast %47 : vector<4x12xf32> to vector<1x4x12xf32>
    %cst_72 = arith.constant dense<0.000000e+00> : vector<1xf32>
    %99 = vector.multi_reduction <add>, %98, %cst_72 [1, 2] : vector<1x4x12xf32> to vector<1xf32>
    %100 = vector.shape_cast %99 : vector<1xf32> to vector<1x1x1xf32>
    %101 = vector.extract %100[0, 0, 0] : f32 from vector<1x1x1xf32>
    %102 = vector.broadcast %101 : f32 to vector<1x1xf32>
    %cst_73 = arith.constant 9.99999974E-6 : f32
    %103 = vector.broadcast %cst_73 : f32 to vector<1x1xf32>
    %104 = arith.addf %102, %103 : vector<1x1xf32>
    %105 = vector.shape_cast %97 : vector<4x12xf32> to vector<1x4x12xf32>
    %cst_74 = arith.constant dense<0.000000e+00> : vector<1xf32>
    %106 = vector.multi_reduction <add>, %105, %cst_74 [1, 2] : vector<1x4x12xf32> to vector<1xf32>
    %107 = vector.shape_cast %106 : vector<1xf32> to vector<1x1x1xf32>
    %108 = vector.extract %107[0, 0, 0] : f32 from vector<1x1x1xf32>
    %109 = vector.broadcast %108 : f32 to vector<1x1xf32>
    %110 = arith.divf %109, %104 : vector<1x1xf32>
    %111 = arith.addf %32, %110 : vector<1x1xf32>
    %cst_75 = arith.constant dense<0.000000e+00> : vector<4x128xf32>
    %112 = tpu.matmul %88, %23, %cst_75 {dimension_numbers = #tpu.dot_dimension_numbers<[1], [0], [0], [1], [0, 0, 1, 1], [], []>} : vector<4x12xf32>, vector<12x128xf32>, vector<4x128xf32> -> vector<4x128xf32>
    %cst_76 = arith.constant dense<0.000000e+00> : vector<4x128xf32>
    %113 = tpu.matmul %38, %25, %cst_76 {dimension_numbers = #tpu.dot_dimension_numbers<[1], [0], [0], [1], [0, 0, 1, 1], [], []>} : vector<4x12xf32>, vector<12x128xf32>, vector<4x128xf32> -> vector<4x128xf32>
    %114 = arith.addf %112, %113 : vector<4x128xf32>
    %cst_77 = arith.constant dense<0.000000e+00> : vector<4x128xf32>
    %115 = tpu.matmul %65, %27, %cst_77 {dimension_numbers = #tpu.dot_dimension_numbers<[1], [0], [0], [1], [0, 0, 1, 1], [], []>} : vector<4x32xf32>, vector<32x128xf32>, vector<4x128xf32> -> vector<4x128xf32>
    %116 = arith.addf %114, %115 : vector<4x128xf32>
    %117 = vector.broadcast %29 : vector<1x128xf32> to vector<4x128xf32>
    %118 = arith.addf %116, %117 : vector<4x128xf32>
    %119 = vector.extract_strided_slice %118 {offsets = [0, 0], sizes = [4, 32], strides = [1, 1]} : vector<4x128xf32> to vector<4x32xf32>
    %120 = arith.negf %119 : vector<4x32xf32>
    %121 = math.exp %120 : vector<4x32xf32>
    %cst_78 = arith.constant 1.000000e+00 : f32
    %122 = vector.broadcast %cst_78 : f32 to vector<4x32xf32>
    %123 = arith.addf %122, %121 : vector<4x32xf32>
    %124 = arith.divf %122, %123 : vector<4x32xf32>
    %125 = vector.extract_strided_slice %118 {offsets = [0, 32], sizes = [4, 32], strides = [1, 1]} : vector<4x128xf32> to vector<4x32xf32>
    %126 = arith.negf %125 : vector<4x32xf32>
    %127 = math.exp %126 : vector<4x32xf32>
    %cst_79 = arith.constant 1.000000e+00 : f32
    %128 = vector.broadcast %cst_79 : f32 to vector<4x32xf32>
    %129 = arith.addf %128, %127 : vector<4x32xf32>
    %130 = arith.divf %128, %129 : vector<4x32xf32>
    %131 = vector.extract_strided_slice %118 {offsets = [0, 64], sizes = [4, 32], strides = [1, 1]} : vector<4x128xf32> to vector<4x32xf32>
    %132 = math.tanh %131 : vector<4x32xf32>
    %133 = vector.extract_strided_slice %118 {offsets = [0, 96], sizes = [4, 32], strides = [1, 1]} : vector<4x128xf32> to vector<4x32xf32>
    %134 = arith.negf %133 : vector<4x32xf32>
    %135 = math.exp %134 : vector<4x32xf32>
    %cst_80 = arith.constant 1.000000e+00 : f32
    %136 = vector.broadcast %cst_80 : f32 to vector<4x32xf32>
    %137 = arith.addf %136, %135 : vector<4x32xf32>
    %138 = arith.divf %136, %137 : vector<4x32xf32>
    %139 = arith.mulf %130, %31 : vector<4x32xf32>
    %140 = arith.mulf %124, %132 : vector<4x32xf32>
    %141 = arith.addf %139, %140 : vector<4x32xf32>
    %142 = math.tanh %141 : vector<4x32xf32>
    %143 = arith.mulf %138, %142 : vector<4x32xf32>
    %c0_81 = arith.constant 0 : index
    %144 = arith.index_cast %c0_i32 : i32 to index
    %c0_82 = arith.constant 0 : index
    %c0_83 = arith.constant 0 : index
    %145 = vector.load %arg21[%c0_81, %144, %c0_82, %c0_83] : memref<1x8x4x12xf32, #tpu.memory_space<vmem>>, vector<1x1x4x12xf32>
    %146 = vector.shape_cast %145 : vector<1x1x4x12xf32> to vector<4x12xf32>
    %147 = vector.shape_cast %88 : vector<4x12xf32> to vector<1x1x4x12xf32>
    tpu.vector_store %arg21[%c0_81, %144, %c0_82, %c0_83], %147 {strides = array<i32>} : memref<1x8x4x12xf32, #tpu.memory_space<vmem>>, vector<1x1x4x12xf32>,
    %c1_i32 = arith.constant 1 : i32
    %c0_84 = arith.constant 0 : index
    %148 = arith.index_cast %c1_i32 : i32 to index
    %c0_85 = arith.constant 0 : index
    %c0_86 = arith.constant 0 : index
    %149 = vector.load %arg1[%c0_84, %148, %c0_85, %c0_86] : memref<1x8x4x12xf32, #tpu.memory_space<vmem>>, vector<1x1x4x12xf32>
    %150 = vector.shape_cast %149 : vector<1x1x4x12xf32> to vector<4x12xf32>
    %c0_87 = arith.constant 0 : index
    %151 = arith.index_cast %c1_i32 : i32 to index
    %c0_88 = arith.constant 0 : index
    %c0_89 = arith.constant 0 : index
    %152 = vector.load %arg2[%c0_87, %151, %c0_88, %c0_89] : memref<1x8x4x12xf32, #tpu.memory_space<vmem>>, vector<1x1x4x12xf32>
    %153 = vector.shape_cast %152 : vector<1x1x4x12xf32> to vector<4x12xf32>
    %c0_90 = arith.constant 0 : index
    %154 = arith.index_cast %c1_i32 : i32 to index
    %c0_91 = arith.constant 0 : index
    %c0_92 = arith.constant 0 : index
    %155 = vector.load %arg3[%c0_90, %154, %c0_91, %c0_92] : memref<1x8x4x12xf32, #tpu.memory_space<vmem>>, vector<1x1x4x12xf32>
    %156 = vector.shape_cast %155 : vector<1x1x4x12xf32> to vector<4x12xf32>
    %c0_93 = arith.constant 0 : index
    %157 = arith.index_cast %c1_i32 : i32 to index
    %c0_94 = arith.constant 0 : index
    %c0_95 = arith.constant 0 : index
    %158 = vector.load %arg4[%c0_93, %157, %c0_94, %c0_95] : memref<1x8x4x12xf32, #tpu.memory_space<vmem>>, vector<1x1x4x12xf32>
    %159 = vector.shape_cast %158 : vector<1x1x4x12xf32> to vector<4x12xf32>
    %c0_96 = arith.constant 0 : index
    %160 = arith.index_cast %c1_i32 : i32 to index
    %c0_97 = arith.constant 0 : index
    %c0_98 = arith.constant 0 : index
    %161 = vector.load %arg5[%c0_96, %160, %c0_97, %c0_98] : memref<1x8x4x12xf32, #tpu.memory_space<vmem>>, vector<1x1x4x12xf32>
    %162 = vector.shape_cast %161 : vector<1x1x4x12xf32> to vector<4x12xf32>
    %cst_99 = arith.constant dense<0.000000e+00> : vector<4x32xf32>
    %163 = tpu.matmul %156, %1, %cst_99 {dimension_numbers = #tpu.dot_dimension_numbers<[1], [0], [0], [1], [0, 0, 1, 1], [], []>} : vector<4x12xf32>, vector<12x32xf32>, vector<4x32xf32> -> vector<4x32xf32>
    %164 = vector.broadcast %3 : vector<1x32xf32> to vector<4x32xf32>
    %165 = arith.addf %163, %164 : vector<4x32xf32>
    %cst_100 = arith.constant 0.000000e+00 : f32
    %166 = vector.broadcast %cst_100 : f32 to vector<4x32xf32>
    %167 = arith.maximumf %165, %166 : vector<4x32xf32>
    %cst_101 = arith.constant 0.000000e+00 : f32
    %168 = vector.broadcast %cst_101 : f32 to vector<4x32xf32>
    %169 = arith.subf %168, %167 : vector<4x32xf32>
    %170 = math.exp %169 : vector<4x32xf32>
    %171 = vector.broadcast %5 : vector<1x12xf32> to vector<4x12xf32>
    %172 = arith.mulf %156, %171 : vector<4x12xf32>
    %173 = vector.broadcast %7 : vector<1x12xf32> to vector<4x12xf32>
    %174 = arith.addf %172, %173 : vector<4x12xf32>
    %cst_102 = arith.constant 0.000000e+00 : f32
    %175 = vector.broadcast %cst_102 : f32 to vector<4x12xf32>
    %176 = arith.maximumf %174, %175 : vector<4x12xf32>
    %cst_103 = arith.constant 0.000000e+00 : f32
    %177 = vector.broadcast %cst_103 : f32 to vector<4x12xf32>
    %178 = arith.subf %177, %176 : vector<4x12xf32>
    %179 = math.exp %178 : vector<4x12xf32>
    %180 = arith.mulf %143, %170 : vector<4x32xf32>
    %cst_104 = arith.constant dense<0.000000e+00> : vector<4x12xf32>
    %181 = tpu.matmul %180, %9, %cst_104 {dimension_numbers = #tpu.dot_dimension_numbers<[1], [0], [0], [1], [0, 0, 1, 1], [], []>} : vector<4x32xf32>, vector<32x12xf32>, vector<4x12xf32> -> vector<4x12xf32>
    %182 = vector.broadcast %11 : vector<1x12xf32> to vector<4x12xf32>
    %183 = arith.addf %181, %182 : vector<4x12xf32>
    %184 = arith.mulf %153, %150 : vector<4x12xf32>
    %cst_105 = arith.constant 1.000000e+00 : f32
    %185 = vector.broadcast %cst_105 : f32 to vector<4x12xf32>
    %186 = arith.subf %185, %153 : vector<4x12xf32>
    %187 = arith.mulf %186, %183 : vector<4x12xf32>
    %188 = arith.addf %184, %187 : vector<4x12xf32>
    %cst_106 = arith.constant dense<0.000000e+00> : vector<4x12xf32>
    %189 = tpu.matmul %188, %13, %cst_106 {dimension_numbers = #tpu.dot_dimension_numbers<[1], [0], [0], [1], [0, 0, 1, 1], [], []>} : vector<4x12xf32>, vector<12x12xf32>, vector<4x12xf32> -> vector<4x12xf32>
    %190 = vector.broadcast %15 : vector<1x12xf32> to vector<4x12xf32>
    %191 = arith.addf %189, %190 : vector<4x12xf32>
    %cst_107 = arith.constant dense<0.000000e+00> : vector<4x12xf32>
    %192 = tpu.matmul %179, %17, %cst_107 {dimension_numbers = #tpu.dot_dimension_numbers<[1], [0], [0], [1], [0, 0, 1, 1], [], []>} : vector<4x12xf32>, vector<12x12xf32>, vector<4x12xf32> -> vector<4x12xf32>
    %cst_108 = arith.constant dense<0.000000e+00> : vector<4x12xf32>
    %193 = tpu.matmul %153, %19, %cst_108 {dimension_numbers = #tpu.dot_dimension_numbers<[1], [0], [0], [1], [0, 0, 1, 1], [], []>} : vector<4x12xf32>, vector<12x12xf32>, vector<4x12xf32> -> vector<4x12xf32>
    %194 = arith.addf %192, %193 : vector<4x12xf32>
    %195 = vector.broadcast %21 : vector<1x12xf32> to vector<4x12xf32>
    %196 = arith.addf %194, %195 : vector<4x12xf32>
    %197 = arith.mulf %196, %191 : vector<4x12xf32>
    %cst_109 = arith.constant 1.000000e+00 : f32
    %198 = vector.broadcast %cst_109 : f32 to vector<4x12xf32>
    %199 = arith.subf %198, %196 : vector<4x12xf32>
    %200 = arith.mulf %199, %183 : vector<4x12xf32>
    %201 = arith.addf %197, %200 : vector<4x12xf32>
    %202 = arith.mulf %186, %201 : vector<4x12xf32>
    %203 = arith.addf %184, %202 : vector<4x12xf32>
    %204 = arith.subf %159, %183 : vector<4x12xf32>
    %205 = math.absf %204 : vector<4x12xf32>
    %206 = arith.subf %159, %191 : vector<4x12xf32>
    %207 = math.absf %206 : vector<4x12xf32>
    %208 = arith.addf %205, %207 : vector<4x12xf32>
    %209 = arith.subf %159, %201 : vector<4x12xf32>
    %210 = math.absf %209 : vector<4x12xf32>
    %211 = arith.addf %208, %210 : vector<4x12xf32>
    %212 = arith.mulf %211, %162 : vector<4x12xf32>
    %213 = vector.shape_cast %162 : vector<4x12xf32> to vector<1x4x12xf32>
    %cst_110 = arith.constant dense<0.000000e+00> : vector<1xf32>
    %214 = vector.multi_reduction <add>, %213, %cst_110 [1, 2] : vector<1x4x12xf32> to vector<1xf32>
    %215 = vector.shape_cast %214 : vector<1xf32> to vector<1x1x1xf32>
    %216 = vector.extract %215[0, 0, 0] : f32 from vector<1x1x1xf32>
    %217 = vector.broadcast %216 : f32 to vector<1x1xf32>
    %cst_111 = arith.constant 9.99999974E-6 : f32
    %218 = vector.broadcast %cst_111 : f32 to vector<1x1xf32>
    %219 = arith.addf %217, %218 : vector<1x1xf32>
    %220 = vector.shape_cast %212 : vector<4x12xf32> to vector<1x4x12xf32>
    %cst_112 = arith.constant dense<0.000000e+00> : vector<1xf32>
    %221 = vector.multi_reduction <add>, %220, %cst_112 [1, 2] : vector<1x4x12xf32> to vector<1xf32>
    %222 = vector.shape_cast %221 : vector<1xf32> to vector<1x1x1xf32>
    %223 = vector.extract %222[0, 0, 0] : f32 from vector<1x1x1xf32>
    %224 = vector.broadcast %223 : f32 to vector<1x1xf32>
    %225 = arith.divf %224, %219 : vector<1x1xf32>
    %226 = arith.addf %111, %225 : vector<1x1xf32>
    %cst_113 = arith.constant dense<0.000000e+00> : vector<4x128xf32>
    %227 = tpu.matmul %203, %23, %cst_113 {dimension_numbers = #tpu.dot_dimension_numbers<[1], [0], [0], [1], [0, 0, 1, 1], [], []>} : vector<4x12xf32>, vector<12x128xf32>, vector<4x128xf32> -> vector<4x128xf32>
    %cst_114 = arith.constant dense<0.000000e+00> : vector<4x128xf32>
    %228 = tpu.matmul %153, %25, %cst_114 {dimension_numbers = #tpu.dot_dimension_numbers<[1], [0], [0], [1], [0, 0, 1, 1], [], []>} : vector<4x12xf32>, vector<12x128xf32>, vector<4x128xf32> -> vector<4x128xf32>
    %229 = arith.addf %227, %228 : vector<4x128xf32>
    %cst_115 = arith.constant dense<0.000000e+00> : vector<4x128xf32>
    %230 = tpu.matmul %180, %27, %cst_115 {dimension_numbers = #tpu.dot_dimension_numbers<[1], [0], [0], [1], [0, 0, 1, 1], [], []>} : vector<4x32xf32>, vector<32x128xf32>, vector<4x128xf32> -> vector<4x128xf32>
    %231 = arith.addf %229, %230 : vector<4x128xf32>
    %232 = vector.broadcast %29 : vector<1x128xf32> to vector<4x128xf32>
    %233 = arith.addf %231, %232 : vector<4x128xf32>
    %234 = vector.extract_strided_slice %233 {offsets = [0, 0], sizes = [4, 32], strides = [1, 1]} : vector<4x128xf32> to vector<4x32xf32>
    %235 = arith.negf %234 : vector<4x32xf32>
    %236 = math.exp %235 : vector<4x32xf32>
    %cst_116 = arith.constant 1.000000e+00 : f32
    %237 = vector.broadcast %cst_116 : f32 to vector<4x32xf32>
    %238 = arith.addf %237, %236 : vector<4x32xf32>
    %239 = arith.divf %237, %238 : vector<4x32xf32>
    %240 = vector.extract_strided_slice %233 {offsets = [0, 32], sizes = [4, 32], strides = [1, 1]} : vector<4x128xf32> to vector<4x32xf32>
    %241 = arith.negf %240 : vector<4x32xf32>
    %242 = math.exp %241 : vector<4x32xf32>
    %cst_117 = arith.constant 1.000000e+00 : f32
    %243 = vector.broadcast %cst_117 : f32 to vector<4x32xf32>
    %244 = arith.addf %243, %242 : vector<4x32xf32>
    %245 = arith.divf %243, %244 : vector<4x32xf32>
    %246 = vector.extract_strided_slice %233 {offsets = [0, 64], sizes = [4, 32], strides = [1, 1]} : vector<4x128xf32> to vector<4x32xf32>
    %247 = math.tanh %246 : vector<4x32xf32>
    %248 = vector.extract_strided_slice %233 {offsets = [0, 96], sizes = [4, 32], strides = [1, 1]} : vector<4x128xf32> to vector<4x32xf32>
    %249 = arith.negf %248 : vector<4x32xf32>
    %250 = math.exp %249 : vector<4x32xf32>
    %cst_118 = arith.constant 1.000000e+00 : f32
    %251 = vector.broadcast %cst_118 : f32 to vector<4x32xf32>
    %252 = arith.addf %251, %250 : vector<4x32xf32>
    %253 = arith.divf %251, %252 : vector<4x32xf32>
    %254 = arith.mulf %245, %141 : vector<4x32xf32>
    %255 = arith.mulf %239, %247 : vector<4x32xf32>
    %256 = arith.addf %254, %255 : vector<4x32xf32>
    %257 = math.tanh %256 : vector<4x32xf32>
    %258 = arith.mulf %253, %257 : vector<4x32xf32>
    %c0_119 = arith.constant 0 : index
    %259 = arith.index_cast %c1_i32 : i32 to index
    %c0_120 = arith.constant 0 : index
    %c0_121 = arith.constant 0 : index
    %260 = vector.load %arg21[%c0_119, %259, %c0_120, %c0_121] : memref<1x8x4x12xf32, #tpu.memory_space<vmem>>, vector<1x1x4x12xf32>
    %261 = vector.shape_cast %260 : vector<1x1x4x12xf32> to vector<4x12xf32>
    %262 = vector.shape_cast %203 : vector<4x12xf32> to vector<1x1x4x12xf32>
    tpu.vector_store %arg21[%c0_119, %259, %c0_120, %c0_121], %262 {strides = array<i32>} : memref<1x8x4x12xf32, #tpu.memory_space<vmem>>, vector<1x1x4x12xf32>,
    %c2_i32 = arith.constant 2 : i32
    %c0_122 = arith.constant 0 : index
    %263 = arith.index_cast %c2_i32 : i32 to index
    %c0_123 = arith.constant 0 : index
    %c0_124 = arith.constant 0 : index
    %264 = vector.load %arg1[%c0_122, %263, %c0_123, %c0_124] : memref<1x8x4x12xf32, #tpu.memory_space<vmem>>, vector<1x1x4x12xf32>
    %265 = vector.shape_cast %264 : vector<1x1x4x12xf32> to vector<4x12xf32>
    %c0_125 = arith.constant 0 : index
    %266 = arith.index_cast %c2_i32 : i32 to index
    %c0_126 = arith.constant 0 : index
    %c0_127 = arith.constant 0 : index
    %267 = vector.load %arg2[%c0_125, %266, %c0_126, %c0_127] : memref<1x8x4x12xf32, #tpu.memory_space<vmem>>, vector<1x1x4x12xf32>
    %268 = vector.shape_cast %267 : vector<1x1x4x12xf32> to vector<4x12xf32>
    %c0_128 = arith.constant 0 : index
    %269 = arith.index_cast %c2_i32 : i32 to index
    %c0_129 = arith.constant 0 : index
    %c0_130 = arith.constant 0 : index
    %270 = vector.load %arg3[%c0_128, %269, %c0_129, %c0_130] : memref<1x8x4x12xf32, #tpu.memory_space<vmem>>, vector<1x1x4x12xf32>
    %271 = vector.shape_cast %270 : vector<1x1x4x12xf32> to vector<4x12xf32>
    %c0_131 = arith.constant 0 : index
    %272 = arith.index_cast %c2_i32 : i32 to index
    %c0_132 = arith.constant 0 : index
    %c0_133 = arith.constant 0 : index
    %273 = vector.load %arg4[%c0_131, %272, %c0_132, %c0_133] : memref<1x8x4x12xf32, #tpu.memory_space<vmem>>, vector<1x1x4x12xf32>
    %274 = vector.shape_cast %273 : vector<1x1x4x12xf32> to vector<4x12xf32>
    %c0_134 = arith.constant 0 : index
    %275 = arith.index_cast %c2_i32 : i32 to index
    %c0_135 = arith.constant 0 : index
    %c0_136 = arith.constant 0 : index
    %276 = vector.load %arg5[%c0_134, %275, %c0_135, %c0_136] : memref<1x8x4x12xf32, #tpu.memory_space<vmem>>, vector<1x1x4x12xf32>
    %277 = vector.shape_cast %276 : vector<1x1x4x12xf32> to vector<4x12xf32>
    %cst_137 = arith.constant dense<0.000000e+00> : vector<4x32xf32>
    %278 = tpu.matmul %271, %1, %cst_137 {dimension_numbers = #tpu.dot_dimension_numbers<[1], [0], [0], [1], [0, 0, 1, 1], [], []>} : vector<4x12xf32>, vector<12x32xf32>, vector<4x32xf32> -> vector<4x32xf32>
    %279 = vector.broadcast %3 : vector<1x32xf32> to vector<4x32xf32>
    %280 = arith.addf %278, %279 : vector<4x32xf32>
    %cst_138 = arith.constant 0.000000e+00 : f32
    %281 = vector.broadcast %cst_138 : f32 to vector<4x32xf32>
    %282 = arith.maximumf %280, %281 : vector<4x32xf32>
    %cst_139 = arith.constant 0.000000e+00 : f32
    %283 = vector.broadcast %cst_139 : f32 to vector<4x32xf32>
    %284 = arith.subf %283, %282 : vector<4x32xf32>
    %285 = math.exp %284 : vector<4x32xf32>
    %286 = vector.broadcast %5 : vector<1x12xf32> to vector<4x12xf32>
    %287 = arith.mulf %271, %286 : vector<4x12xf32>
    %288 = vector.broadcast %7 : vector<1x12xf32> to vector<4x12xf32>
    %289 = arith.addf %287, %288 : vector<4x12xf32>
    %cst_140 = arith.constant 0.000000e+00 : f32
    %290 = vector.broadcast %cst_140 : f32 to vector<4x12xf32>
    %291 = arith.maximumf %289, %290 : vector<4x12xf32>
    %cst_141 = arith.constant 0.000000e+00 : f32
    %292 = vector.broadcast %cst_141 : f32 to vector<4x12xf32>
    %293 = arith.subf %292, %291 : vector<4x12xf32>
    %294 = math.exp %293 : vector<4x12xf32>
    %295 = arith.mulf %258, %285 : vector<4x32xf32>
    %cst_142 = arith.constant dense<0.000000e+00> : vector<4x12xf32>
    %296 = tpu.matmul %295, %9, %cst_142 {dimension_numbers = #tpu.dot_dimension_numbers<[1], [0], [0], [1], [0, 0, 1, 1], [], []>} : vector<4x32xf32>, vector<32x12xf32>, vector<4x12xf32> -> vector<4x12xf32>
    %297 = vector.broadcast %11 : vector<1x12xf32> to vector<4x12xf32>
    %298 = arith.addf %296, %297 : vector<4x12xf32>
    %299 = arith.mulf %268, %265 : vector<4x12xf32>
    %cst_143 = arith.constant 1.000000e+00 : f32
    %300 = vector.broadcast %cst_143 : f32 to vector<4x12xf32>
    %301 = arith.subf %300, %268 : vector<4x12xf32>
    %302 = arith.mulf %301, %298 : vector<4x12xf32>
    %303 = arith.addf %299, %302 : vector<4x12xf32>
    %cst_144 = arith.constant dense<0.000000e+00> : vector<4x12xf32>
    %304 = tpu.matmul %303, %13, %cst_144 {dimension_numbers = #tpu.dot_dimension_numbers<[1], [0], [0], [1], [0, 0, 1, 1], [], []>} : vector<4x12xf32>, vector<12x12xf32>, vector<4x12xf32> -> vector<4x12xf32>
    %305 = vector.broadcast %15 : vector<1x12xf32> to vector<4x12xf32>
    %306 = arith.addf %304, %305 : vector<4x12xf32>
    %cst_145 = arith.constant dense<0.000000e+00> : vector<4x12xf32>
    %307 = tpu.matmul %294, %17, %cst_145 {dimension_numbers = #tpu.dot_dimension_numbers<[1], [0], [0], [1], [0, 0, 1, 1], [], []>} : vector<4x12xf32>, vector<12x12xf32>, vector<4x12xf32> -> vector<4x12xf32>
    %cst_146 = arith.constant dense<0.000000e+00> : vector<4x12xf32>
    %308 = tpu.matmul %268, %19, %cst_146 {dimension_numbers = #tpu.dot_dimension_numbers<[1], [0], [0], [1], [0, 0, 1, 1], [], []>} : vector<4x12xf32>, vector<12x12xf32>, vector<4x12xf32> -> vector<4x12xf32>
    %309 = arith.addf %307, %308 : vector<4x12xf32>
    %310 = vector.broadcast %21 : vector<1x12xf32> to vector<4x12xf32>
    %311 = arith.addf %309, %310 : vector<4x12xf32>
    %312 = arith.mulf %311, %306 : vector<4x12xf32>
    %cst_147 = arith.constant 1.000000e+00 : f32
    %313 = vector.broadcast %cst_147 : f32 to vector<4x12xf32>
    %314 = arith.subf %313, %311 : vector<4x12xf32>
    %315 = arith.mulf %314, %298 : vector<4x12xf32>
    %316 = arith.addf %312, %315 : vector<4x12xf32>
    %317 = arith.mulf %301, %316 : vector<4x12xf32>
    %318 = arith.addf %299, %317 : vector<4x12xf32>
    %319 = arith.subf %274, %298 : vector<4x12xf32>
    %320 = math.absf %319 : vector<4x12xf32>
    %321 = arith.subf %274, %306 : vector<4x12xf32>
    %322 = math.absf %321 : vector<4x12xf32>
    %323 = arith.addf %320, %322 : vector<4x12xf32>
    %324 = arith.subf %274, %316 : vector<4x12xf32>
    %325 = math.absf %324 : vector<4x12xf32>
    %326 = arith.addf %323, %325 : vector<4x12xf32>
    %327 = arith.mulf %326, %277 : vector<4x12xf32>
    %328 = vector.shape_cast %277 : vector<4x12xf32> to vector<1x4x12xf32>
    %cst_148 = arith.constant dense<0.000000e+00> : vector<1xf32>
    %329 = vector.multi_reduction <add>, %328, %cst_148 [1, 2] : vector<1x4x12xf32> to vector<1xf32>
    %330 = vector.shape_cast %329 : vector<1xf32> to vector<1x1x1xf32>
    %331 = vector.extract %330[0, 0, 0] : f32 from vector<1x1x1xf32>
    %332 = vector.broadcast %331 : f32 to vector<1x1xf32>
    %cst_149 = arith.constant 9.99999974E-6 : f32
    %333 = vector.broadcast %cst_149 : f32 to vector<1x1xf32>
    %334 = arith.addf %332, %333 : vector<1x1xf32>
    %335 = vector.shape_cast %327 : vector<4x12xf32> to vector<1x4x12xf32>
    %cst_150 = arith.constant dense<0.000000e+00> : vector<1xf32>
    %336 = vector.multi_reduction <add>, %335, %cst_150 [1, 2] : vector<1x4x12xf32> to vector<1xf32>
    %337 = vector.shape_cast %336 : vector<1xf32> to vector<1x1x1xf32>
    %338 = vector.extract %337[0, 0, 0] : f32 from vector<1x1x1xf32>
    %339 = vector.broadcast %338 : f32 to vector<1x1xf32>
    %340 = arith.divf %339, %334 : vector<1x1xf32>
    %341 = arith.addf %226, %340 : vector<1x1xf32>
    %cst_151 = arith.constant dense<0.000000e+00> : vector<4x128xf32>
    %342 = tpu.matmul %318, %23, %cst_151 {dimension_numbers = #tpu.dot_dimension_numbers<[1], [0], [0], [1], [0, 0, 1, 1], [], []>} : vector<4x12xf32>, vector<12x128xf32>, vector<4x128xf32> -> vector<4x128xf32>
    %cst_152 = arith.constant dense<0.000000e+00> : vector<4x128xf32>
    %343 = tpu.matmul %268, %25, %cst_152 {dimension_numbers = #tpu.dot_dimension_numbers<[1], [0], [0], [1], [0, 0, 1, 1], [], []>} : vector<4x12xf32>, vector<12x128xf32>, vector<4x128xf32> -> vector<4x128xf32>
    %344 = arith.addf %342, %343 : vector<4x128xf32>
    %cst_153 = arith.constant dense<0.000000e+00> : vector<4x128xf32>
    %345 = tpu.matmul %295, %27, %cst_153 {dimension_numbers = #tpu.dot_dimension_numbers<[1], [0], [0], [1], [0, 0, 1, 1], [], []>} : vector<4x32xf32>, vector<32x128xf32>, vector<4x128xf32> -> vector<4x128xf32>
    %346 = arith.addf %344, %345 : vector<4x128xf32>
    %347 = vector.broadcast %29 : vector<1x128xf32> to vector<4x128xf32>
    %348 = arith.addf %346, %347 : vector<4x128xf32>
    %349 = vector.extract_strided_slice %348 {offsets = [0, 0], sizes = [4, 32], strides = [1, 1]} : vector<4x128xf32> to vector<4x32xf32>
    %350 = arith.negf %349 : vector<4x32xf32>
    %351 = math.exp %350 : vector<4x32xf32>
    %cst_154 = arith.constant 1.000000e+00 : f32
    %352 = vector.broadcast %cst_154 : f32 to vector<4x32xf32>
    %353 = arith.addf %352, %351 : vector<4x32xf32>
    %354 = arith.divf %352, %353 : vector<4x32xf32>
    %355 = vector.extract_strided_slice %348 {offsets = [0, 32], sizes = [4, 32], strides = [1, 1]} : vector<4x128xf32> to vector<4x32xf32>
    %356 = arith.negf %355 : vector<4x32xf32>
    %357 = math.exp %356 : vector<4x32xf32>
    %cst_155 = arith.constant 1.000000e+00 : f32
    %358 = vector.broadcast %cst_155 : f32 to vector<4x32xf32>
    %359 = arith.addf %358, %357 : vector<4x32xf32>
    %360 = arith.divf %358, %359 : vector<4x32xf32>
    %361 = vector.extract_strided_slice %348 {offsets = [0, 64], sizes = [4, 32], strides = [1, 1]} : vector<4x128xf32> to vector<4x32xf32>
    %362 = math.tanh %361 : vector<4x32xf32>
    %363 = vector.extract_strided_slice %348 {offsets = [0, 96], sizes = [4, 32], strides = [1, 1]} : vector<4x128xf32> to vector<4x32xf32>
    %364 = arith.negf %363 : vector<4x32xf32>
    %365 = math.exp %364 : vector<4x32xf32>
    %cst_156 = arith.constant 1.000000e+00 : f32
    %366 = vector.broadcast %cst_156 : f32 to vector<4x32xf32>
    %367 = arith.addf %366, %365 : vector<4x32xf32>
    %368 = arith.divf %366, %367 : vector<4x32xf32>
    %369 = arith.mulf %360, %256 : vector<4x32xf32>
    %370 = arith.mulf %354, %362 : vector<4x32xf32>
    %371 = arith.addf %369, %370 : vector<4x32xf32>
    %372 = math.tanh %371 : vector<4x32xf32>
    %373 = arith.mulf %368, %372 : vector<4x32xf32>
    %c0_157 = arith.constant 0 : index
    %374 = arith.index_cast %c2_i32 : i32 to index
    %c0_158 = arith.constant 0 : index
    %c0_159 = arith.constant 0 : index
    %375 = vector.load %arg21[%c0_157, %374, %c0_158, %c0_159] : memref<1x8x4x12xf32, #tpu.memory_space<vmem>>, vector<1x1x4x12xf32>
    %376 = vector.shape_cast %375 : vector<1x1x4x12xf32> to vector<4x12xf32>
    %377 = vector.shape_cast %318 : vector<4x12xf32> to vector<1x1x4x12xf32>
    tpu.vector_store %arg21[%c0_157, %374, %c0_158, %c0_159], %377 {strides = array<i32>} : memref<1x8x4x12xf32, #tpu.memory_space<vmem>>, vector<1x1x4x12xf32>,
    %c3_i32 = arith.constant 3 : i32
    %c0_160 = arith.constant 0 : index
    %378 = arith.index_cast %c3_i32 : i32 to index
    %c0_161 = arith.constant 0 : index
    %c0_162 = arith.constant 0 : index
    %379 = vector.load %arg1[%c0_160, %378, %c0_161, %c0_162] : memref<1x8x4x12xf32, #tpu.memory_space<vmem>>, vector<1x1x4x12xf32>
    %380 = vector.shape_cast %379 : vector<1x1x4x12xf32> to vector<4x12xf32>
    %c0_163 = arith.constant 0 : index
    %381 = arith.index_cast %c3_i32 : i32 to index
    %c0_164 = arith.constant 0 : index
    %c0_165 = arith.constant 0 : index
    %382 = vector.load %arg2[%c0_163, %381, %c0_164, %c0_165] : memref<1x8x4x12xf32, #tpu.memory_space<vmem>>, vector<1x1x4x12xf32>
    %383 = vector.shape_cast %382 : vector<1x1x4x12xf32> to vector<4x12xf32>
    %c0_166 = arith.constant 0 : index
    %384 = arith.index_cast %c3_i32 : i32 to index
    %c0_167 = arith.constant 0 : index
    %c0_168 = arith.constant 0 : index
    %385 = vector.load %arg3[%c0_166, %384, %c0_167, %c0_168] : memref<1x8x4x12xf32, #tpu.memory_space<vmem>>, vector<1x1x4x12xf32>
    %386 = vector.shape_cast %385 : vector<1x1x4x12xf32> to vector<4x12xf32>
    %c0_169 = arith.constant 0 : index
    %387 = arith.index_cast %c3_i32 : i32 to index
    %c0_170 = arith.constant 0 : index
    %c0_171 = arith.constant 0 : index
    %388 = vector.load %arg4[%c0_169, %387, %c0_170, %c0_171] : memref<1x8x4x12xf32, #tpu.memory_space<vmem>>, vector<1x1x4x12xf32>
    %389 = vector.shape_cast %388 : vector<1x1x4x12xf32> to vector<4x12xf32>
    %c0_172 = arith.constant 0 : index
    %390 = arith.index_cast %c3_i32 : i32 to index
    %c0_173 = arith.constant 0 : index
    %c0_174 = arith.constant 0 : index
    %391 = vector.load %arg5[%c0_172, %390, %c0_173, %c0_174] : memref<1x8x4x12xf32, #tpu.memory_space<vmem>>, vector<1x1x4x12xf32>
    %392 = vector.shape_cast %391 : vector<1x1x4x12xf32> to vector<4x12xf32>
    %cst_175 = arith.constant dense<0.000000e+00> : vector<4x32xf32>
    %393 = tpu.matmul %386, %1, %cst_175 {dimension_numbers = #tpu.dot_dimension_numbers<[1], [0], [0], [1], [0, 0, 1, 1], [], []>} : vector<4x12xf32>, vector<12x32xf32>, vector<4x32xf32> -> vector<4x32xf32>
    %394 = vector.broadcast %3 : vector<1x32xf32> to vector<4x32xf32>
    %395 = arith.addf %393, %394 : vector<4x32xf32>
    %cst_176 = arith.constant 0.000000e+00 : f32
    %396 = vector.broadcast %cst_176 : f32 to vector<4x32xf32>
    %397 = arith.maximumf %395, %396 : vector<4x32xf32>
    %cst_177 = arith.constant 0.000000e+00 : f32
    %398 = vector.broadcast %cst_177 : f32 to vector<4x32xf32>
    %399 = arith.subf %398, %397 : vector<4x32xf32>
    %400 = math.exp %399 : vector<4x32xf32>
    %401 = vector.broadcast %5 : vector<1x12xf32> to vector<4x12xf32>
    %402 = arith.mulf %386, %401 : vector<4x12xf32>
    %403 = vector.broadcast %7 : vector<1x12xf32> to vector<4x12xf32>
    %404 = arith.addf %402, %403 : vector<4x12xf32>
    %cst_178 = arith.constant 0.000000e+00 : f32
    %405 = vector.broadcast %cst_178 : f32 to vector<4x12xf32>
    %406 = arith.maximumf %404, %405 : vector<4x12xf32>
    %cst_179 = arith.constant 0.000000e+00 : f32
    %407 = vector.broadcast %cst_179 : f32 to vector<4x12xf32>
    %408 = arith.subf %407, %406 : vector<4x12xf32>
    %409 = math.exp %408 : vector<4x12xf32>
    %410 = arith.mulf %373, %400 : vector<4x32xf32>
    %cst_180 = arith.constant dense<0.000000e+00> : vector<4x12xf32>
    %411 = tpu.matmul %410, %9, %cst_180 {dimension_numbers = #tpu.dot_dimension_numbers<[1], [0], [0], [1], [0, 0, 1, 1], [], []>} : vector<4x32xf32>, vector<32x12xf32>, vector<4x12xf32> -> vector<4x12xf32>
    %412 = vector.broadcast %11 : vector<1x12xf32> to vector<4x12xf32>
    %413 = arith.addf %411, %412 : vector<4x12xf32>
    %414 = arith.mulf %383, %380 : vector<4x12xf32>
    %cst_181 = arith.constant 1.000000e+00 : f32
    %415 = vector.broadcast %cst_181 : f32 to vector<4x12xf32>
    %416 = arith.subf %415, %383 : vector<4x12xf32>
    %417 = arith.mulf %416, %413 : vector<4x12xf32>
    %418 = arith.addf %414, %417 : vector<4x12xf32>
    %cst_182 = arith.constant dense<0.000000e+00> : vector<4x12xf32>
    %419 = tpu.matmul %418, %13, %cst_182 {dimension_numbers = #tpu.dot_dimension_numbers<[1], [0], [0], [1], [0, 0, 1, 1], [], []>} : vector<4x12xf32>, vector<12x12xf32>, vector<4x12xf32> -> vector<4x12xf32>
    %420 = vector.broadcast %15 : vector<1x12xf32> to vector<4x12xf32>
    %421 = arith.addf %419, %420 : vector<4x12xf32>
    %cst_183 = arith.constant dense<0.000000e+00> : vector<4x12xf32>
    %422 = tpu.matmul %409, %17, %cst_183 {dimension_numbers = #tpu.dot_dimension_numbers<[1], [0], [0], [1], [0, 0, 1, 1], [], []>} : vector<4x12xf32>, vector<12x12xf32>, vector<4x12xf32> -> vector<4x12xf32>
    %cst_184 = arith.constant dense<0.000000e+00> : vector<4x12xf32>
    %423 = tpu.matmul %383, %19, %cst_184 {dimension_numbers = #tpu.dot_dimension_numbers<[1], [0], [0], [1], [0, 0, 1, 1], [], []>} : vector<4x12xf32>, vector<12x12xf32>, vector<4x12xf32> -> vector<4x12xf32>
    %424 = arith.addf %422, %423 : vector<4x12xf32>
    %425 = vector.broadcast %21 : vector<1x12xf32> to vector<4x12xf32>
    %426 = arith.addf %424, %425 : vector<4x12xf32>
    %427 = arith.mulf %426, %421 : vector<4x12xf32>
    %cst_185 = arith.constant 1.000000e+00 : f32
    %428 = vector.broadcast %cst_185 : f32 to vector<4x12xf32>
    %429 = arith.subf %428, %426 : vector<4x12xf32>
    %430 = arith.mulf %429, %413 : vector<4x12xf32>
    %431 = arith.addf %427, %430 : vector<4x12xf32>
    %432 = arith.mulf %416, %431 : vector<4x12xf32>
    %433 = arith.addf %414, %432 : vector<4x12xf32>
    %434 = arith.subf %389, %413 : vector<4x12xf32>
    %435 = math.absf %434 : vector<4x12xf32>
    %436 = arith.subf %389, %421 : vector<4x12xf32>
    %437 = math.absf %436 : vector<4x12xf32>
    %438 = arith.addf %435, %437 : vector<4x12xf32>
    %439 = arith.subf %389, %431 : vector<4x12xf32>
    %440 = math.absf %439 : vector<4x12xf32>
    %441 = arith.addf %438, %440 : vector<4x12xf32>
    %442 = arith.mulf %441, %392 : vector<4x12xf32>
    %443 = vector.shape_cast %392 : vector<4x12xf32> to vector<1x4x12xf32>
    %cst_186 = arith.constant dense<0.000000e+00> : vector<1xf32>
    %444 = vector.multi_reduction <add>, %443, %cst_186 [1, 2] : vector<1x4x12xf32> to vector<1xf32>
    %445 = vector.shape_cast %444 : vector<1xf32> to vector<1x1x1xf32>
    %446 = vector.extract %445[0, 0, 0] : f32 from vector<1x1x1xf32>
    %447 = vector.broadcast %446 : f32 to vector<1x1xf32>
    %cst_187 = arith.constant 9.99999974E-6 : f32
    %448 = vector.broadcast %cst_187 : f32 to vector<1x1xf32>
    %449 = arith.addf %447, %448 : vector<1x1xf32>
    %450 = vector.shape_cast %442 : vector<4x12xf32> to vector<1x4x12xf32>
    %cst_188 = arith.constant dense<0.000000e+00> : vector<1xf32>
    %451 = vector.multi_reduction <add>, %450, %cst_188 [1, 2] : vector<1x4x12xf32> to vector<1xf32>
    %452 = vector.shape_cast %451 : vector<1xf32> to vector<1x1x1xf32>
    %453 = vector.extract %452[0, 0, 0] : f32 from vector<1x1x1xf32>
    %454 = vector.broadcast %453 : f32 to vector<1x1xf32>
    %455 = arith.divf %454, %449 : vector<1x1xf32>
    %456 = arith.addf %341, %455 : vector<1x1xf32>
    %cst_189 = arith.constant dense<0.000000e+00> : vector<4x128xf32>
    %457 = tpu.matmul %433, %23, %cst_189 {dimension_numbers = #tpu.dot_dimension_numbers<[1], [0], [0], [1], [0, 0, 1, 1], [], []>} : vector<4x12xf32>, vector<12x128xf32>, vector<4x128xf32> -> vector<4x128xf32>
    %cst_190 = arith.constant dense<0.000000e+00> : vector<4x128xf32>
    %458 = tpu.matmul %383, %25, %cst_190 {dimension_numbers = #tpu.dot_dimension_numbers<[1], [0], [0], [1], [0, 0, 1, 1], [], []>} : vector<4x12xf32>, vector<12x128xf32>, vector<4x128xf32> -> vector<4x128xf32>
    %459 = arith.addf %457, %458 : vector<4x128xf32>
    %cst_191 = arith.constant dense<0.000000e+00> : vector<4x128xf32>
    %460 = tpu.matmul %410, %27, %cst_191 {dimension_numbers = #tpu.dot_dimension_numbers<[1], [0], [0], [1], [0, 0, 1, 1], [], []>} : vector<4x32xf32>, vector<32x128xf32>, vector<4x128xf32> -> vector<4x128xf32>
    %461 = arith.addf %459, %460 : vector<4x128xf32>
    %462 = vector.broadcast %29 : vector<1x128xf32> to vector<4x128xf32>
    %463 = arith.addf %461, %462 : vector<4x128xf32>
    %464 = vector.extract_strided_slice %463 {offsets = [0, 0], sizes = [4, 32], strides = [1, 1]} : vector<4x128xf32> to vector<4x32xf32>
    %465 = arith.negf %464 : vector<4x32xf32>
    %466 = math.exp %465 : vector<4x32xf32>
    %cst_192 = arith.constant 1.000000e+00 : f32
    %467 = vector.broadcast %cst_192 : f32 to vector<4x32xf32>
    %468 = arith.addf %467, %466 : vector<4x32xf32>
    %469 = arith.divf %467, %468 : vector<4x32xf32>
    %470 = vector.extract_strided_slice %463 {offsets = [0, 32], sizes = [4, 32], strides = [1, 1]} : vector<4x128xf32> to vector<4x32xf32>
    %471 = arith.negf %470 : vector<4x32xf32>
    %472 = math.exp %471 : vector<4x32xf32>
    %cst_193 = arith.constant 1.000000e+00 : f32
    %473 = vector.broadcast %cst_193 : f32 to vector<4x32xf32>
    %474 = arith.addf %473, %472 : vector<4x32xf32>
    %475 = arith.divf %473, %474 : vector<4x32xf32>
    %476 = vector.extract_strided_slice %463 {offsets = [0, 64], sizes = [4, 32], strides = [1, 1]} : vector<4x128xf32> to vector<4x32xf32>
    %477 = math.tanh %476 : vector<4x32xf32>
    %478 = vector.extract_strided_slice %463 {offsets = [0, 96], sizes = [4, 32], strides = [1, 1]} : vector<4x128xf32> to vector<4x32xf32>
    %479 = arith.negf %478 : vector<4x32xf32>
    %480 = math.exp %479 : vector<4x32xf32>
    %cst_194 = arith.constant 1.000000e+00 : f32
    %481 = vector.broadcast %cst_194 : f32 to vector<4x32xf32>
    %482 = arith.addf %481, %480 : vector<4x32xf32>
    %483 = arith.divf %481, %482 : vector<4x32xf32>
    %484 = arith.mulf %475, %371 : vector<4x32xf32>
    %485 = arith.mulf %469, %477 : vector<4x32xf32>
    %486 = arith.addf %484, %485 : vector<4x32xf32>
    %487 = math.tanh %486 : vector<4x32xf32>
    %488 = arith.mulf %483, %487 : vector<4x32xf32>
    %c0_195 = arith.constant 0 : index
    %489 = arith.index_cast %c3_i32 : i32 to index
    %c0_196 = arith.constant 0 : index
    %c0_197 = arith.constant 0 : index
    %490 = vector.load %arg21[%c0_195, %489, %c0_196, %c0_197] : memref<1x8x4x12xf32, #tpu.memory_space<vmem>>, vector<1x1x4x12xf32>
    %491 = vector.shape_cast %490 : vector<1x1x4x12xf32> to vector<4x12xf32>
    %492 = vector.shape_cast %433 : vector<4x12xf32> to vector<1x1x4x12xf32>
    tpu.vector_store %arg21[%c0_195, %489, %c0_196, %c0_197], %492 {strides = array<i32>} : memref<1x8x4x12xf32, #tpu.memory_space<vmem>>, vector<1x1x4x12xf32>,
    %c4_i32 = arith.constant 4 : i32
    %c0_198 = arith.constant 0 : index
    %493 = arith.index_cast %c4_i32 : i32 to index
    %c0_199 = arith.constant 0 : index
    %c0_200 = arith.constant 0 : index
    %494 = vector.load %arg1[%c0_198, %493, %c0_199, %c0_200] : memref<1x8x4x12xf32, #tpu.memory_space<vmem>>, vector<1x1x4x12xf32>
    %495 = vector.shape_cast %494 : vector<1x1x4x12xf32> to vector<4x12xf32>
    %c0_201 = arith.constant 0 : index
    %496 = arith.index_cast %c4_i32 : i32 to index
    %c0_202 = arith.constant 0 : index
    %c0_203 = arith.constant 0 : index
    %497 = vector.load %arg2[%c0_201, %496, %c0_202, %c0_203] : memref<1x8x4x12xf32, #tpu.memory_space<vmem>>, vector<1x1x4x12xf32>
    %498 = vector.shape_cast %497 : vector<1x1x4x12xf32> to vector<4x12xf32>
    %c0_204 = arith.constant 0 : index
    %499 = arith.index_cast %c4_i32 : i32 to index
    %c0_205 = arith.constant 0 : index
    %c0_206 = arith.constant 0 : index
    %500 = vector.load %arg3[%c0_204, %499, %c0_205, %c0_206] : memref<1x8x4x12xf32, #tpu.memory_space<vmem>>, vector<1x1x4x12xf32>
    %501 = vector.shape_cast %500 : vector<1x1x4x12xf32> to vector<4x12xf32>
    %c0_207 = arith.constant 0 : index
    %502 = arith.index_cast %c4_i32 : i32 to index
    %c0_208 = arith.constant 0 : index
    %c0_209 = arith.constant 0 : index
    %503 = vector.load %arg4[%c0_207, %502, %c0_208, %c0_209] : memref<1x8x4x12xf32, #tpu.memory_space<vmem>>, vector<1x1x4x12xf32>
    %504 = vector.shape_cast %503 : vector<1x1x4x12xf32> to vector<4x12xf32>
    %c0_210 = arith.constant 0 : index
    %505 = arith.index_cast %c4_i32 : i32 to index
    %c0_211 = arith.constant 0 : index
    %c0_212 = arith.constant 0 : index
    %506 = vector.load %arg5[%c0_210, %505, %c0_211, %c0_212] : memref<1x8x4x12xf32, #tpu.memory_space<vmem>>, vector<1x1x4x12xf32>
    %507 = vector.shape_cast %506 : vector<1x1x4x12xf32> to vector<4x12xf32>
    %cst_213 = arith.constant dense<0.000000e+00> : vector<4x32xf32>
    %508 = tpu.matmul %501, %1, %cst_213 {dimension_numbers = #tpu.dot_dimension_numbers<[1], [0], [0], [1], [0, 0, 1, 1], [], []>} : vector<4x12xf32>, vector<12x32xf32>, vector<4x32xf32> -> vector<4x32xf32>
    %509 = vector.broadcast %3 : vector<1x32xf32> to vector<4x32xf32>
    %510 = arith.addf %508, %509 : vector<4x32xf32>
    %cst_214 = arith.constant 0.000000e+00 : f32
    %511 = vector.broadcast %cst_214 : f32 to vector<4x32xf32>
    %512 = arith.maximumf %510, %511 : vector<4x32xf32>
    %cst_215 = arith.constant 0.000000e+00 : f32
    %513 = vector.broadcast %cst_215 : f32 to vector<4x32xf32>
    %514 = arith.subf %513, %512 : vector<4x32xf32>
    %515 = math.exp %514 : vector<4x32xf32>
    %516 = vector.broadcast %5 : vector<1x12xf32> to vector<4x12xf32>
    %517 = arith.mulf %501, %516 : vector<4x12xf32>
    %518 = vector.broadcast %7 : vector<1x12xf32> to vector<4x12xf32>
    %519 = arith.addf %517, %518 : vector<4x12xf32>
    %cst_216 = arith.constant 0.000000e+00 : f32
    %520 = vector.broadcast %cst_216 : f32 to vector<4x12xf32>
    %521 = arith.maximumf %519, %520 : vector<4x12xf32>
    %cst_217 = arith.constant 0.000000e+00 : f32
    %522 = vector.broadcast %cst_217 : f32 to vector<4x12xf32>
    %523 = arith.subf %522, %521 : vector<4x12xf32>
    %524 = math.exp %523 : vector<4x12xf32>
    %525 = arith.mulf %488, %515 : vector<4x32xf32>
    %cst_218 = arith.constant dense<0.000000e+00> : vector<4x12xf32>
    %526 = tpu.matmul %525, %9, %cst_218 {dimension_numbers = #tpu.dot_dimension_numbers<[1], [0], [0], [1], [0, 0, 1, 1], [], []>} : vector<4x32xf32>, vector<32x12xf32>, vector<4x12xf32> -> vector<4x12xf32>
    %527 = vector.broadcast %11 : vector<1x12xf32> to vector<4x12xf32>
    %528 = arith.addf %526, %527 : vector<4x12xf32>
    %529 = arith.mulf %498, %495 : vector<4x12xf32>
    %cst_219 = arith.constant 1.000000e+00 : f32
    %530 = vector.broadcast %cst_219 : f32 to vector<4x12xf32>
    %531 = arith.subf %530, %498 : vector<4x12xf32>
    %532 = arith.mulf %531, %528 : vector<4x12xf32>
    %533 = arith.addf %529, %532 : vector<4x12xf32>
    %cst_220 = arith.constant dense<0.000000e+00> : vector<4x12xf32>
    %534 = tpu.matmul %533, %13, %cst_220 {dimension_numbers = #tpu.dot_dimension_numbers<[1], [0], [0], [1], [0, 0, 1, 1], [], []>} : vector<4x12xf32>, vector<12x12xf32>, vector<4x12xf32> -> vector<4x12xf32>
    %535 = vector.broadcast %15 : vector<1x12xf32> to vector<4x12xf32>
    %536 = arith.addf %534, %535 : vector<4x12xf32>
    %cst_221 = arith.constant dense<0.000000e+00> : vector<4x12xf32>
    %537 = tpu.matmul %524, %17, %cst_221 {dimension_numbers = #tpu.dot_dimension_numbers<[1], [0], [0], [1], [0, 0, 1, 1], [], []>} : vector<4x12xf32>, vector<12x12xf32>, vector<4x12xf32> -> vector<4x12xf32>
    %cst_222 = arith.constant dense<0.000000e+00> : vector<4x12xf32>
    %538 = tpu.matmul %498, %19, %cst_222 {dimension_numbers = #tpu.dot_dimension_numbers<[1], [0], [0], [1], [0, 0, 1, 1], [], []>} : vector<4x12xf32>, vector<12x12xf32>, vector<4x12xf32> -> vector<4x12xf32>
    %539 = arith.addf %537, %538 : vector<4x12xf32>
    %540 = vector.broadcast %21 : vector<1x12xf32> to vector<4x12xf32>
    %541 = arith.addf %539, %540 : vector<4x12xf32>
    %542 = arith.mulf %541, %536 : vector<4x12xf32>
    %cst_223 = arith.constant 1.000000e+00 : f32
    %543 = vector.broadcast %cst_223 : f32 to vector<4x12xf32>
    %544 = arith.subf %543, %541 : vector<4x12xf32>
    %545 = arith.mulf %544, %528 : vector<4x12xf32>
    %546 = arith.addf %542, %545 : vector<4x12xf32>
    %547 = arith.mulf %531, %546 : vector<4x12xf32>
    %548 = arith.addf %529, %547 : vector<4x12xf32>
    %549 = arith.subf %504, %528 : vector<4x12xf32>
    %550 = math.absf %549 : vector<4x12xf32>
    %551 = arith.subf %504, %536 : vector<4x12xf32>
    %552 = math.absf %551 : vector<4x12xf32>
    %553 = arith.addf %550, %552 : vector<4x12xf32>
    %554 = arith.subf %504, %546 : vector<4x12xf32>
    %555 = math.absf %554 : vector<4x12xf32>
    %556 = arith.addf %553, %555 : vector<4x12xf32>
    %557 = arith.mulf %556, %507 : vector<4x12xf32>
    %558 = vector.shape_cast %507 : vector<4x12xf32> to vector<1x4x12xf32>
    %cst_224 = arith.constant dense<0.000000e+00> : vector<1xf32>
    %559 = vector.multi_reduction <add>, %558, %cst_224 [1, 2] : vector<1x4x12xf32> to vector<1xf32>
    %560 = vector.shape_cast %559 : vector<1xf32> to vector<1x1x1xf32>
    %561 = vector.extract %560[0, 0, 0] : f32 from vector<1x1x1xf32>
    %562 = vector.broadcast %561 : f32 to vector<1x1xf32>
    %cst_225 = arith.constant 9.99999974E-6 : f32
    %563 = vector.broadcast %cst_225 : f32 to vector<1x1xf32>
    %564 = arith.addf %562, %563 : vector<1x1xf32>
    %565 = vector.shape_cast %557 : vector<4x12xf32> to vector<1x4x12xf32>
    %cst_226 = arith.constant dense<0.000000e+00> : vector<1xf32>
    %566 = vector.multi_reduction <add>, %565, %cst_226 [1, 2] : vector<1x4x12xf32> to vector<1xf32>
    %567 = vector.shape_cast %566 : vector<1xf32> to vector<1x1x1xf32>
    %568 = vector.extract %567[0, 0, 0] : f32 from vector<1x1x1xf32>
    %569 = vector.broadcast %568 : f32 to vector<1x1xf32>
    %570 = arith.divf %569, %564 : vector<1x1xf32>
    %571 = arith.addf %456, %570 : vector<1x1xf32>
    %cst_227 = arith.constant dense<0.000000e+00> : vector<4x128xf32>
    %572 = tpu.matmul %548, %23, %cst_227 {dimension_numbers = #tpu.dot_dimension_numbers<[1], [0], [0], [1], [0, 0, 1, 1], [], []>} : vector<4x12xf32>, vector<12x128xf32>, vector<4x128xf32> -> vector<4x128xf32>
    %cst_228 = arith.constant dense<0.000000e+00> : vector<4x128xf32>
    %573 = tpu.matmul %498, %25, %cst_228 {dimension_numbers = #tpu.dot_dimension_numbers<[1], [0], [0], [1], [0, 0, 1, 1], [], []>} : vector<4x12xf32>, vector<12x128xf32>, vector<4x128xf32> -> vector<4x128xf32>
    %574 = arith.addf %572, %573 : vector<4x128xf32>
    %cst_229 = arith.constant dense<0.000000e+00> : vector<4x128xf32>
    %575 = tpu.matmul %525, %27, %cst_229 {dimension_numbers = #tpu.dot_dimension_numbers<[1], [0], [0], [1], [0, 0, 1, 1], [], []>} : vector<4x32xf32>, vector<32x128xf32>, vector<4x128xf32> -> vector<4x128xf32>
    %576 = arith.addf %574, %575 : vector<4x128xf32>
    %577 = vector.broadcast %29 : vector<1x128xf32> to vector<4x128xf32>
    %578 = arith.addf %576, %577 : vector<4x128xf32>
    %579 = vector.extract_strided_slice %578 {offsets = [0, 0], sizes = [4, 32], strides = [1, 1]} : vector<4x128xf32> to vector<4x32xf32>
    %580 = arith.negf %579 : vector<4x32xf32>
    %581 = math.exp %580 : vector<4x32xf32>
    %cst_230 = arith.constant 1.000000e+00 : f32
    %582 = vector.broadcast %cst_230 : f32 to vector<4x32xf32>
    %583 = arith.addf %582, %581 : vector<4x32xf32>
    %584 = arith.divf %582, %583 : vector<4x32xf32>
    %585 = vector.extract_strided_slice %578 {offsets = [0, 32], sizes = [4, 32], strides = [1, 1]} : vector<4x128xf32> to vector<4x32xf32>
    %586 = arith.negf %585 : vector<4x32xf32>
    %587 = math.exp %586 : vector<4x32xf32>
    %cst_231 = arith.constant 1.000000e+00 : f32
    %588 = vector.broadcast %cst_231 : f32 to vector<4x32xf32>
    %589 = arith.addf %588, %587 : vector<4x32xf32>
    %590 = arith.divf %588, %589 : vector<4x32xf32>
    %591 = vector.extract_strided_slice %578 {offsets = [0, 64], sizes = [4, 32], strides = [1, 1]} : vector<4x128xf32> to vector<4x32xf32>
    %592 = math.tanh %591 : vector<4x32xf32>
    %593 = vector.extract_strided_slice %578 {offsets = [0, 96], sizes = [4, 32], strides = [1, 1]} : vector<4x128xf32> to vector<4x32xf32>
    %594 = arith.negf %593 : vector<4x32xf32>
    %595 = math.exp %594 : vector<4x32xf32>
    %cst_232 = arith.constant 1.000000e+00 : f32
    %596 = vector.broadcast %cst_232 : f32 to vector<4x32xf32>
    %597 = arith.addf %596, %595 : vector<4x32xf32>
    %598 = arith.divf %596, %597 : vector<4x32xf32>
    %599 = arith.mulf %590, %486 : vector<4x32xf32>
    %600 = arith.mulf %584, %592 : vector<4x32xf32>
    %601 = arith.addf %599, %600 : vector<4x32xf32>
    %602 = math.tanh %601 : vector<4x32xf32>
    %603 = arith.mulf %598, %602 : vector<4x32xf32>
    %c0_233 = arith.constant 0 : index
    %604 = arith.index_cast %c4_i32 : i32 to index
    %c0_234 = arith.constant 0 : index
    %c0_235 = arith.constant 0 : index
    %605 = vector.load %arg21[%c0_233, %604, %c0_234, %c0_235] : memref<1x8x4x12xf32, #tpu.memory_space<vmem>>, vector<1x1x4x12xf32>
    %606 = vector.shape_cast %605 : vector<1x1x4x12xf32> to vector<4x12xf32>
    %607 = vector.shape_cast %548 : vector<4x12xf32> to vector<1x1x4x12xf32>
    tpu.vector_store %arg21[%c0_233, %604, %c0_234, %c0_235], %607 {strides = array<i32>} : memref<1x8x4x12xf32, #tpu.memory_space<vmem>>, vector<1x1x4x12xf32>,
    %c5_i32 = arith.constant 5 : i32
    %c0_236 = arith.constant 0 : index
    %608 = arith.index_cast %c5_i32 : i32 to index
    %c0_237 = arith.constant 0 : index
    %c0_238 = arith.constant 0 : index
    %609 = vector.load %arg1[%c0_236, %608, %c0_237, %c0_238] : memref<1x8x4x12xf32, #tpu.memory_space<vmem>>, vector<1x1x4x12xf32>
    %610 = vector.shape_cast %609 : vector<1x1x4x12xf32> to vector<4x12xf32>
    %c0_239 = arith.constant 0 : index
    %611 = arith.index_cast %c5_i32 : i32 to index
    %c0_240 = arith.constant 0 : index
    %c0_241 = arith.constant 0 : index
    %612 = vector.load %arg2[%c0_239, %611, %c0_240, %c0_241] : memref<1x8x4x12xf32, #tpu.memory_space<vmem>>, vector<1x1x4x12xf32>
    %613 = vector.shape_cast %612 : vector<1x1x4x12xf32> to vector<4x12xf32>
    %c0_242 = arith.constant 0 : index
    %614 = arith.index_cast %c5_i32 : i32 to index
    %c0_243 = arith.constant 0 : index
    %c0_244 = arith.constant 0 : index
    %615 = vector.load %arg3[%c0_242, %614, %c0_243, %c0_244] : memref<1x8x4x12xf32, #tpu.memory_space<vmem>>, vector<1x1x4x12xf32>
    %616 = vector.shape_cast %615 : vector<1x1x4x12xf32> to vector<4x12xf32>
    %c0_245 = arith.constant 0 : index
    %617 = arith.index_cast %c5_i32 : i32 to index
    %c0_246 = arith.constant 0 : index
    %c0_247 = arith.constant 0 : index
    %618 = vector.load %arg4[%c0_245, %617, %c0_246, %c0_247] : memref<1x8x4x12xf32, #tpu.memory_space<vmem>>, vector<1x1x4x12xf32>
    %619 = vector.shape_cast %618 : vector<1x1x4x12xf32> to vector<4x12xf32>
    %c0_248 = arith.constant 0 : index
    %620 = arith.index_cast %c5_i32 : i32 to index
    %c0_249 = arith.constant 0 : index
    %c0_250 = arith.constant 0 : index
    %621 = vector.load %arg5[%c0_248, %620, %c0_249, %c0_250] : memref<1x8x4x12xf32, #tpu.memory_space<vmem>>, vector<1x1x4x12xf32>
    %622 = vector.shape_cast %621 : vector<1x1x4x12xf32> to vector<4x12xf32>
    %cst_251 = arith.constant dense<0.000000e+00> : vector<4x32xf32>
    %623 = tpu.matmul %616, %1, %cst_251 {dimension_numbers = #tpu.dot_dimension_numbers<[1], [0], [0], [1], [0, 0, 1, 1], [], []>} : vector<4x12xf32>, vector<12x32xf32>, vector<4x32xf32> -> vector<4x32xf32>
    %624 = vector.broadcast %3 : vector<1x32xf32> to vector<4x32xf32>
    %625 = arith.addf %623, %624 : vector<4x32xf32>
    %cst_252 = arith.constant 0.000000e+00 : f32
    %626 = vector.broadcast %cst_252 : f32 to vector<4x32xf32>
    %627 = arith.maximumf %625, %626 : vector<4x32xf32>
    %cst_253 = arith.constant 0.000000e+00 : f32
    %628 = vector.broadcast %cst_253 : f32 to vector<4x32xf32>
    %629 = arith.subf %628, %627 : vector<4x32xf32>
    %630 = math.exp %629 : vector<4x32xf32>
    %631 = vector.broadcast %5 : vector<1x12xf32> to vector<4x12xf32>
    %632 = arith.mulf %616, %631 : vector<4x12xf32>
    %633 = vector.broadcast %7 : vector<1x12xf32> to vector<4x12xf32>
    %634 = arith.addf %632, %633 : vector<4x12xf32>
    %cst_254 = arith.constant 0.000000e+00 : f32
    %635 = vector.broadcast %cst_254 : f32 to vector<4x12xf32>
    %636 = arith.maximumf %634, %635 : vector<4x12xf32>
    %cst_255 = arith.constant 0.000000e+00 : f32
    %637 = vector.broadcast %cst_255 : f32 to vector<4x12xf32>
    %638 = arith.subf %637, %636 : vector<4x12xf32>
    %639 = math.exp %638 : vector<4x12xf32>
    %640 = arith.mulf %603, %630 : vector<4x32xf32>
    %cst_256 = arith.constant dense<0.000000e+00> : vector<4x12xf32>
    %641 = tpu.matmul %640, %9, %cst_256 {dimension_numbers = #tpu.dot_dimension_numbers<[1], [0], [0], [1], [0, 0, 1, 1], [], []>} : vector<4x32xf32>, vector<32x12xf32>, vector<4x12xf32> -> vector<4x12xf32>
    %642 = vector.broadcast %11 : vector<1x12xf32> to vector<4x12xf32>
    %643 = arith.addf %641, %642 : vector<4x12xf32>
    %644 = arith.mulf %613, %610 : vector<4x12xf32>
    %cst_257 = arith.constant 1.000000e+00 : f32
    %645 = vector.broadcast %cst_257 : f32 to vector<4x12xf32>
    %646 = arith.subf %645, %613 : vector<4x12xf32>
    %647 = arith.mulf %646, %643 : vector<4x12xf32>
    %648 = arith.addf %644, %647 : vector<4x12xf32>
    %cst_258 = arith.constant dense<0.000000e+00> : vector<4x12xf32>
    %649 = tpu.matmul %648, %13, %cst_258 {dimension_numbers = #tpu.dot_dimension_numbers<[1], [0], [0], [1], [0, 0, 1, 1], [], []>} : vector<4x12xf32>, vector<12x12xf32>, vector<4x12xf32> -> vector<4x12xf32>
    %650 = vector.broadcast %15 : vector<1x12xf32> to vector<4x12xf32>
    %651 = arith.addf %649, %650 : vector<4x12xf32>
    %cst_259 = arith.constant dense<0.000000e+00> : vector<4x12xf32>
    %652 = tpu.matmul %639, %17, %cst_259 {dimension_numbers = #tpu.dot_dimension_numbers<[1], [0], [0], [1], [0, 0, 1, 1], [], []>} : vector<4x12xf32>, vector<12x12xf32>, vector<4x12xf32> -> vector<4x12xf32>
    %cst_260 = arith.constant dense<0.000000e+00> : vector<4x12xf32>
    %653 = tpu.matmul %613, %19, %cst_260 {dimension_numbers = #tpu.dot_dimension_numbers<[1], [0], [0], [1], [0, 0, 1, 1], [], []>} : vector<4x12xf32>, vector<12x12xf32>, vector<4x12xf32> -> vector<4x12xf32>
    %654 = arith.addf %652, %653 : vector<4x12xf32>
    %655 = vector.broadcast %21 : vector<1x12xf32> to vector<4x12xf32>
    %656 = arith.addf %654, %655 : vector<4x12xf32>
    %657 = arith.mulf %656, %651 : vector<4x12xf32>
    %cst_261 = arith.constant 1.000000e+00 : f32
    %658 = vector.broadcast %cst_261 : f32 to vector<4x12xf32>
    %659 = arith.subf %658, %656 : vector<4x12xf32>
    %660 = arith.mulf %659, %643 : vector<4x12xf32>
    %661 = arith.addf %657, %660 : vector<4x12xf32>
    %662 = arith.mulf %646, %661 : vector<4x12xf32>
    %663 = arith.addf %644, %662 : vector<4x12xf32>
    %664 = arith.subf %619, %643 : vector<4x12xf32>
    %665 = math.absf %664 : vector<4x12xf32>
    %666 = arith.subf %619, %651 : vector<4x12xf32>
    %667 = math.absf %666 : vector<4x12xf32>
    %668 = arith.addf %665, %667 : vector<4x12xf32>
    %669 = arith.subf %619, %661 : vector<4x12xf32>
    %670 = math.absf %669 : vector<4x12xf32>
    %671 = arith.addf %668, %670 : vector<4x12xf32>
    %672 = arith.mulf %671, %622 : vector<4x12xf32>
    %673 = vector.shape_cast %622 : vector<4x12xf32> to vector<1x4x12xf32>
    %cst_262 = arith.constant dense<0.000000e+00> : vector<1xf32>
    %674 = vector.multi_reduction <add>, %673, %cst_262 [1, 2] : vector<1x4x12xf32> to vector<1xf32>
    %675 = vector.shape_cast %674 : vector<1xf32> to vector<1x1x1xf32>
    %676 = vector.extract %675[0, 0, 0] : f32 from vector<1x1x1xf32>
    %677 = vector.broadcast %676 : f32 to vector<1x1xf32>
    %cst_263 = arith.constant 9.99999974E-6 : f32
    %678 = vector.broadcast %cst_263 : f32 to vector<1x1xf32>
    %679 = arith.addf %677, %678 : vector<1x1xf32>
    %680 = vector.shape_cast %672 : vector<4x12xf32> to vector<1x4x12xf32>
    %cst_264 = arith.constant dense<0.000000e+00> : vector<1xf32>
    %681 = vector.multi_reduction <add>, %680, %cst_264 [1, 2] : vector<1x4x12xf32> to vector<1xf32>
    %682 = vector.shape_cast %681 : vector<1xf32> to vector<1x1x1xf32>
    %683 = vector.extract %682[0, 0, 0] : f32 from vector<1x1x1xf32>
    %684 = vector.broadcast %683 : f32 to vector<1x1xf32>
    %685 = arith.divf %684, %679 : vector<1x1xf32>
    %686 = arith.addf %571, %685 : vector<1x1xf32>
    %cst_265 = arith.constant dense<0.000000e+00> : vector<4x128xf32>
    %687 = tpu.matmul %663, %23, %cst_265 {dimension_numbers = #tpu.dot_dimension_numbers<[1], [0], [0], [1], [0, 0, 1, 1], [], []>} : vector<4x12xf32>, vector<12x128xf32>, vector<4x128xf32> -> vector<4x128xf32>
    %cst_266 = arith.constant dense<0.000000e+00> : vector<4x128xf32>
    %688 = tpu.matmul %613, %25, %cst_266 {dimension_numbers = #tpu.dot_dimension_numbers<[1], [0], [0], [1], [0, 0, 1, 1], [], []>} : vector<4x12xf32>, vector<12x128xf32>, vector<4x128xf32> -> vector<4x128xf32>
    %689 = arith.addf %687, %688 : vector<4x128xf32>
    %cst_267 = arith.constant dense<0.000000e+00> : vector<4x128xf32>
    %690 = tpu.matmul %640, %27, %cst_267 {dimension_numbers = #tpu.dot_dimension_numbers<[1], [0], [0], [1], [0, 0, 1, 1], [], []>} : vector<4x32xf32>, vector<32x128xf32>, vector<4x128xf32> -> vector<4x128xf32>
    %691 = arith.addf %689, %690 : vector<4x128xf32>
    %692 = vector.broadcast %29 : vector<1x128xf32> to vector<4x128xf32>
    %693 = arith.addf %691, %692 : vector<4x128xf32>
    %694 = vector.extract_strided_slice %693 {offsets = [0, 0], sizes = [4, 32], strides = [1, 1]} : vector<4x128xf32> to vector<4x32xf32>
    %695 = arith.negf %694 : vector<4x32xf32>
    %696 = math.exp %695 : vector<4x32xf32>
    %cst_268 = arith.constant 1.000000e+00 : f32
    %697 = vector.broadcast %cst_268 : f32 to vector<4x32xf32>
    %698 = arith.addf %697, %696 : vector<4x32xf32>
    %699 = arith.divf %697, %698 : vector<4x32xf32>
    %700 = vector.extract_strided_slice %693 {offsets = [0, 32], sizes = [4, 32], strides = [1, 1]} : vector<4x128xf32> to vector<4x32xf32>
    %701 = arith.negf %700 : vector<4x32xf32>
    %702 = math.exp %701 : vector<4x32xf32>
    %cst_269 = arith.constant 1.000000e+00 : f32
    %703 = vector.broadcast %cst_269 : f32 to vector<4x32xf32>
    %704 = arith.addf %703, %702 : vector<4x32xf32>
    %705 = arith.divf %703, %704 : vector<4x32xf32>
    %706 = vector.extract_strided_slice %693 {offsets = [0, 64], sizes = [4, 32], strides = [1, 1]} : vector<4x128xf32> to vector<4x32xf32>
    %707 = math.tanh %706 : vector<4x32xf32>
    %708 = vector.extract_strided_slice %693 {offsets = [0, 96], sizes = [4, 32], strides = [1, 1]} : vector<4x128xf32> to vector<4x32xf32>
    %709 = arith.negf %708 : vector<4x32xf32>
    %710 = math.exp %709 : vector<4x32xf32>
    %cst_270 = arith.constant 1.000000e+00 : f32
    %711 = vector.broadcast %cst_270 : f32 to vector<4x32xf32>
    %712 = arith.addf %711, %710 : vector<4x32xf32>
    %713 = arith.divf %711, %712 : vector<4x32xf32>
    %714 = arith.mulf %705, %601 : vector<4x32xf32>
    %715 = arith.mulf %699, %707 : vector<4x32xf32>
    %716 = arith.addf %714, %715 : vector<4x32xf32>
    %717 = math.tanh %716 : vector<4x32xf32>
    %718 = arith.mulf %713, %717 : vector<4x32xf32>
    %c0_271 = arith.constant 0 : index
    %719 = arith.index_cast %c5_i32 : i32 to index
    %c0_272 = arith.constant 0 : index
    %c0_273 = arith.constant 0 : index
    %720 = vector.load %arg21[%c0_271, %719, %c0_272, %c0_273] : memref<1x8x4x12xf32, #tpu.memory_space<vmem>>, vector<1x1x4x12xf32>
    %721 = vector.shape_cast %720 : vector<1x1x4x12xf32> to vector<4x12xf32>
    %722 = vector.shape_cast %663 : vector<4x12xf32> to vector<1x1x4x12xf32>
    tpu.vector_store %arg21[%c0_271, %719, %c0_272, %c0_273], %722 {strides = array<i32>} : memref<1x8x4x12xf32, #tpu.memory_space<vmem>>, vector<1x1x4x12xf32>,
    %c6_i32 = arith.constant 6 : i32
    %c0_274 = arith.constant 0 : index
    %723 = arith.index_cast %c6_i32 : i32 to index
    %c0_275 = arith.constant 0 : index
    %c0_276 = arith.constant 0 : index
    %724 = vector.load %arg1[%c0_274, %723, %c0_275, %c0_276] : memref<1x8x4x12xf32, #tpu.memory_space<vmem>>, vector<1x1x4x12xf32>
    %725 = vector.shape_cast %724 : vector<1x1x4x12xf32> to vector<4x12xf32>
    %c0_277 = arith.constant 0 : index
    %726 = arith.index_cast %c6_i32 : i32 to index
    %c0_278 = arith.constant 0 : index
    %c0_279 = arith.constant 0 : index
    %727 = vector.load %arg2[%c0_277, %726, %c0_278, %c0_279] : memref<1x8x4x12xf32, #tpu.memory_space<vmem>>, vector<1x1x4x12xf32>
    %728 = vector.shape_cast %727 : vector<1x1x4x12xf32> to vector<4x12xf32>
    %c0_280 = arith.constant 0 : index
    %729 = arith.index_cast %c6_i32 : i32 to index
    %c0_281 = arith.constant 0 : index
    %c0_282 = arith.constant 0 : index
    %730 = vector.load %arg3[%c0_280, %729, %c0_281, %c0_282] : memref<1x8x4x12xf32, #tpu.memory_space<vmem>>, vector<1x1x4x12xf32>
    %731 = vector.shape_cast %730 : vector<1x1x4x12xf32> to vector<4x12xf32>
    %c0_283 = arith.constant 0 : index
    %732 = arith.index_cast %c6_i32 : i32 to index
    %c0_284 = arith.constant 0 : index
    %c0_285 = arith.constant 0 : index
    %733 = vector.load %arg4[%c0_283, %732, %c0_284, %c0_285] : memref<1x8x4x12xf32, #tpu.memory_space<vmem>>, vector<1x1x4x12xf32>
    %734 = vector.shape_cast %733 : vector<1x1x4x12xf32> to vector<4x12xf32>
    %c0_286 = arith.constant 0 : index
    %735 = arith.index_cast %c6_i32 : i32 to index
    %c0_287 = arith.constant 0 : index
    %c0_288 = arith.constant 0 : index
    %736 = vector.load %arg5[%c0_286, %735, %c0_287, %c0_288] : memref<1x8x4x12xf32, #tpu.memory_space<vmem>>, vector<1x1x4x12xf32>
    %737 = vector.shape_cast %736 : vector<1x1x4x12xf32> to vector<4x12xf32>
    %cst_289 = arith.constant dense<0.000000e+00> : vector<4x32xf32>
    %738 = tpu.matmul %731, %1, %cst_289 {dimension_numbers = #tpu.dot_dimension_numbers<[1], [0], [0], [1], [0, 0, 1, 1], [], []>} : vector<4x12xf32>, vector<12x32xf32>, vector<4x32xf32> -> vector<4x32xf32>
    %739 = vector.broadcast %3 : vector<1x32xf32> to vector<4x32xf32>
    %740 = arith.addf %738, %739 : vector<4x32xf32>
    %cst_290 = arith.constant 0.000000e+00 : f32
    %741 = vector.broadcast %cst_290 : f32 to vector<4x32xf32>
    %742 = arith.maximumf %740, %741 : vector<4x32xf32>
    %cst_291 = arith.constant 0.000000e+00 : f32
    %743 = vector.broadcast %cst_291 : f32 to vector<4x32xf32>
    %744 = arith.subf %743, %742 : vector<4x32xf32>
    %745 = math.exp %744 : vector<4x32xf32>
    %746 = vector.broadcast %5 : vector<1x12xf32> to vector<4x12xf32>
    %747 = arith.mulf %731, %746 : vector<4x12xf32>
    %748 = vector.broadcast %7 : vector<1x12xf32> to vector<4x12xf32>
    %749 = arith.addf %747, %748 : vector<4x12xf32>
    %cst_292 = arith.constant 0.000000e+00 : f32
    %750 = vector.broadcast %cst_292 : f32 to vector<4x12xf32>
    %751 = arith.maximumf %749, %750 : vector<4x12xf32>
    %cst_293 = arith.constant 0.000000e+00 : f32
    %752 = vector.broadcast %cst_293 : f32 to vector<4x12xf32>
    %753 = arith.subf %752, %751 : vector<4x12xf32>
    %754 = math.exp %753 : vector<4x12xf32>
    %755 = arith.mulf %718, %745 : vector<4x32xf32>
    %cst_294 = arith.constant dense<0.000000e+00> : vector<4x12xf32>
    %756 = tpu.matmul %755, %9, %cst_294 {dimension_numbers = #tpu.dot_dimension_numbers<[1], [0], [0], [1], [0, 0, 1, 1], [], []>} : vector<4x32xf32>, vector<32x12xf32>, vector<4x12xf32> -> vector<4x12xf32>
    %757 = vector.broadcast %11 : vector<1x12xf32> to vector<4x12xf32>
    %758 = arith.addf %756, %757 : vector<4x12xf32>
    %759 = arith.mulf %728, %725 : vector<4x12xf32>
    %cst_295 = arith.constant 1.000000e+00 : f32
    %760 = vector.broadcast %cst_295 : f32 to vector<4x12xf32>
    %761 = arith.subf %760, %728 : vector<4x12xf32>
    %762 = arith.mulf %761, %758 : vector<4x12xf32>
    %763 = arith.addf %759, %762 : vector<4x12xf32>
    %cst_296 = arith.constant dense<0.000000e+00> : vector<4x12xf32>
    %764 = tpu.matmul %763, %13, %cst_296 {dimension_numbers = #tpu.dot_dimension_numbers<[1], [0], [0], [1], [0, 0, 1, 1], [], []>} : vector<4x12xf32>, vector<12x12xf32>, vector<4x12xf32> -> vector<4x12xf32>
    %765 = vector.broadcast %15 : vector<1x12xf32> to vector<4x12xf32>
    %766 = arith.addf %764, %765 : vector<4x12xf32>
    %cst_297 = arith.constant dense<0.000000e+00> : vector<4x12xf32>
    %767 = tpu.matmul %754, %17, %cst_297 {dimension_numbers = #tpu.dot_dimension_numbers<[1], [0], [0], [1], [0, 0, 1, 1], [], []>} : vector<4x12xf32>, vector<12x12xf32>, vector<4x12xf32> -> vector<4x12xf32>
    %cst_298 = arith.constant dense<0.000000e+00> : vector<4x12xf32>
    %768 = tpu.matmul %728, %19, %cst_298 {dimension_numbers = #tpu.dot_dimension_numbers<[1], [0], [0], [1], [0, 0, 1, 1], [], []>} : vector<4x12xf32>, vector<12x12xf32>, vector<4x12xf32> -> vector<4x12xf32>
    %769 = arith.addf %767, %768 : vector<4x12xf32>
    %770 = vector.broadcast %21 : vector<1x12xf32> to vector<4x12xf32>
    %771 = arith.addf %769, %770 : vector<4x12xf32>
    %772 = arith.mulf %771, %766 : vector<4x12xf32>
    %cst_299 = arith.constant 1.000000e+00 : f32
    %773 = vector.broadcast %cst_299 : f32 to vector<4x12xf32>
    %774 = arith.subf %773, %771 : vector<4x12xf32>
    %775 = arith.mulf %774, %758 : vector<4x12xf32>
    %776 = arith.addf %772, %775 : vector<4x12xf32>
    %777 = arith.mulf %761, %776 : vector<4x12xf32>
    %778 = arith.addf %759, %777 : vector<4x12xf32>
    %779 = arith.subf %734, %758 : vector<4x12xf32>
    %780 = math.absf %779 : vector<4x12xf32>
    %781 = arith.subf %734, %766 : vector<4x12xf32>
    %782 = math.absf %781 : vector<4x12xf32>
    %783 = arith.addf %780, %782 : vector<4x12xf32>
    %784 = arith.subf %734, %776 : vector<4x12xf32>
    %785 = math.absf %784 : vector<4x12xf32>
    %786 = arith.addf %783, %785 : vector<4x12xf32>
    %787 = arith.mulf %786, %737 : vector<4x12xf32>
    %788 = vector.shape_cast %737 : vector<4x12xf32> to vector<1x4x12xf32>
    %cst_300 = arith.constant dense<0.000000e+00> : vector<1xf32>
    %789 = vector.multi_reduction <add>, %788, %cst_300 [1, 2] : vector<1x4x12xf32> to vector<1xf32>
    %790 = vector.shape_cast %789 : vector<1xf32> to vector<1x1x1xf32>
    %791 = vector.extract %790[0, 0, 0] : f32 from vector<1x1x1xf32>
    %792 = vector.broadcast %791 : f32 to vector<1x1xf32>
    %cst_301 = arith.constant 9.99999974E-6 : f32
    %793 = vector.broadcast %cst_301 : f32 to vector<1x1xf32>
    %794 = arith.addf %792, %793 : vector<1x1xf32>
    %795 = vector.shape_cast %787 : vector<4x12xf32> to vector<1x4x12xf32>
    %cst_302 = arith.constant dense<0.000000e+00> : vector<1xf32>
    %796 = vector.multi_reduction <add>, %795, %cst_302 [1, 2] : vector<1x4x12xf32> to vector<1xf32>
    %797 = vector.shape_cast %796 : vector<1xf32> to vector<1x1x1xf32>
    %798 = vector.extract %797[0, 0, 0] : f32 from vector<1x1x1xf32>
    %799 = vector.broadcast %798 : f32 to vector<1x1xf32>
    %800 = arith.divf %799, %794 : vector<1x1xf32>
    %801 = arith.addf %686, %800 : vector<1x1xf32>
    %cst_303 = arith.constant dense<0.000000e+00> : vector<4x128xf32>
    %802 = tpu.matmul %778, %23, %cst_303 {dimension_numbers = #tpu.dot_dimension_numbers<[1], [0], [0], [1], [0, 0, 1, 1], [], []>} : vector<4x12xf32>, vector<12x128xf32>, vector<4x128xf32> -> vector<4x128xf32>
    %cst_304 = arith.constant dense<0.000000e+00> : vector<4x128xf32>
    %803 = tpu.matmul %728, %25, %cst_304 {dimension_numbers = #tpu.dot_dimension_numbers<[1], [0], [0], [1], [0, 0, 1, 1], [], []>} : vector<4x12xf32>, vector<12x128xf32>, vector<4x128xf32> -> vector<4x128xf32>
    %804 = arith.addf %802, %803 : vector<4x128xf32>
    %cst_305 = arith.constant dense<0.000000e+00> : vector<4x128xf32>
    %805 = tpu.matmul %755, %27, %cst_305 {dimension_numbers = #tpu.dot_dimension_numbers<[1], [0], [0], [1], [0, 0, 1, 1], [], []>} : vector<4x32xf32>, vector<32x128xf32>, vector<4x128xf32> -> vector<4x128xf32>
    %806 = arith.addf %804, %805 : vector<4x128xf32>
    %807 = vector.broadcast %29 : vector<1x128xf32> to vector<4x128xf32>
    %808 = arith.addf %806, %807 : vector<4x128xf32>
    %809 = vector.extract_strided_slice %808 {offsets = [0, 0], sizes = [4, 32], strides = [1, 1]} : vector<4x128xf32> to vector<4x32xf32>
    %810 = arith.negf %809 : vector<4x32xf32>
    %811 = math.exp %810 : vector<4x32xf32>
    %cst_306 = arith.constant 1.000000e+00 : f32
    %812 = vector.broadcast %cst_306 : f32 to vector<4x32xf32>
    %813 = arith.addf %812, %811 : vector<4x32xf32>
    %814 = arith.divf %812, %813 : vector<4x32xf32>
    %815 = vector.extract_strided_slice %808 {offsets = [0, 32], sizes = [4, 32], strides = [1, 1]} : vector<4x128xf32> to vector<4x32xf32>
    %816 = arith.negf %815 : vector<4x32xf32>
    %817 = math.exp %816 : vector<4x32xf32>
    %cst_307 = arith.constant 1.000000e+00 : f32
    %818 = vector.broadcast %cst_307 : f32 to vector<4x32xf32>
    %819 = arith.addf %818, %817 : vector<4x32xf32>
    %820 = arith.divf %818, %819 : vector<4x32xf32>
    %821 = vector.extract_strided_slice %808 {offsets = [0, 64], sizes = [4, 32], strides = [1, 1]} : vector<4x128xf32> to vector<4x32xf32>
    %822 = math.tanh %821 : vector<4x32xf32>
    %823 = vector.extract_strided_slice %808 {offsets = [0, 96], sizes = [4, 32], strides = [1, 1]} : vector<4x128xf32> to vector<4x32xf32>
    %824 = arith.negf %823 : vector<4x32xf32>
    %825 = math.exp %824 : vector<4x32xf32>
    %cst_308 = arith.constant 1.000000e+00 : f32
    %826 = vector.broadcast %cst_308 : f32 to vector<4x32xf32>
    %827 = arith.addf %826, %825 : vector<4x32xf32>
    %828 = arith.divf %826, %827 : vector<4x32xf32>
    %829 = arith.mulf %820, %716 : vector<4x32xf32>
    %830 = arith.mulf %814, %822 : vector<4x32xf32>
    %831 = arith.addf %829, %830 : vector<4x32xf32>
    %832 = math.tanh %831 : vector<4x32xf32>
    %833 = arith.mulf %828, %832 : vector<4x32xf32>
    %c0_309 = arith.constant 0 : index
    %834 = arith.index_cast %c6_i32 : i32 to index
    %c0_310 = arith.constant 0 : index
    %c0_311 = arith.constant 0 : index
    %835 = vector.load %arg21[%c0_309, %834, %c0_310, %c0_311] : memref<1x8x4x12xf32, #tpu.memory_space<vmem>>, vector<1x1x4x12xf32>
    %836 = vector.shape_cast %835 : vector<1x1x4x12xf32> to vector<4x12xf32>
    %837 = vector.shape_cast %778 : vector<4x12xf32> to vector<1x1x4x12xf32>
    tpu.vector_store %arg21[%c0_309, %834, %c0_310, %c0_311], %837 {strides = array<i32>} : memref<1x8x4x12xf32, #tpu.memory_space<vmem>>, vector<1x1x4x12xf32>,
    %c7_i32 = arith.constant 7 : i32
    %c0_312 = arith.constant 0 : index
    %838 = arith.index_cast %c7_i32 : i32 to index
    %c0_313 = arith.constant 0 : index
    %c0_314 = arith.constant 0 : index
    %839 = vector.load %arg1[%c0_312, %838, %c0_313, %c0_314] : memref<1x8x4x12xf32, #tpu.memory_space<vmem>>, vector<1x1x4x12xf32>
    %840 = vector.shape_cast %839 : vector<1x1x4x12xf32> to vector<4x12xf32>
    %c0_315 = arith.constant 0 : index
    %841 = arith.index_cast %c7_i32 : i32 to index
    %c0_316 = arith.constant 0 : index
    %c0_317 = arith.constant 0 : index
    %842 = vector.load %arg2[%c0_315, %841, %c0_316, %c0_317] : memref<1x8x4x12xf32, #tpu.memory_space<vmem>>, vector<1x1x4x12xf32>
    %843 = vector.shape_cast %842 : vector<1x1x4x12xf32> to vector<4x12xf32>
    %c0_318 = arith.constant 0 : index
    %844 = arith.index_cast %c7_i32 : i32 to index
    %c0_319 = arith.constant 0 : index
    %c0_320 = arith.constant 0 : index
    %845 = vector.load %arg3[%c0_318, %844, %c0_319, %c0_320] : memref<1x8x4x12xf32, #tpu.memory_space<vmem>>, vector<1x1x4x12xf32>
    %846 = vector.shape_cast %845 : vector<1x1x4x12xf32> to vector<4x12xf32>
    %c0_321 = arith.constant 0 : index
    %847 = arith.index_cast %c7_i32 : i32 to index
    %c0_322 = arith.constant 0 : index
    %c0_323 = arith.constant 0 : index
    %848 = vector.load %arg4[%c0_321, %847, %c0_322, %c0_323] : memref<1x8x4x12xf32, #tpu.memory_space<vmem>>, vector<1x1x4x12xf32>
    %849 = vector.shape_cast %848 : vector<1x1x4x12xf32> to vector<4x12xf32>
    %c0_324 = arith.constant 0 : index
    %850 = arith.index_cast %c7_i32 : i32 to index
    %c0_325 = arith.constant 0 : index
    %c0_326 = arith.constant 0 : index
    %851 = vector.load %arg5[%c0_324, %850, %c0_325, %c0_326] : memref<1x8x4x12xf32, #tpu.memory_space<vmem>>, vector<1x1x4x12xf32>
    %852 = vector.shape_cast %851 : vector<1x1x4x12xf32> to vector<4x12xf32>
    %cst_327 = arith.constant dense<0.000000e+00> : vector<4x32xf32>
    %853 = tpu.matmul %846, %1, %cst_327 {dimension_numbers = #tpu.dot_dimension_numbers<[1], [0], [0], [1], [0, 0, 1, 1], [], []>} : vector<4x12xf32>, vector<12x32xf32>, vector<4x32xf32> -> vector<4x32xf32>
    %854 = vector.broadcast %3 : vector<1x32xf32> to vector<4x32xf32>
    %855 = arith.addf %853, %854 : vector<4x32xf32>
    %cst_328 = arith.constant 0.000000e+00 : f32
    %856 = vector.broadcast %cst_328 : f32 to vector<4x32xf32>
    %857 = arith.maximumf %855, %856 : vector<4x32xf32>
    %cst_329 = arith.constant 0.000000e+00 : f32
    %858 = vector.broadcast %cst_329 : f32 to vector<4x32xf32>
    %859 = arith.subf %858, %857 : vector<4x32xf32>
    %860 = math.exp %859 : vector<4x32xf32>
    %861 = vector.broadcast %5 : vector<1x12xf32> to vector<4x12xf32>
    %862 = arith.mulf %846, %861 : vector<4x12xf32>
    %863 = vector.broadcast %7 : vector<1x12xf32> to vector<4x12xf32>
    %864 = arith.addf %862, %863 : vector<4x12xf32>
    %cst_330 = arith.constant 0.000000e+00 : f32
    %865 = vector.broadcast %cst_330 : f32 to vector<4x12xf32>
    %866 = arith.maximumf %864, %865 : vector<4x12xf32>
    %cst_331 = arith.constant 0.000000e+00 : f32
    %867 = vector.broadcast %cst_331 : f32 to vector<4x12xf32>
    %868 = arith.subf %867, %866 : vector<4x12xf32>
    %869 = math.exp %868 : vector<4x12xf32>
    %870 = arith.mulf %833, %860 : vector<4x32xf32>
    %cst_332 = arith.constant dense<0.000000e+00> : vector<4x12xf32>
    %871 = tpu.matmul %870, %9, %cst_332 {dimension_numbers = #tpu.dot_dimension_numbers<[1], [0], [0], [1], [0, 0, 1, 1], [], []>} : vector<4x32xf32>, vector<32x12xf32>, vector<4x12xf32> -> vector<4x12xf32>
    %872 = vector.broadcast %11 : vector<1x12xf32> to vector<4x12xf32>
    %873 = arith.addf %871, %872 : vector<4x12xf32>
    %874 = arith.mulf %843, %840 : vector<4x12xf32>
    %cst_333 = arith.constant 1.000000e+00 : f32
    %875 = vector.broadcast %cst_333 : f32 to vector<4x12xf32>
    %876 = arith.subf %875, %843 : vector<4x12xf32>
    %877 = arith.mulf %876, %873 : vector<4x12xf32>
    %878 = arith.addf %874, %877 : vector<4x12xf32>
    %cst_334 = arith.constant dense<0.000000e+00> : vector<4x12xf32>
    %879 = tpu.matmul %878, %13, %cst_334 {dimension_numbers = #tpu.dot_dimension_numbers<[1], [0], [0], [1], [0, 0, 1, 1], [], []>} : vector<4x12xf32>, vector<12x12xf32>, vector<4x12xf32> -> vector<4x12xf32>
    %880 = vector.broadcast %15 : vector<1x12xf32> to vector<4x12xf32>
    %881 = arith.addf %879, %880 : vector<4x12xf32>
    %cst_335 = arith.constant dense<0.000000e+00> : vector<4x12xf32>
    %882 = tpu.matmul %869, %17, %cst_335 {dimension_numbers = #tpu.dot_dimension_numbers<[1], [0], [0], [1], [0, 0, 1, 1], [], []>} : vector<4x12xf32>, vector<12x12xf32>, vector<4x12xf32> -> vector<4x12xf32>
    %cst_336 = arith.constant dense<0.000000e+00> : vector<4x12xf32>
    %883 = tpu.matmul %843, %19, %cst_336 {dimension_numbers = #tpu.dot_dimension_numbers<[1], [0], [0], [1], [0, 0, 1, 1], [], []>} : vector<4x12xf32>, vector<12x12xf32>, vector<4x12xf32> -> vector<4x12xf32>
    %884 = arith.addf %882, %883 : vector<4x12xf32>
    %885 = vector.broadcast %21 : vector<1x12xf32> to vector<4x12xf32>
    %886 = arith.addf %884, %885 : vector<4x12xf32>
    %887 = arith.mulf %886, %881 : vector<4x12xf32>
    %cst_337 = arith.constant 1.000000e+00 : f32
    %888 = vector.broadcast %cst_337 : f32 to vector<4x12xf32>
    %889 = arith.subf %888, %886 : vector<4x12xf32>
    %890 = arith.mulf %889, %873 : vector<4x12xf32>
    %891 = arith.addf %887, %890 : vector<4x12xf32>
    %892 = arith.mulf %876, %891 : vector<4x12xf32>
    %893 = arith.addf %874, %892 : vector<4x12xf32>
    %894 = arith.subf %849, %873 : vector<4x12xf32>
    %895 = math.absf %894 : vector<4x12xf32>
    %896 = arith.subf %849, %881 : vector<4x12xf32>
    %897 = math.absf %896 : vector<4x12xf32>
    %898 = arith.addf %895, %897 : vector<4x12xf32>
    %899 = arith.subf %849, %891 : vector<4x12xf32>
    %900 = math.absf %899 : vector<4x12xf32>
    %901 = arith.addf %898, %900 : vector<4x12xf32>
    %902 = arith.mulf %901, %852 : vector<4x12xf32>
    %903 = vector.shape_cast %852 : vector<4x12xf32> to vector<1x4x12xf32>
    %cst_338 = arith.constant dense<0.000000e+00> : vector<1xf32>
    %904 = vector.multi_reduction <add>, %903, %cst_338 [1, 2] : vector<1x4x12xf32> to vector<1xf32>
    %905 = vector.shape_cast %904 : vector<1xf32> to vector<1x1x1xf32>
    %906 = vector.extract %905[0, 0, 0] : f32 from vector<1x1x1xf32>
    %907 = vector.broadcast %906 : f32 to vector<1x1xf32>
    %cst_339 = arith.constant 9.99999974E-6 : f32
    %908 = vector.broadcast %cst_339 : f32 to vector<1x1xf32>
    %909 = arith.addf %907, %908 : vector<1x1xf32>
    %910 = vector.shape_cast %902 : vector<4x12xf32> to vector<1x4x12xf32>
    %cst_340 = arith.constant dense<0.000000e+00> : vector<1xf32>
    %911 = vector.multi_reduction <add>, %910, %cst_340 [1, 2] : vector<1x4x12xf32> to vector<1xf32>
    %912 = vector.shape_cast %911 : vector<1xf32> to vector<1x1x1xf32>
    %913 = vector.extract %912[0, 0, 0] : f32 from vector<1x1x1xf32>
    %914 = vector.broadcast %913 : f32 to vector<1x1xf32>
    %915 = arith.divf %914, %909 : vector<1x1xf32>
    %916 = arith.addf %801, %915 : vector<1x1xf32>
    %cst_341 = arith.constant dense<0.000000e+00> : vector<4x128xf32>
    %917 = tpu.matmul %893, %23, %cst_341 {dimension_numbers = #tpu.dot_dimension_numbers<[1], [0], [0], [1], [0, 0, 1, 1], [], []>} : vector<4x12xf32>, vector<12x128xf32>, vector<4x128xf32> -> vector<4x128xf32>
    %cst_342 = arith.constant dense<0.000000e+00> : vector<4x128xf32>
    %918 = tpu.matmul %843, %25, %cst_342 {dimension_numbers = #tpu.dot_dimension_numbers<[1], [0], [0], [1], [0, 0, 1, 1], [], []>} : vector<4x12xf32>, vector<12x128xf32>, vector<4x128xf32> -> vector<4x128xf32>
    %919 = arith.addf %917, %918 : vector<4x128xf32>
    %cst_343 = arith.constant dense<0.000000e+00> : vector<4x128xf32>
    %920 = tpu.matmul %870, %27, %cst_343 {dimension_numbers = #tpu.dot_dimension_numbers<[1], [0], [0], [1], [0, 0, 1, 1], [], []>} : vector<4x32xf32>, vector<32x128xf32>, vector<4x128xf32> -> vector<4x128xf32>
    %921 = arith.addf %919, %920 : vector<4x128xf32>
    %922 = vector.broadcast %29 : vector<1x128xf32> to vector<4x128xf32>
    %923 = arith.addf %921, %922 : vector<4x128xf32>
    %924 = vector.extract_strided_slice %923 {offsets = [0, 0], sizes = [4, 32], strides = [1, 1]} : vector<4x128xf32> to vector<4x32xf32>
    %925 = arith.negf %924 : vector<4x32xf32>
    %926 = math.exp %925 : vector<4x32xf32>
    %cst_344 = arith.constant 1.000000e+00 : f32
    %927 = vector.broadcast %cst_344 : f32 to vector<4x32xf32>
    %928 = arith.addf %927, %926 : vector<4x32xf32>
    %929 = arith.divf %927, %928 : vector<4x32xf32>
    %930 = vector.extract_strided_slice %923 {offsets = [0, 32], sizes = [4, 32], strides = [1, 1]} : vector<4x128xf32> to vector<4x32xf32>
    %931 = arith.negf %930 : vector<4x32xf32>
    %932 = math.exp %931 : vector<4x32xf32>
    %cst_345 = arith.constant 1.000000e+00 : f32
    %933 = vector.broadcast %cst_345 : f32 to vector<4x32xf32>
    %934 = arith.addf %933, %932 : vector<4x32xf32>
    %935 = arith.divf %933, %934 : vector<4x32xf32>
    %936 = vector.extract_strided_slice %923 {offsets = [0, 64], sizes = [4, 32], strides = [1, 1]} : vector<4x128xf32> to vector<4x32xf32>
    %937 = math.tanh %936 : vector<4x32xf32>
    %938 = vector.extract_strided_slice %923 {offsets = [0, 96], sizes = [4, 32], strides = [1, 1]} : vector<4x128xf32> to vector<4x32xf32>
    %939 = arith.negf %938 : vector<4x32xf32>
    %940 = math.exp %939 : vector<4x32xf32>
    %cst_346 = arith.constant 1.000000e+00 : f32
    %941 = vector.broadcast %cst_346 : f32 to vector<4x32xf32>
    %942 = arith.addf %941, %940 : vector<4x32xf32>
    %943 = arith.divf %941, %942 : vector<4x32xf32>
    %944 = arith.mulf %935, %831 : vector<4x32xf32>
    %945 = arith.mulf %929, %937 : vector<4x32xf32>
    %946 = arith.addf %944, %945 : vector<4x32xf32>
    %947 = math.tanh %946 : vector<4x32xf32>
    %948 = arith.mulf %943, %947 : vector<4x32xf32>
    %c0_347 = arith.constant 0 : index
    %949 = arith.index_cast %c7_i32 : i32 to index
    %c0_348 = arith.constant 0 : index
    %c0_349 = arith.constant 0 : index
    %950 = vector.load %arg21[%c0_347, %949, %c0_348, %c0_349] : memref<1x8x4x12xf32, #tpu.memory_space<vmem>>, vector<1x1x4x12xf32>
    %951 = vector.shape_cast %950 : vector<1x1x4x12xf32> to vector<4x12xf32>
    %952 = vector.shape_cast %893 : vector<4x12xf32> to vector<1x1x4x12xf32>
    tpu.vector_store %arg21[%c0_347, %949, %c0_348, %c0_349], %952 {strides = array<i32>} : memref<1x8x4x12xf32, #tpu.memory_space<vmem>>, vector<1x1x4x12xf32>,
    %c8_i32 = arith.constant 8 : i32
    %c0_350 = arith.constant 0 : index
    %c0_351 = arith.constant 0 : index
    %c0_352 = arith.constant 0 : index
    %953 = vector.load %arg22[%c0_350, %c0_351, %c0_352] : memref<1x1x1xf32, #tpu.memory_space<vmem>>, vector<1x1x1xf32>
    %954 = vector.shape_cast %953 : vector<1x1x1xf32> to vector<1x1xf32>
    %955 = vector.shape_cast %916 : vector<1x1xf32> to vector<1x1x1xf32>
    tpu.vector_store %arg22[%c0_350, %c0_351, %c0_352], %955 {strides = array<i32>} : memref<1x1x1xf32, #tpu.memory_space<vmem>>, vector<1x1x1xf32>,
    return
  }
  func.func @transform_0(%arg0: i32) -> (i32, i32, i32, i32) {
    %c0_i32 = arith.constant 0 : i32
    %c0_i32_0 = arith.constant 0 : i32
    %c0_i32_1 = arith.constant 0 : i32
    %c0_i32_2 = arith.constant 0 : i32
    return %arg0, %c0_i32, %c0_i32_0, %c0_i32_1 : i32, i32, i32, i32
  }
  func.func @transform_1(%arg0: i32) -> (i32, i32, i32, i32) {
    %c0_i32 = arith.constant 0 : i32
    %c0_i32_0 = arith.constant 0 : i32
    %c0_i32_1 = arith.constant 0 : i32
    %c0_i32_2 = arith.constant 0 : i32
    return %arg0, %c0_i32, %c0_i32_0, %c0_i32_1 : i32, i32, i32, i32
  }
  func.func @transform_2(%arg0: i32) -> (i32, i32, i32, i32) {
    %c0_i32 = arith.constant 0 : i32
    %c0_i32_0 = arith.constant 0 : i32
    %c0_i32_1 = arith.constant 0 : i32
    %c0_i32_2 = arith.constant 0 : i32
    return %arg0, %c0_i32, %c0_i32_0, %c0_i32_1 : i32, i32, i32, i32
  }
  func.func @transform_3(%arg0: i32) -> (i32, i32, i32, i32) {
    %c0_i32 = arith.constant 0 : i32
    %c0_i32_0 = arith.constant 0 : i32
    %c0_i32_1 = arith.constant 0 : i32
    %c0_i32_2 = arith.constant 0 : i32
    return %arg0, %c0_i32, %c0_i32_0, %c0_i32_1 : i32, i32, i32, i32
  }
  func.func @transform_4(%arg0: i32) -> (i32, i32, i32, i32) {
    %c0_i32 = arith.constant 0 : i32
    %c0_i32_0 = arith.constant 0 : i32
    %c0_i32_1 = arith.constant 0 : i32
    %c0_i32_2 = arith.constant 0 : i32
    return %arg0, %c0_i32, %c0_i32_0, %c0_i32_1 : i32, i32, i32, i32
  }
  func.func @transform_5(%arg0: i32) -> (i32, i32, i32) {
    %c0_i32 = arith.constant 0 : i32
    %c0_i32_0 = arith.constant 0 : i32
    %c0_i32_1 = arith.constant 0 : i32
    return %arg0, %c0_i32, %c0_i32_0 : i32, i32, i32
  }
  func.func @transform_6(%arg0: i32) -> (i32, i32, i32) {
    %c0_i32 = arith.constant 0 : i32
    %c0_i32_0 = arith.constant 0 : i32
    %c0_i32_1 = arith.constant 0 : i32
    return %arg0, %c0_i32, %c0_i32_0 : i32, i32, i32
  }
  func.func @transform_7(%arg0: i32) -> (i32, i32, i32) {
    %c0_i32 = arith.constant 0 : i32
    %c0_i32_0 = arith.constant 0 : i32
    %c0_i32_1 = arith.constant 0 : i32
    return %arg0, %c0_i32, %c0_i32_0 : i32, i32, i32
  }
  func.func @transform_8(%arg0: i32) -> (i32, i32, i32) {
    %c0_i32 = arith.constant 0 : i32
    %c0_i32_0 = arith.constant 0 : i32
    %c0_i32_1 = arith.constant 0 : i32
    return %arg0, %c0_i32, %c0_i32_0 : i32, i32, i32
  }
  func.func @transform_9(%arg0: i32) -> (i32, i32, i32) {
    %c0_i32 = arith.constant 0 : i32
    %c0_i32_0 = arith.constant 0 : i32
    %c0_i32_1 = arith.constant 0 : i32
    return %arg0, %c0_i32, %c0_i32_0 : i32, i32, i32
  }
  func.func @transform_10(%arg0: i32) -> (i32, i32, i32) {
    %c0_i32 = arith.constant 0 : i32
    %c0_i32_0 = arith.constant 0 : i32
    %c0_i32_1 = arith.constant 0 : i32
    return %arg0, %c0_i32, %c0_i32_0 : i32, i32, i32
  }
  func.func @transform_11(%arg0: i32) -> (i32, i32, i32) {
    %c0_i32 = arith.constant 0 : i32
    %c0_i32_0 = arith.constant 0 : i32
    %c0_i32_1 = arith.constant 0 : i32
    return %arg0, %c0_i32, %c0_i32_0 : i32, i32, i32
  }
  func.func @transform_12(%arg0: i32) -> (i32, i32, i32) {
    %c0_i32 = arith.constant 0 : i32
    %c0_i32_0 = arith.constant 0 : i32
    %c0_i32_1 = arith.constant 0 : i32
    return %arg0, %c0_i32, %c0_i32_0 : i32, i32, i32
  }
  func.func @transform_13(%arg0: i32) -> (i32, i32, i32) {
    %c0_i32 = arith.constant 0 : i32
    %c0_i32_0 = arith.constant 0 : i32
    %c0_i32_1 = arith.constant 0 : i32
    return %arg0, %c0_i32, %c0_i32_0 : i32, i32, i32
  }
  func.func @transform_14(%arg0: i32) -> (i32, i32, i32) {
    %c0_i32 = arith.constant 0 : i32
    %c0_i32_0 = arith.constant 0 : i32
    %c0_i32_1 = arith.constant 0 : i32
    return %arg0, %c0_i32, %c0_i32_0 : i32, i32, i32
  }
  func.func @transform_15(%arg0: i32) -> (i32, i32, i32) {
    %c0_i32 = arith.constant 0 : i32
    %c0_i32_0 = arith.constant 0 : i32
    %c0_i32_1 = arith.constant 0 : i32
    return %arg0, %c0_i32, %c0_i32_0 : i32, i32, i32
  }
  func.func @transform_16(%arg0: i32) -> (i32, i32, i32) {
    %c0_i32 = arith.constant 0 : i32
    %c0_i32_0 = arith.constant 0 : i32
    %c0_i32_1 = arith.constant 0 : i32
    return %arg0, %c0_i32, %c0_i32_0 : i32, i32, i32
  }
  func.func @transform_17(%arg0: i32) -> (i32, i32, i32) {
    %c0_i32 = arith.constant 0 : i32
    %c0_i32_0 = arith.constant 0 : i32
    %c0_i32_1 = arith.constant 0 : i32
    return %arg0, %c0_i32, %c0_i32_0 : i32, i32, i32
  }
  func.func @transform_18(%arg0: i32) -> (i32, i32, i32) {
    %c0_i32 = arith.constant 0 : i32
    %c0_i32_0 = arith.constant 0 : i32
    %c0_i32_1 = arith.constant 0 : i32
    return %arg0, %c0_i32, %c0_i32_0 : i32, i32, i32
  }
  func.func @transform_19(%arg0: i32) -> (i32, i32, i32) {
    %c0_i32 = arith.constant 0 : i32
    %c0_i32_0 = arith.constant 0 : i32
    %c0_i32_1 = arith.constant 0 : i32
    return %arg0, %c0_i32, %c0_i32_0 : i32, i32, i32
  }
  func.func @transform_20(%arg0: i32) -> (i32, i32, i32, i32) {
    %c0_i32 = arith.constant 0 : i32
    %c0_i32_0 = arith.constant 0 : i32
    %c0_i32_1 = arith.constant 0 : i32
    %c0_i32_2 = arith.constant 0 : i32
    return %arg0, %c0_i32, %c0_i32_0, %c0_i32_1 : i32, i32, i32, i32
  }
  func.func @transform_21(%arg0: i32) -> (i32, i32, i32) {
    %c0_i32 = arith.constant 0 : i32
    %c0_i32_0 = arith.constant 0 : i32
    %c0_i32_1 = arith.constant 0 : i32
    return %arg0, %c0_i32, %c0_i32_0 : i32, i32, i32
  }
}

</mosaic_0001>

<bundles_post_ra>
// kernel: tpu_custom_call.1
= control target key start
LH: loop header
LB: loop body
LE: loop exit
PB: predicated region body
PF: predicated region fallthrough
CT: control target
= control target key end

     0   :  { %s9728_s0 = inlined_call_operand.vmem [shape: f32[2,8,4,12], index: 0, kind: input, shape index: {}]   ;;  %s9729_s1 = inlined_call_operand.vmem [shape: f32[2,8,4,12], index: 1, kind: input, shape index: {}]   ;;  %s9730_s2 = inlined_call_operand.vmem [shape: f32[2,8,4,12], index: 2, kind: input, shape index: {}]   ;;  %s9731_s3 = inlined_call_operand.vmem [shape: f32[2,8,4,12], index: 3, kind: input, shape index: {}]   ;;  %s9732_s4 = inlined_call_operand.vmem [shape: f32[2,8,4,12], index: 4, kind: input, shape index: {}]   ;;  %s9733_s5 = inlined_call_operand.vmem [shape: f32[2,12,32], index: 5, kind: input, shape index: {}]   ;;  %s9734_s6 = inlined_call_operand.hbm [shape: f32[2,1,32], index: 6, kind: input, shape index: {}]   ;;  %s9735_s7 = inlined_call_operand.hbm [shape: f32[2,1,12], index: 7, kind: input, shape index: {}]   ;;  %s9736_s8 = inlined_call_operand.hbm [shape: f32[2,1,12], index: 8, kind: input, shape index: {}]   ;;  %s9737_s9 = inlined_call_operand.vmem [shape: f32[2,32,12], index: 9, kind: input, shape index: {}]   ;;  %s9738_s10 = inlined_call_operand.hbm [shape: f32[2,1,12], index: 10, kind: input, shape index: {}]   ;;  %s9739_s11 = inlined_call_operand.vmem [shape: f32[2,12,12], index: 11, kind: input, shape index: {}]   ;;  %s9740_s12 = inlined_call_operand.hbm [shape: f32[2,1,12], index: 12, kind: input, shape index: {}]   ;;  %s9741_s13 = inlined_call_operand.vmem [shape: f32[2,12,12], index: 13, kind: input, shape index: {}]   ;;  %s9742_s14 = inlined_call_operand.vmem [shape: f32[2,12,12], index: 14, kind: input, shape index: {}]   ;;  %s9743_s15 = inlined_call_operand.hbm [shape: f32[2,1,12], index: 15, kind: input, shape index: {}]   ;;  %s9744_s16 = inlined_call_operand.vmem [shape: f32[2,12,128], index: 16, kind: input, shape index: {}]   ;;  %s9745_s17 = inlined_call_operand.vmem [shape: f32[2,12,128], index: 17, kind: input, shape index: {}]   ;;  %s9746_s18 = inlined_call_operand.vmem [shape: f32[2,32,128], index: 18, kind: input, shape index: {}]   ;;  %s9747_s19 = inlined_call_operand.vmem [shape: f32[2,1,128], index: 19, kind: input, shape index: {}]   ;;  %s9748_s20 = inlined_call_operand.hbm [shape: f32[2,8,4,12], index: 20, kind: output, shape index: {0}]   ;;  %s9749_s21 = inlined_call_operand.vmem [shape: f32[2,1,1], index: 21, kind: output, shape index: {1}]  }
   0x1   :  { %9765 = sst [smem:[#allocation26_spill]] %s9728_s0 }
   0x2   :  { %9766 = sst [smem:[#allocation27_spill]] %s9729_s1 }
   0x3   :  { %9767 = sst [smem:[#allocation28_spill]] %s9730_s2 }
   0x4   :  { %9768 = sst [smem:[#allocation29_spill]] %s9731_s3 }
   0x5   :  { %9769 = sst [smem:[#allocation30_spill]] %s9732_s4 }
   0x6   :  { %9770 = sst [smem:[#allocation31_spill]] %s9733_s5 }
   0x7   :  { %9771 = sst [smem:[#allocation32_spill]] %s9735_s7 }
   0x8   :  { %9772 = sst [smem:[#allocation33_spill]] %s9738_s10 }
   0x9   :  { %9773 = sst [smem:[#allocation34_spill]] %s9744_s16 }
   0xa   :  { %9774 = sst [smem:[#allocation35_spill]] %s9746_s18 }
   0xb   :  { %9775 = sst [smem:[#allocation36_spill]] %s9747_s19 }
   0xc   :  { %9776 = sst [smem:[#allocation37_spill]] %s9748_s20 }
   0xd   :  { %9777 = sst [smem:[#allocation38_spill]] %s9749_s21 }
   0xe   :  { %27 = vsyncpa [#allocation3], 0 }
   0xf   :  { %29 = vsyncpa [#allocation3 + $0x1], 0 }
  0x10   :  { %30 = vsyncpa [#allocation6], 0 }
  0x11   :  { %32 = vsyncpa [#allocation6 + $0x1], 0 }
  0x12   :  { %33 = vsyncpa [#allocation9], 0 }
  0x13   :  { %35 = vsyncpa [#allocation9 + $0x1], 0 }
  0x14   :  { %36 = vsyncpa [#allocation12], 0 }
  0x15   :  { %38 = vsyncpa [#allocation12 + $0x1], 0 }
  0x16   :  { %39 = vsyncpa [#allocation4], 0 }
  0x17   :  { %41 = vsyncpa [#allocation4 + $0x1], 0  ;;  %s8558_s2 = smov 0   ;;  %s8560_s25 = smov 0  }
  0x18   :  { %s8562_s26 = smov 0   ;;  %s8564_s27 = smov 0  }
  0x19 LB: > { %9778 = sst [smem:[#allocation19_spill]] %s8419_s2  ;;  %s8579_s3 = sadd.s32 4294967295, %s8431_s27   ;;  %s8431_s27 = sphi %s8564_s27, %s9824_s27   ;;  %s8427_s26 = sphi %s8562_s26, %s9826_s26   ;;  %s8423_s25 = sphi %s8560_s25, %s9828_s25   ;;  %s8419_s2 = sphi %s8558_s2, %s9827_s2  }
  0x1a   : > { %9779 = sst [smem:[#allocation20_spill]] %s8427_s26  ;;  %s6758_s28 = sadd.s32 4294967294, %s8431_s27  }
  0x1b   : > { %9780 = sst [smem:[#allocation21_spill]] %s8431_s27  ;;  %s8583_s29 = sadd.s32 1, %s8431_s27  }
  0x1c   : > { %9781 = sst [smem:[#allocation22_spill]] %s8583_s29  ;;  %s210_s0 = sadd.s32 1, %s8427_s26 }
  0x1d   : > { %s207_s4 = ssub.s32 %s8431_s27, %s8583_s29  ;;  %p217_p0 = scmp.ne.s32.totalorder %s8427_s26, %s8423_s25 }
  0x1e   : > { %p208_p1 = scmp.eq.s32.totalorder %s207_s4, 0  ;;  %p218_p2 = scmp.eq.s32.totalorder %s8431_s27, 0 }
  0x1f   : > { %p223_p3 = scmp.ne.s32.totalorder %s8423_s25, %s8419_s2  ;;  %p224_p4 = scmp.eq.s32.totalorder %s8579_s3, 0 }
  0x20   : > { %s8595_s30 = scalar_select %p208_p1, %s8427_s26, %s210_s0  }
  0x21   : > { %p219_p5 = por %p218_p2, %p217_p0  ;;  %p8597_p6 = por %p224_p4, %p223_p3 }
  0x22   : > { %9782 = sst [smem:[#allocation23_spill]] %s8595_s30  ;;  %p585_p7 = scmp.eq.s32.totalorder %s8579_s3, 1 }
  0x23   : > { %s9783_s5 = scalar_select %p8597_p6, 1, 0 }
  0x24   : > { %p591_p8 = scmp.eq.s32.totalorder %s6758_s28, 1  ;;  %p8020_p10 = scmp.lt.s32.totalorder %s8431_s27, 2 }
  0x25   : > { %p8604_p11 = por %p585_p7, %p217_p0  ;;  %s8613_s1 = sand.u32 1, %s8427_s26  }
  0x26   : > { %p8608_p12 = por %p591_p8, %p223_p3  ;;  %s8616_s24 = sshll.u32 %s8431_s27, 4 }
  0x27   : > { %s9784_s22 = scalar_select %p8604_p11, 1, 0 }
  0x28   : > { %s9786_s23 = scalar_select %p8608_p12, 1, 0 }
  0x29   : > { %9785 = sst [smem:[#allocation24_spill]] %s9784_s22  ;;  %p8618_p13 = pnand %p8020_p10, %p219_p5 }
  0x2a   : > { %9787 = sst [smem:[#allocation25_spill]] %s9786_s23  ;;  %s9758_s28 = sand.u32 1, %s8431_s27  }
  0x2b   : > { %s9788_s0 = scalar_select %p8618_p13, 1, 0 }
  0x2c   : > { %s9789_s7 = sld [smem:[#allocation32_spill]]  ;;  %s705_s26 = scalar_lea.vmem [#allocation5], %s8613_s1 }
  0x2d   : > { %s712_s23 = sshll.u32 %s705_s26, 4  ;;  %s8636_s2 = scalar_lea.sflag [#allocation6], %s9758_s28  ;;  %s8631_s23 = int_to_ptr.vmem [resolvable:$true] %s712_s23 }
  0x2e   : > { %p8642_p3 = pneg %p8618_p13 }
  0x32   : > { %s8627_s29 = scalar_lea.hbm %s9789_s7, %s8616_s24  ;;  %s8178_s20 = scalar_lea.hbm %s9789_s7, 32 }
  0x33   : > { %s8173_s21 = scalar_lea.hbm %s8627_s29, 16  ;;  %p8179_p7 = scmp.lt.u32.totalorder %s8627_s29, %s9789_s7 }
  0x34   : > { %p8174_p2 = scmp.ne.s32.totalorder %s8627_s29, %s8173_s21  ;;  %p8180_p8 = scmp.lt.u32.totalorder %s8178_s20, %s8173_s21 }
  0x35   : > { %p8182_p9 = scmp.lt.u32.totalorder %s8173_s21, %s8627_s29 }
  0x36   : > { %p8176_p4 = pnand %p8642_p3, %p8174_p2  ;;  %p8181_p10 = por %p8180_p8, %p8179_p7 }
  0x38   : > { %p8177_p5 = pneg %p8176_p4  ;;  %p8183_p0 = por %p8182_p9, %p8181_p10 }
  0x3a   : > { %p8184_p1 = pnand %p8183_p0, %p8177_p5 }
  0x3c   : > { %8187 = shalt.err (!%p8184_p1)
}
  0x3d   : > { %s8188_s28 = scalar_lea.vmem %s8631_s23, 16  ;;  %s8433_s4 = smov [#allocation5]  }
  0x3e   : > { %p8189_p2 = scmp.ne.s32.totalorder %s8631_s23, %s8188_s28  ;;  %s8193_s26 = sshll.u32 %s8433_s4, 4  ;;  %s8194_s26 = int_to_ptr.vmem [resolvable:$false] %s8193_s26 }
  0x3f   : > { %s8195_s19 = scalar_lea.vmem %s8194_s26, 32  ;;  %p8196_p11 = scmp.lt.s32.totalorder %s8631_s23, %s8194_s26 }
  0x40   : > { %p8191_p4 = pnand %p8189_p2, %p8642_p3  ;;  %p8197_p6 = scmp.lt.s32.totalorder %s8195_s19, %s8188_s28 }
  0x42   : > { %p8192_p12 = pneg %p8191_p4  ;;  %p8198_p7 = por %p8197_p6, %p8196_p11 }
  0x44   : > { %p8199_p8 = pnand %p8198_p7, %p8192_p12 }
  0x46   : > { %8202 = shalt.err (!%p8199_p8)
}
  0x47   : > { %8003 = dma.hbm_to_vmem [thread:$0]  (!%p8618_p13), %s8627_s29, 16, %s8631_s23, %s8636_s2  }
  0x48   : > { %p9791_p9 = scmp.lt.s32.totalorder %s8431_s27, 3  ;;  %p9792_p0 = scmp.ge.s32.totalorder %s8431_s27, 1 }
  0x49   : > { %s9794_s10 = sld [smem:[#allocation33_spill]]  ;;  %s747_s4 = scalar_lea.vmem [#allocation8], %s8613_s1 }
  0x4a   : > { %p8670_p1 = pnand %p9792_p0, %p9791_p9  ;;  %s754_s26 = sshll.u32 %s747_s4, 4  ;;  %s755_s26 = int_to_ptr.vmem [resolvable:$true] %s754_s26 }
  0x4b   : > { %s9795_s19 = sand.u32 1, %s8431_s27  }
  0x4c   : > { %s9793_s20 = scalar_select %p8670_p1, 1, 0 }
  0x4d   : > { %s8683_s29 = scalar_lea.sflag [#allocation9], %s9795_s19 }
  0x4f   : > { %s8678_s28 = scalar_lea.hbm %s9794_s10, %s8616_s24  ;;  %s8208_s21 = scalar_lea.hbm %s9794_s10, 32 }
  0x50   : > { %s8203_s23 = scalar_lea.hbm %s8678_s28, 16  ;;  %p8209_p5 = scmp.lt.u32.totalorder %s8678_s28, %s9794_s10 }
  0x51   : > { %p8204_p6 = scmp.ne.s32.totalorder %s8678_s28, %s8203_s23  ;;  %p8210_p10 = scmp.lt.u32.totalorder %s8208_s21, %s8203_s23 }
  0x52   : > { %p8212_p4 = scmp.lt.u32.totalorder %s8203_s23, %s8678_s28 }
  0x53   : > { %p8206_p11 = pnand %p8204_p6, %p8642_p3  ;;  %p8211_p2 = por %p8210_p10, %p8209_p5 }
  0x55   : > { %p8207_p12 = pneg %p8206_p11  ;;  %p8213_p7 = por %p8212_p4, %p8211_p2 }
  0x57   : > { %p8214_p8 = pnand %p8213_p7, %p8207_p12 }
  0x59   : > { %8217 = shalt.err (!%p8214_p8)
}
  0x5a   : > { %s8218_s4 = scalar_lea.vmem %s755_s26, 16  ;;  %s8434_s19 = smov [#allocation8]  }
  0x5b   : > { %p8219_p9 = scmp.ne.s32.totalorder %s755_s26, %s8218_s4  ;;  %s8223_s27 = sshll.u32 %s8434_s19, 4  ;;  %s8224_s27 = int_to_ptr.vmem [resolvable:$false] %s8223_s27 }
  0x5c   : > { %s8225_s7 = scalar_lea.vmem %s8224_s27, 32  ;;  %p8226_p11 = scmp.lt.s32.totalorder %s755_s26, %s8224_s27 }
  0x5d   : > { %p8221_p0 = pnand %p8219_p9, %p8642_p3  ;;  %p8227_p1 = scmp.lt.s32.totalorder %s8225_s7, %s8218_s4 }
  0x5f   : > { %p8222_p6 = pneg %p8221_p0  ;;  %p8228_p13 = por %p8227_p1, %p8226_p11 }
  0x61   : > { %p8229_p5 = pnand %p8228_p13, %p8222_p6 }
  0x63   : > { %8232 = shalt.err (!%p8229_p5)
}
  0x64   : > { %p9796_p10 = scmp.ne.s32.totalorder %s9788_s0, 0  ;;  %s8707_s23 = scalar_lea.hbm %s9734_s6, %s8616_s24 }
  0x65   : > { %s688_s27 = scalar_lea.vmem [#allocation2], %s8613_s1  ;;  %s686_s22 = scalar_lea.sflag [#allocation3], %s8613_s1 }
  0x66   : > { %8009 = dma.hbm_to_vmem [thread:$0]  (!%p9796_p10), %s8678_s28, 16, %s755_s26, %s8683_s29  }
  0x67   : > { %s695_s21 = sshll.u32 %s688_s27, 4  ;;  %s8233_s4 = scalar_lea.hbm %s8707_s23, 16  ;;  %s696_s21 = int_to_ptr.vmem [resolvable:$true] %s695_s21 }
  0x68   : > { %p8234_p13 = scmp.ne.s32.totalorder %s8707_s23, %s8233_s4  ;;  %s8238_s26 = scalar_lea.hbm %s9734_s6, 32 }
  0x69   : > { %p8239_p2 = scmp.lt.u32.totalorder %s8707_s23, %s9734_s6  ;;  %p8240_p4 = scmp.lt.u32.totalorder %s8238_s26, %s8233_s4 }
  0x6a   : > { %p8236_p1 = pnand %p8234_p13, %p8642_p3  ;;  %p8242_p8 = scmp.lt.u32.totalorder %s8233_s4, %s8707_s23 }
  0x6b   : > { %p8241_p7 = por %p8240_p4, %p8239_p2 }
  0x6c   : > { %p8237_p12 = pneg %p8236_p1 }
  0x6d   : > { %p8243_p9 = por %p8242_p8, %p8241_p7 }
  0x6f   : > { %p8244_p0 = pnand %p8243_p9, %p8237_p12 }
  0x71   : > { %8247 = shalt.err (!%p8244_p0)
}
  0x72   : > { %s8248_s18 = scalar_lea.vmem %s696_s21, 16  ;;  %s8435_s27 = smov [#allocation2]  }
  0x73   : > { %p8249_p6 = scmp.ne.s32.totalorder %s696_s21, %s8248_s18  ;;  %s8253_s10 = sshll.u32 %s8435_s27, 4  ;;  %s8254_s10 = int_to_ptr.vmem [resolvable:$false] %s8253_s10 }
  0x74   : > { %s8255_s19 = scalar_lea.vmem %s8254_s10, 32  ;;  %p8256_p13 = scmp.lt.s32.totalorder %s696_s21, %s8254_s10 }
  0x75   : > { %p8251_p11 = pnand %p8249_p6, %p8642_p3  ;;  %p8257_p1 = scmp.lt.s32.totalorder %s8255_s19, %s8248_s18 }
  0x77   : > { %p8252_p5 = pneg %p8251_p11  ;;  %p8258_p10 = por %p8257_p1, %p8256_p13 }
  0x79   : > { %p8259_p2 = pnand %p8258_p10, %p8252_p5 }
  0x7b   : > { %8262 = shalt.err (!%p8259_p2)
}
  0x7c   : > { %p9797_p4 = scmp.ne.s32.totalorder %s9788_s0, 0  ;;  %s8732_s26 = scalar_lea.hbm %s9736_s8, %s8616_s24 }
  0x7d   : > { %s722_s10 = scalar_lea.vmem [#allocation7], %s8613_s1  ;;  %s8263_s16 = scalar_lea.hbm %s8732_s26, 16 }
  0x7e   : > { %8000 = dma.hbm_to_vmem [thread:$0]  (!%p9797_p4), %s8707_s23, 16, %s696_s21, %s686_s22  }
  0x7f   : > { %s729_s7 = sshll.u32 %s722_s10, 4  ;;  %p8264_p10 = scmp.ne.s32.totalorder %s8732_s26, %s8263_s16  ;;  %s730_s7 = int_to_ptr.vmem [resolvable:$true] %s729_s7 }
  0x80   : > { %s8268_s23 = scalar_lea.hbm %s9736_s8, 32  ;;  %p8269_p8 = scmp.lt.u32.totalorder %s8732_s26, %s9736_s8 }
  0x81   : > { %p8266_p12 = pnand %p8264_p10, %p8642_p3  ;;  %p8270_p9 = scmp.lt.u32.totalorder %s8268_s23, %s8263_s16 }
  0x82   : > { %p8272_p6 = scmp.lt.u32.totalorder %s8263_s16, %s8732_s26 }
  0x83   : > { %p8267_p7 = pneg %p8266_p12  ;;  %p8271_p0 = por %p8270_p9, %p8269_p8 }
  0x85   : > { %p8273_p11 = por %p8272_p6, %p8271_p0 }
  0x87   : > { %p8274_p5 = pnand %p8273_p11, %p8267_p7 }
  0x89   : > { %8277 = shalt.err (!%p8274_p5)
}
  0x8a   : > { %s8278_s19 = scalar_lea.vmem %s730_s7, 16  ;;  %s8436_s4 = smov [#allocation7]  }
  0x8b   : > { %p8279_p13 = scmp.ne.s32.totalorder %s730_s7, %s8278_s19  ;;  %s8283_s28 = sshll.u32 %s8436_s4, 4  ;;  %s8284_s28 = int_to_ptr.vmem [resolvable:$false] %s8283_s28 }
  0x8c   : > { %s8285_s10 = scalar_lea.vmem %s8284_s28, 32  ;;  %p8286_p10 = scmp.lt.s32.totalorder %s730_s7, %s8284_s28 }
  0x8d   : > { %p8281_p1 = pnand %p8279_p13, %p8642_p3  ;;  %p8287_p12 = scmp.lt.s32.totalorder %s8285_s10, %s8278_s19 }
  0x8f   : > { %p8282_p2 = pneg %p8281_p1  ;;  %p8288_p4 = por %p8287_p12, %p8286_p10 }
  0x91   : > { %p8289_p8 = pnand %p8288_p4, %p8282_p2 }
  0x93   : > { %8292 = shalt.err (!%p8289_p8)
}
  0x94   : > { %p9798_p9 = scmp.ne.s32.totalorder %s9788_s0, 0  ;;  %s8757_s27 = scalar_lea.hbm %s9740_s12, %s8616_s24 }
  0x95   : > { %s772_s23 = scalar_lea.vmem [#allocation10], %s8613_s1  ;;  %s8293_s22 = scalar_lea.hbm %s8757_s27, 16 }
  0x96   : > { %8006 = dma.hbm_to_vmem [thread:$0]  (!%p9798_p9), %s8732_s26, 16, %s730_s7, %s8636_s2  }
  0x97   : > { %s779_s21 = sshll.u32 %s772_s23, 4  ;;  %p8294_p4 = scmp.ne.s32.totalorder %s8757_s27, %s8293_s22  ;;  %s780_s21 = int_to_ptr.vmem [resolvable:$true] %s779_s21 }
  0x98   : > { %s8298_s2 = scalar_lea.hbm %s9740_s12, 32  ;;  %p8299_p6 = scmp.lt.u32.totalorder %s8757_s27, %s9740_s12 }
  0x99   : > { %p8296_p7 = pnand %p8294_p4, %p8642_p3  ;;  %p8300_p11 = scmp.lt.u32.totalorder %s8298_s2, %s8293_s22 }
  0x9a   : > { %p8302_p13 = scmp.lt.u32.totalorder %s8293_s22, %s8757_s27 }
  0x9b   : > { %p8297_p0 = pneg %p8296_p7  ;;  %p8301_p5 = por %p8300_p11, %p8299_p6 }
  0x9d   : > { %p8303_p1 = por %p8302_p13, %p8301_p5 }
  0x9f   : > { %p8304_p2 = pnand %p8303_p1, %p8297_p0 }
  0xa1   : > { %8307 = shalt.err (!%p8304_p2)
}
  0xa2   : > { %s8308_s28 = scalar_lea.vmem %s780_s21, 16  ;;  %s8437_s10 = smov [#allocation10]  }
  0xa3   : > { %p8309_p10 = scmp.ne.s32.totalorder %s780_s21, %s8308_s28  ;;  %s8313_s16 = sshll.u32 %s8437_s10, 4  ;;  %s8314_s16 = int_to_ptr.vmem [resolvable:$false] %s8313_s16 }
  0xa4   : > { %s8315_s18 = scalar_lea.vmem %s8314_s16, 32  ;;  %p8316_p4 = scmp.lt.s32.totalorder %s780_s21, %s8314_s16 }
  0xa5   : > { %p8311_p12 = pnand %p8309_p10, %p8642_p3  ;;  %p8317_p7 = scmp.lt.s32.totalorder %s8315_s18, %s8308_s28 }
  0xa7   : > { %p8312_p8 = pneg %p8311_p12  ;;  %p8318_p9 = por %p8317_p7, %p8316_p4 }
  0xa9   : > { %p8319_p6 = pnand %p8318_p9, %p8312_p8 }
  0xab   : > { %8322 = shalt.err (!%p8319_p6)
}
  0xac   : > { %p9799_p11 = scmp.ne.s32.totalorder %s9788_s0, 0  ;;  %s8782_s19 = scalar_lea.hbm %s9743_s15, %s8616_s24 }
  0xad   : > { %s805_s4 = scalar_lea.vmem [#allocation11], %s8613_s1  ;;  %s803_s26 = scalar_lea.sflag [#allocation12], %s8613_s1 }
  0xae   : > { %8012 = dma.hbm_to_vmem [thread:$0]  (!%p9799_p11), %s8757_s27, 16, %s780_s21, %s8683_s29  }
  0xaf   : > { %s812_s2 = sshll.u32 %s805_s4, 4  ;;  %s8323_s7 = scalar_lea.hbm %s8782_s19, 16  ;;  %s813_s2 = int_to_ptr.vmem [resolvable:$true] %s812_s2 }
  0xb0   : > { %p8324_p9 = scmp.ne.s32.totalorder %s8782_s19, %s8323_s7  ;;  %s8328_s27 = scalar_lea.hbm %s9743_s15, 32 }
  0xb1   : > { %p8329_p13 = scmp.lt.u32.totalorder %s8782_s19, %s9743_s15  ;;  %p8330_p1 = scmp.lt.u32.totalorder %s8328_s27, %s8323_s7 }
  0xb2   : > { %p8326_p0 = pnand %p8324_p9, %p8642_p3  ;;  %p8332_p10 = scmp.lt.u32.totalorder %s8323_s7, %s8782_s19 }
  0xb3   : > { %p8331_p2 = por %p8330_p1, %p8329_p13 }
  0xb4   : > { %p8327_p5 = pneg %p8326_p0 }
  0xb5   : > { %p8333_p12 = por %p8332_p10, %p8331_p2 }
  0xb7   : > { %p8334_p8 = pnand %p8333_p12, %p8327_p5 }
  0xb9   : > { %8337 = shalt.err (!%p8334_p8)
}
  0xba   : > { %s8338_s1 = scalar_lea.vmem %s813_s2, 16  ;;  %s8438_s10 = smov [#allocation11]  }
  0xbb   : > { %p8339_p4 = scmp.ne.s32.totalorder %s813_s2, %s8338_s1  ;;  %s8343_s16 = sshll.u32 %s8438_s10, 4  ;;  %s8344_s16 = int_to_ptr.vmem [resolvable:$false] %s8343_s16 }
  0xbc   : > { %s8345_s18 = scalar_lea.vmem %s8344_s16, 32  ;;  %p8346_p9 = scmp.lt.s32.totalorder %s813_s2, %s8344_s16 }
  0xbd   : > { %p8341_p7 = pnand %p8339_p4, %p8642_p3  ;;  %p8347_p0 = scmp.lt.s32.totalorder %s8345_s18, %s8338_s1 }
  0xbf   : > { %p8342_p6 = pneg %p8341_p7  ;;  %p8348_p11 = por %p8347_p0, %p8346_p9 }
  0xc1   : > { %p8349_p1 = pnand %p8348_p11, %p8342_p6 }
  0xc3   : > { %8352 = shalt.err (!%p8349_p1)
}
  0xc4   : > { %p9800_p13 = scmp.ne.s32.totalorder %s9788_s0, 0  ;;  %p9801_p5 = scmp.ne.s32.totalorder %s9793_s20, 0 }
  0xc5   : > { %s8806_s30 = sand.u32 (!%p9801_p5), 1, %s8423_s25   ;;  %p9802_p3 = scmp.ne.s32.totalorder (!%p9801_p5), %s9783_s5, 0 }
  0xc6   : > { %8015 = dma.hbm_to_vmem [thread:$0]  (!%p9800_p13), %s8782_s19, 16, %s813_s2, %s803_s26  }
  0xc7   : > { %851 = sbr.rel (%p9801_p5) target bundleno = 9220 (0x2404), region = 100  ;;  %s854_s23 = scalar_lea.sflag (!%p9801_p5), [#allocation3], %s8806_s30 }
  0xc8   : > { %s9764_s22 = scalar_lea.vmem (!%p9801_p5), [#allocation2], %s8806_s30 }
  0xce   : > { %8398 = dma.done.wait (%p9802_p3), %s854_s23, 16  }
  0xcf   : > { %8400 = vsyncadd (%p9802_p3), %s854_s23, 4294967280  ;;  %s861_s0 = sand.u32 1, %s8579_s3   ;;  %s864_s20 = scalar_lea.vmem [#allocation5], %s8806_s30 }
  0xd0   : > { %s862_s19 = scalar_lea.sflag [#allocation6], %s861_s0 }
  0xd1   : > { %8402 = dma.done.wait (%p9802_p3), %s862_s19, 32  }
  0xd2   : > { %8404 = vsyncadd (%p9802_p3), %s862_s19, 4294967264  ;;  %s872_s4 = scalar_lea.vmem [#allocation7], %s8806_s30  ;;  %s878_s2 = scalar_lea.sflag [#allocation9], %s861_s0 }
  0xd3   : > { %s880_s26 = scalar_lea.vmem [#allocation8], %s8806_s30 }
  0xd4   : > { %8406 = dma.done.wait (%p9802_p3), %s878_s2, 32  }
  0xd5   : > { %8408 = vsyncadd (%p9802_p3), %s878_s2, 4294967264  ;;  %s888_s7 = scalar_lea.vmem [#allocation10], %s8806_s30  ;;  %s894_s28 = scalar_lea.sflag [#allocation12], %s8806_s30 }
  0xd6   : > { %s896_s29 = scalar_lea.vmem [#allocation11], %s8806_s30 }
  0xd7   : > { %8410 = dma.done.wait (%p9802_p3), %s894_s28, 16  }
  0xd8   : > { %8412 = vsyncadd (%p9802_p3), %s894_s28, 4294967280  ;;  %p1045_p11 = scmp.lt.s32.totalorder %s8579_s3, 1  ;;  %v8439_v0 = vmov 0.0|0.0   ;;  %vm8440_vm0 = vmmov 0   ;;  %v8441_v1 = vmov 0.0   ;;  %vm1158_vm1 = vcmask 1043456  }
  0xd9   : > { %7677 = vmatprep.subr.bf16.mxu0 %v8439_v0  ;;  %7681 = vmatprep.subr.bf16.mxu1 %v8439_v0  ;;  %s9803_s10 = sld [smem:[#allocation31_spill]]  ;;  %vm8442_vm2 = vmmov 1   ;;  %s9806_s0 = sld [smem:[#allocation28_spill]]  ;;  %vm1154_vm4 = vcmask 97280   ;;  %v8887_v13 = vld [vmem:[%s9764_s22] ss:$0 sm:$0xff] }
  0xda   : > { %s8837_s27 = scalar_select %p1045_p11, %s8579_s3, 1  ;;  %7194 = vmatprep.mubr.msk.f32.mxu0 %vm8440_vm0, %v8441_v1  ;;  %7205 = vmatprep.mubr.msk.f32.mxu1 %vm8440_vm0, %v8441_v1  ;;  %vm8853_vm3 = vmpackc.low %vm1158_vm1, %vm8442_vm2  ;;  %vm1261_vm5 = vcmask 261120   ;;  %v8898_v22 = vld [vmem:[%s864_s20] ss:$0 sm:$0xff]  ;;  %vm1595_vm6 = vcmask 93184  }
  0xdb   : > { %v8903_v24 = vld [vmem:[%s872_s4] ss:$0 sm:$0xff]  ;;  %s9808_s18 = sld [smem:[#allocation26_spill]]  ;;  %s8443_s22 = smov 64  }
  0xdc   : > { %s8844_s5 = sshll.u32 %s8837_s27, 4  ;;  %s8847_s21 = sshll.u32 %s8837_s27, 5  ;;  %v8946_v37 = vld [vmem:[%s880_s26] ss:$0 sm:$0xff] }
  0xdd   : > { %s1079_s24 = scalar_lea.vmem %s9737_s9, %s8847_s21  ;;  %s1094_s2 = scalar_lea.vmem %s9742_s14, %s8844_s5 }
  0xde   : > { %v1121_v7 = vld [vmem:[%s1079_s24] sm:$0xff]  ;;  %v1122_v8 = vld [vmem:[%s1079_s24 + $0x8] sm:$0xff]  ;;  %v1123_v10 = vld [vmem:[%s1079_s24 + $0x10] sm:$0xff]  ;;  %s9816_s28 = sld [smem:[#allocation37_spill]] }
  0xdf   : > { %s1074_s16 = scalar_lea.vmem %s9803_s10, %s8844_s5  ;;  %s8861_s19 = scalar_lea.vmem %s9806_s0, %s8847_s21  ;;  %v8877_v9 = vpack.c.bf16 %v1122_v8, %v1121_v7  ;;  %v1124_v11 = vld [vmem:[%s1079_s24 + $0x18] sm:$0xff]  ;;  %v1131_v44 = vld [vmem:[%s1094_s2] sm:$0xff]  ;;  %v1132_v45 = vld [vmem:[%s1094_s2 + $0x8] sm:$0xf] }
  0xe0   : > { %v1116_v2 = vld [vmem:[%s1074_s16] sm:$0xff]  ;;  %v1117_v3 = vld [vmem:[%s1074_s16 + $0x8] sm:$0xf]  ;;  %v8881_v12 = vpack.c.bf16 %v1124_v11, %v1123_v10  ;;  %s1084_s16 = scalar_lea.vmem %s9739_s11, %s8844_s5  ;;  %s1089_s0 = scalar_lea.vmem %s9741_s13, %s8844_s5  ;;  %v8967_v47 = vpack.c.bf16 %v1132_v45, %v1131_v44 }
  0xe1   : > { %v8863_v5 = vpack.c.bf16 %v1117_v3, %v1116_v2  ;;  %v1145_v6 = vld [vmem:[%s8861_s19] sm:$0xf]  ;;  %7683 = vmatpush3.bf16.msra.mxu1 %v8877_v9  ;;  %v1127_v30 = vld [vmem:[%s1084_s16 + $0x8] sm:$0xf]  ;;  %s9807_s24 = sld [smem:[#allocation27_spill]]  ;;  %s8939_s23 = scalar_lea.vmem %s9808_s18, %s8847_s21 }
  0xe2   : > { %7684 = vmatprep.subr.bf16.mxu1 %v8439_v0  ;;  %v1242_v23 = vmul.f32 %v8898_v22, %v1145_v6  ;;  %v1126_v29 = vld [vmem:[%s1084_s16] sm:$0xff]  ;;  %v1130_v33 = vld [vmem:[%s1089_s0 + $0x8] sm:$0xf]  ;;  %s1104_s10 = scalar_lea.vmem %s9745_s17, %s8844_s5  ;;  %s9809_s18 = sld [smem:[#allocation35_spill]] }
  0xe3   : > { %7680 = vmatpush3.bf16.msk.msra.mxu0 %vm8853_vm3, %v8863_v5  ;;  %v8910_v31 = vpack.c.bf16 %v1127_v30, %v1126_v29  ;;  %v1129_v32 = vld [vmem:[%s1089_s0] sm:$0xff]  ;;  %v1137_v50 = vld [vmem:[%s1104_s10 + $0x8] sm:$0xf]  ;;  %s9811_s16 = sld [smem:[#allocation29_spill]] }
  0xe4   : > { %7687 = vmatprep.subr.bf16.mxu0 %v8439_v0  ;;  %v1249_v25 = vadd.f32 %v8903_v24, %v1242_v23  ;;  %v8920_v34 = vpack.c.bf16 %v1130_v33, %v1129_v32  ;;  %v1143_v38 = vld [vmem:[%s8939_s23] sm:$0xf] }
  0xe5   : > { %7686 = vmatpush3.bf16.msra.mxu1 %v8881_v12  ;;  %v1136_v49 = vld [vmem:[%s1104_s10] sm:$0xff] }
  0xe6   : > { %7195 = vmatmul.mubr.msk.f32.vlgmr.msra.gmra.mrb[0].mxu0 %vm1154_vm4, %v1145_v6  ;;  %7695 = vmatprep.subr.bf16.mxu1 %v8439_v0  ;;  %v1250_v26 = vmax.f32 %v1249_v25, 0.0  ;;  %v8980_v51 = vpack.c.bf16 %v1137_v50, %v1136_v49  ;;  %v9023_v3 = vld [vmem:[%s888_s7] ss:$0 sm:$0xff] }
  0xe7   : > { %7212 = vmatprep.mubr.msk.f32.mxu0 %vm8440_vm0, %v8441_v1  ;;  %7690 = vmatpush3.bf16.msk.msra.mxu0 %vm8853_vm3, %v8910_v31  ;;  %s8933_s1 = scalar_lea.vmem %s9807_s24, %s8847_s21  ;;  %s9810_s24 = sld [smem:[#allocation34_spill]]  ;;  %v9027_v6 = vld [vmem:[%s896_s29] ss:$0 sm:$0xff] }
  0xe8   : > { %v1251_v27 = vsub.f32 0.0, %v1250_v26  ;;  %7691 = vmatprep.subr.bf16.mxu0 %v8439_v0  ;;  %v8942_v36 = vld [vmem:[%s8933_s1] sm:$0xf]  ;;  %s1109_s0 = scalar_lea.vmem %s9809_s18, %s8847_s21 }
  0xe9   : > { %v1336_v39 = vsub.f32 1.0, %v8942_v36  ;;  %v8958_v42 = vmul.f32 %v8942_v36, %v1143_v38  ;;  %v1138_v52 = vld [vmem:[%s1109_s0] sm:$0xff]  ;;  %v1139_v53 = vld [vmem:[%s1109_s0 + $0x8] sm:$0xff]  ;;  %v1140_v55 = vld [vmem:[%s1109_s0 + $0x10] sm:$0xff]  ;;  %s9033_s18 = scalar_lea.vmem %s9811_s16, %s8847_s21  ;;  %s8444_s16 = smov 32  }
  0xea   : > { %v1252_v28 = vmul.f32 1.442695, %v1251_v27  ;;  %v8990_v54 = vpack.c.bf16 %v1139_v53, %v1138_v52  ;;  %v1141_v56 = vld [vmem:[%s1109_s0 + $0x18] sm:$0xff]  ;;  %s6768_s0 = sshll.u32 %s8806_s30, 5 }
  0xeb   : > { %v8996_v57 = vpack.c.bf16 %v1141_v56, %v1140_v55  ;;  %s9044_s2 = scalar_lea.vmem [#allocation13], %s6768_s0  ;;  %s8445_s0 = smov 96  }
  0xed   : > { %s1099_s10 = scalar_lea.vmem %s9810_s24, %s8844_s5 }
  0xee   : > { %v1134_v60 = vld [vmem:[%s1099_s10] sm:$0xff]  ;;  %v1135_v61 = vld [vmem:[%s1099_s10 + $0x8] sm:$0xf]  ;;  %s9812_s10 = sld [smem:[#allocation36_spill]] }
  0xef   : > { %v9015_v62 = vpack.c.bf16 %v1135_v61, %v1134_v60 }
  0xf4   : > { %s9069_s5 = scalar_lea.vmem %s9812_s10, %s8837_s27  ;;  %s6391_s10 = scalar_lea.sflag [#allocation4], %s8806_s30 }
 0x1b9   : > { %v1228_v14 = vpop.f32.mrb[0].mxu0 }
 0x1ba   : > { %v1229_v15 = vadd.f32 %v8887_v13, %v1228_v14  ;;  %v7196_v16 = vpop.f32.mrb[1].mxu0 }
 0x1bc   : > { %v1232_v17 = vmax.f32 %v1229_v15, 0.0  ;;  %v1146_v15 = vld [vmem:[%s9033_s18] sm:$0xf] }
 0x1be   : > { %v1233_v18 = vsub.f32 0.0, %v1232_v17 }
 0x1c0   : > { %v1234_v19 = vmul.f32 1.442695, %v1233_v18 }
 0x1c2   : > { %8062 = vpow2.f32 %v1234_v19 }
 0x1c3   : > { %8064 = vpow2.f32 %v1252_v28 }
 0x1cc   : > { %v8063_v20 = vpop.eup %8062 }
 0x1cd   : > { %v8890_v21 = vmul.f32 0.0, %v8063_v20  ;;  %v8065_v35 = vpop.eup %8064 }
 0x1cf   : > { %7206 = vmatmul.mubr.msk.f32.vlgmr.msra.gmra.mrb[0].mxu1 %vm1261_vm5, %v8890_v21 }
 0x1d0   : > { %7226 = vmatprep.mubr.msk.f32.mxu1 %vm8440_vm0, %v8441_v1  ;;  %7698 = vmatpush3.bf16.msk.msra.mxu1 %vm8853_vm3, %v8920_v34 }
 0x1d1   : > { %7703 = vmatprep.subr.bf16.mxu1 %v8439_v0 }
 0x1d3   : > { %7227 = vmatmul.mubr.msk.f32.vlgmr.msra.gmra.mrb[2].mxu1 %vm1154_vm4, %v8065_v35 }
 0x1d4   : > { %7240 = vmatprep.mubr.msk.f32.mxu1 %vm8440_vm0, %v8441_v1  ;;  %7706 = vmatpush3.bf16.msk.msra.mxu1 %vm8853_vm3, %v9015_v62 }
 0x1d5   : > { %7713 = vmatprep.subr.bf16.mxu1 %v8439_v0 }
 0x2a2   : > { %v1331_v40 = vpop.f32.mrb[0].mxu1 }
 0x2a3   : > { %v8955_v41 = vadd.f32 %v8946_v37, %v1331_v40  ;;  %v7207_v43 = vpop.f32.mrb[1].mxu1 }
 0x2a4   : > { %v9072_v43 = vld [vmem:[%s9069_s5] ss:$0 sm:$0xff] }
 0x2a5   : > { %v1337_v46 = vmul.f32 %v1336_v39, %v8955_v41 }
 0x2a6   : > { %v1569_v58 = vpop.f32.mrb[2].mxu1 }
 0x2a7   : > { %v1338_v48 = vadd.f32 %v1337_v46, %v8958_v42  ;;  %v7228_v59 = vpop.f32.mrb[3].mxu1 }
 0x2a9   : > { %7213 = vmatmul.mubr.msk.f32.vlgmr.msra.gmra.mrb[2].mxu0 %vm1154_vm4, %v1338_v48 }
 0x2aa   : > { %7694 = vmatpush3.bf16.msk.msra.mxu0 %vm8853_vm3, %v8967_v47  ;;  %7219 = vmatprep.mubr.msk.f32.mxu0 %vm8440_vm0, %v8441_v1 }
 0x2ab   : > { %7699 = vmatprep.subr.bf16.mxu0 %v8439_v0 }
 0x2ad   : > { %7220 = vmatmul.mubr.msk.f32.vlgmr.msra.gmra.mrb[4].mxu0 %vm1154_vm4, %v8942_v36 }
 0x2ae   : > { %7702 = vmatpush3.bf16.msk.msra.mxu0 %vm8853_vm3, %v8980_v51  ;;  %7233 = vmatprep.mubr.msk.f32.mxu0 %vm8440_vm0, %v8441_v1 }
 0x2af   : > { %7707 = vmatprep.subr.bf16.mxu0 %v8439_v0 }
 0x2b1   : > { %7234 = vmatmul.mubr.msk.f32.vlgmr.msra.gmra.mrb[6].mxu0 %vm1154_vm4, %v8942_v36  ;;  %v6819_v36 = vld [vmem:[%s8861_s19 + $0x4] sm:$0xf] }
 0x2b2   : > { %7709 = vmatpush3.bf16.msra.mxu0 %v8990_v54  ;;  %7251 = vmatprep.mubr.msk.f32.mxu0 %vm8440_vm0, %v8441_v1 }
 0x2b3   : > { %7710 = vmatprep.subr.bf16.mxu0 %v8439_v0 }
 0x2b6   : > { %7712 = vmatpush3.bf16.msra.mxu0 %v8996_v57 }
 0x2b7   : > { %7723 = vmatprep.subr.bf16.mxu0 %v8439_v0 }
 0x2b9   : > { %7252 = vmatmul.mubr.msk.f32.vlgmr.msra.gmra.mrb[8].mxu0 %vm1261_vm5, %v8890_v21  ;;  %v1586_v21 = vsub.f32 %v1146_v15, %v8955_v41 }
 0x2ba   : > { %7726 = vmatpush3.bf16.msk.msra.mxu0 %vm8853_vm3, %v8910_v31  ;;  %7276 = vmatprep.mubr.msk.f32.mxu0 %vm8440_vm0, %v8441_v1 }
 0x2bb   : > { %7727 = vmatprep.subr.bf16.mxu0 %v8439_v0  ;;  %v1587_v27 = vand.u32 2147483647, %v1586_v21 }
 0x37c   : > { %v1417_v63 = vpop.f32.mrb[2].mxu0 }
 0x37d   : > { %v7214_v2 = vpop.f32.mrb[3].mxu0  ;;  %v1418_v8 = vadd.f32 %v9023_v3, %v1417_v63 }
 0x37f   : > { %v1588_v17 = vsub.f32 %v1146_v15, %v1418_v8 }
 0x380   : > { %v1493_v7 = vpop.f32.mrb[4].mxu0 }
 0x381   : > { %v1570_v10 = vadd.f32 %v1569_v58, %v1493_v7  ;;  %v7221_v11 = vpop.f32.mrb[5].mxu0  ;;  %v1589_v25 = vand.u32 2147483647, %v1588_v17 }
 0x383   : > { %v1579_v14 = vadd.f32 %v9027_v6, %v1570_v10  ;;  %v1590_v32 = vadd.f32 %v1589_v25, %v1587_v27  ;;  %v6818_v27 = vld [vmem:[%s8933_s1 + $0x4] sm:$0xf] }
 0x384   : > { %v1691_v16 = vpop.f32.mrb[6].mxu0 }
 0x385   : > { %v1580_v18 = vmul.f32 %v1579_v14, %v1418_v8  ;;  %v1581_v19 = vsub.f32 1.0, %v1579_v14  ;;  %v7235_v20 = vpop.f32.mrb[7].mxu0 }
 0x387   : > { %v1582_v23 = vmul.f32 %v1581_v19, %v8955_v41 }
 0x389   : > { %v1583_v26 = vadd.f32 %v1582_v23, %v1580_v18  ;;  %v1961_v18 = vmul.f32 %v6819_v36, %v8898_v22 }
 0x38b   : > { %v1584_v28 = vmul.f32 %v1583_v26, %v1336_v39  ;;  %v1591_v29 = vsub.f32 %v1146_v15, %v1583_v26  ;;  %v1962_v19 = vadd.f32 %v8903_v24, %v1961_v18 }
 0x38c   : > { %v1837_v30 = vpop.f32.mrb[8].mxu0 }
 0x38d   : > { %v1585_v33 = vadd.f32 %v1584_v28, %v8958_v42  ;;  %v7253_v35 = vpop.f32.mrb[9].mxu0  ;;  %v1592_v38 = vand.u32 2147483647, %v1591_v29  ;;  %v1963_v20 = vmax.f32 %v1962_v19, 0.0  ;;  %v6817_v28 = vld [vmem:[%s8939_s23 + $0x4] sm:$0xf] }
 0x38e   : > { %v2048_v29 = vsub.f32 1.0, %v6818_v27 }
 0x38f   : > { %1873 = vst.msk [vmem:[%s9044_s2] sm:$0xf] %vm1595_vm6, %v1585_v33  ;;  %7241 = vmatmul.mubr.msk.f32.vlgmr.msra.gmra.mrb[4].mxu1 %vm1154_vm4, %v1585_v33  ;;  %v9049_v40 = vadd.f32 %v1592_v38, %v1590_v32  ;;  %v1964_v21 = vsub.f32 0.0, %v1963_v20  ;;  %v2047_v33 = vmul.f32 %v6818_v27, %v6817_v28  ;;  %v6840_v20 = vld [vmem:[%s8861_s19 + $0x8] sm:$0xf] }
 0x390   : > { %7716 = vmatpush3.bf16.msk.msra.mxu1 %vm8853_vm3, %v8863_v5  ;;  %7258 = vmatprep.mubr.msk.f32.mxu1 %vm8440_vm0, %v8441_v1 }
 0x391   : > { %7717 = vmatprep.subr.bf16.mxu1 %v8439_v0  ;;  %v1965_v23 = vmul.f32 1.442695, %v1964_v21 }
 0x393   : > { %7259 = vmatmul.mubr.msk.f32.vlgmr.msra.gmra.mrb[6].mxu1 %vm1154_vm4, %v6819_v36 }
 0x394   : > { %7719 = vmatpush3.bf16.msra.mxu1 %v8877_v9  ;;  %7269 = vmatprep.mubr.msk.f32.mxu1 %vm8440_vm0, %v8441_v1 }
 0x395   : > { %7720 = vmatprep.subr.bf16.mxu1 %v8439_v0 }
 0x398   : > { %7722 = vmatpush3.bf16.msra.mxu1 %v8881_v12 }
 0x399   : > { %7731 = vmatprep.subr.bf16.mxu1 %v8439_v0 }
 0x462   : > { %v1767_v39 = vpop.f32.mrb[4].mxu1 }
 0x463   : > { %v1768_v41 = vadd.f32 %v1767_v39, %v1691_v16  ;;  %v7242_v42 = vpop.f32.mrb[5].mxu1 }
 0x465   : > { %v1841_v44 = vadd.f32 %v1837_v30, %v1768_v41 }
 0x466   : > { %v1953_v49 = vpop.f32.mrb[6].mxu1 }
 0x467   : > { %v1848_v45 = vadd.f32 %v9072_v43, %v1841_v44  ;;  %v7260_v50 = vpop.f32.mrb[7].mxu1  ;;  %v1954_v59 = vadd.f32 %v8887_v13, %v1953_v49 }
 0x469   : > { %8066 = vtanh.f32 %v1848_v45  ;;  %v6816_v48 = vmul.f32 -1.442695, %v1848_v45  ;;  %v1957_v60 = vmax.f32 %v1954_v59, 0.0 }
 0x46b   : > { %8068 = vpow2.f32 %v6816_v48  ;;  %v1958_v61 = vsub.f32 0.0, %v1957_v60 }
 0x46d   : > { %v1959_v7 = vmul.f32 1.442695, %v1958_v61 }
 0x473   : > { %v8067_v46 = vpop.eup %8066 }
 0x474   : > { %1858 = vrot.lane.b32.xlu0 %v8067_v46, %s8443_s22 }
 0x475   : > { %v8069_v52 = vpop.eup %8068 }
 0x476   : > { %v1852_v53 = vadd.f32 1.0, %v8069_v52  ;;  %v6820_v52 = vld [vmem:[%s9033_s18 + $0x4] sm:$0xf] }
 0x478   : > { %8070 = vrcp.f32 %v1852_v53 }
 0x482   : > { %v8071_v55 = vpop.eup %8070 }
 0x483   : > { %v1856_v63 = vmul.f32 0.0, %v8071_v55 }
 0x4e6   : > { %v1859_v56 = vpop.permute.xlu0 %1858 }
 0x4e7   : > { %v1861_v58 = vmul.f32 %v8071_v55, %v1859_v56 }
 0x4e9   : > { %1863 = vrot.lane.b32.xlu0 %v1861_v58, %s8444_s16 }
 0x55b   : > { %v1864_v2 = vpop.permute.xlu0 %1863 }
 0x55c   : > { %v9078_v8 = vadd.f32 %v1864_v2, %v1856_v63 }
 0x55e   : > { %8072 = vtanh.f32 %v9078_v8 }
 0x55f   : > { %8074 = vpow2.f32 %v1959_v7 }
 0x560   : > { %8076 = vpow2.f32 %v1965_v23 }
 0x568   : > { %v8073_v10 = vpop.eup %8072 }
 0x569   : > { %1869 = vrot.lane.b32.xlu1 %v8073_v10, %s8443_s22  ;;  %v8075_v11 = vpop.eup %8074 }
 0x56a   : > { %v8077_v26 = vpop.eup %8076 }
 0x56d   : > { %1968 = vrot.lane.b32.xlu1 %v8075_v11, %s8445_s0 }
 0x5db   : > { %v1870_v14 = vpop.permute.xlu1 %1869 }
 0x5dc   : > { %v1872_v15 = vmul.f32 %v8071_v55, %v1870_v14 }
 0x5df   : > { %v1969_v16 = vpop.permute.xlu1 %1968 }
 0x5e0   : > { %v1971_v17 = vmul.f32 %v1969_v16, %v1872_v15 }
 0x5e2   : > { %1973 = vrot.lane.b32.xlu0 %v1971_v17, %s8444_s16 }
 0x654   : > { %v1974_v25 = vpop.permute.xlu0 %1973 }
 0x655   : > { %7270 = vmatmul.mubr.msk.f32.vlgmr.msra.gmra.mrb[8].mxu1 %vm1261_vm5, %v1974_v25 }
 0x656   : > { %7734 = vmatpush3.bf16.msk.msra.mxu1 %vm8853_vm3, %v8920_v34  ;;  %7290 = vmatprep.mubr.msk.f32.mxu1 %vm8440_vm0, %v8441_v1 }
 0x657   : > { %7739 = vmatprep.subr.bf16.mxu1 %v8439_v0 }
 0x659   : > { %7291 = vmatmul.mubr.msk.f32.vlgmr.msra.gmra.mrb[10].mxu1 %vm1154_vm4, %v8077_v26 }
 0x65a   : > { %7742 = vmatpush3.bf16.msk.msra.mxu1 %vm8853_vm3, %v9015_v62  ;;  %7304 = vmatprep.mubr.msk.f32.mxu1 %vm8440_vm0, %v8441_v1 }
 0x65b   : > { %7749 = vmatprep.subr.bf16.mxu1 %v8439_v0 }
 0x728   : > { %v2043_v30 = vpop.f32.mrb[8].mxu1 }
 0x729   : > { %v2044_v32 = vadd.f32 %v8946_v37, %v2043_v30  ;;  %v7271_v35 = vpop.f32.mrb[9].mxu1 }
 0x72b   : > { %v2049_v38 = vmul.f32 %v2048_v29, %v2044_v32  ;;  %v2277_v60 = vsub.f32 %v6820_v52, %v2044_v32 }
 0x72c   : > { %v2266_v39 = vpop.f32.mrb[10].mxu1 }
 0x72d   : > { %v2050_v36 = vadd.f32 %v2049_v38, %v2047_v33  ;;  %v7292_v41 = vpop.f32.mrb[11].mxu1  ;;  %v2278_v7 = vand.u32 2147483647, %v2277_v60 }
 0x72f   : > { %7277 = vmatmul.mubr.msk.f32.vlgmr.msra.gmra.mrb[10].mxu0 %vm1154_vm4, %v2050_v36 }
 0x730   : > { %7730 = vmatpush3.bf16.msk.msra.mxu0 %vm8853_vm3, %v8967_v47  ;;  %7283 = vmatprep.mubr.msk.f32.mxu0 %vm8440_vm0, %v8441_v1 }
 0x731   : > { %7735 = vmatprep.subr.bf16.mxu0 %v8439_v0 }
 0x733   : > { %7284 = vmatmul.mubr.msk.f32.vlgmr.msra.gmra.mrb[12].mxu0 %vm1154_vm4, %v6818_v27 }
 0x734   : > { %7738 = vmatpush3.bf16.msk.msra.mxu0 %vm8853_vm3, %v8980_v51  ;;  %7297 = vmatprep.mubr.msk.f32.mxu0 %vm8440_vm0, %v8441_v1 }
 0x735   : > { %7743 = vmatprep.subr.bf16.mxu0 %v8439_v0 }
 0x737   : > { %7298 = vmatmul.mubr.msk.f32.vlgmr.msra.gmra.mrb[14].mxu0 %vm1154_vm4, %v6818_v27 }
 0x738   : > { %7745 = vmatpush3.bf16.msra.mxu0 %v8990_v54  ;;  %7315 = vmatprep.mubr.msk.f32.mxu0 %vm8440_vm0, %v8441_v1 }
 0x739   : > { %7746 = vmatprep.subr.bf16.mxu0 %v8439_v0 }
 0x73c   : > { %7748 = vmatpush3.bf16.msra.mxu0 %v8996_v57 }
 0x73d   : > { %7759 = vmatprep.subr.bf16.mxu0 %v8439_v0 }
 0x73f   : > { %7316 = vmatmul.mubr.msk.f32.vlgmr.msra.gmra.mrb[16].mxu0 %vm1261_vm5, %v1974_v25 }
 0x740   : > { %7762 = vmatpush3.bf16.msk.msra.mxu0 %vm8853_vm3, %v8910_v31  ;;  %7340 = vmatprep.mubr.msk.f32.mxu0 %vm8440_vm0, %v8441_v1 }
 0x741   : > { %7763 = vmatprep.subr.bf16.mxu0 %v8439_v0 }
 0x802   : > { %v2120_v42 = vpop.f32.mrb[10].mxu0 }
 0x803   : > { %v7278_v44 = vpop.f32.mrb[11].mxu0  ;;  %v2121_v46 = vadd.f32 %v9023_v3, %v2120_v42 }
 0x805   : > { %v2279_v55 = vsub.f32 %v6820_v52, %v2121_v46 }
 0x806   : > { %v2193_v45 = vpop.f32.mrb[12].mxu0 }
 0x807   : > { %v2267_v48 = vadd.f32 %v2266_v39, %v2193_v45  ;;  %v7285_v49 = vpop.f32.mrb[13].mxu0  ;;  %v2280_v63 = vand.u32 2147483647, %v2279_v55 }
 0x809   : > { %v2270_v50 = vadd.f32 %v9027_v6, %v2267_v48  ;;  %v2281_v15 = vadd.f32 %v2280_v63, %v2278_v7 }
 0x80a   : > { %v2378_v53 = vpop.f32.mrb[14].mxu0 }
 0x80b   : > { %v2271_v56 = vmul.f32 %v2270_v50, %v2121_v46  ;;  %v2272_v58 = vsub.f32 1.0, %v2270_v50  ;;  %v7299_v59 = vpop.f32.mrb[15].mxu0 }
 0x80c   : > { %v2640_v59 = vmul.f32 %v6840_v20, %v8898_v22 }
 0x80d   : > { %v2273_v61 = vmul.f32 %v2272_v58, %v2044_v32 }
 0x80e   : > { %v2641_v60 = vadd.f32 %v8903_v24, %v2640_v59 }
 0x80f   : > { %v2274_v2 = vadd.f32 %v2273_v61, %v2271_v56 }
 0x811   : > { %v2275_v10 = vmul.f32 %v2274_v2, %v2048_v29  ;;  %v2282_v11 = vsub.f32 %v6820_v52, %v2274_v2 }
 0x812   : > { %v2521_v14 = vpop.f32.mrb[16].mxu0 }
 0x813   : > { %v2276_v16 = vadd.f32 %v2275_v10, %v2047_v33  ;;  %v7317_v17 = vpop.f32.mrb[17].mxu0  ;;  %v2283_v18 = vand.u32 2147483647, %v2282_v11  ;;  %v6839_v10 = vld [vmem:[%s8933_s1 + $0x8] sm:$0xf] }
 0x814   : > { %v6838_v11 = vld [vmem:[%s8939_s23 + $0x8] sm:$0xf] }
 0x815   : > { %6837 = vst.msk [vmem:[%s9044_s2 + $0x4] sm:$0xf] %vm1595_vm6, %v2276_v16  ;;  %7305 = vmatmul.mubr.msk.f32.vlgmr.msra.gmra.mrb[12].mxu1 %vm1154_vm4, %v2276_v16  ;;  %v9137_v19 = vadd.f32 %v2283_v18, %v2281_v15  ;;  %v2726_v17 = vmul.f32 %v6839_v10, %v6838_v11 }
 0x816   : > { %7752 = vmatpush3.bf16.msk.msra.mxu1 %vm8853_vm3, %v8863_v5  ;;  %7322 = vmatprep.mubr.msk.f32.mxu1 %vm8440_vm0, %v8441_v1 }
 0x817   : > { %7753 = vmatprep.subr.bf16.mxu1 %v8439_v0 }
 0x819   : > { %7323 = vmatmul.mubr.msk.f32.vlgmr.msra.gmra.mrb[14].mxu1 %vm1154_vm4, %v6840_v20 }
 0x81a   : > { %7755 = vmatpush3.bf16.msra.mxu1 %v8877_v9  ;;  %7333 = vmatprep.mubr.msk.f32.mxu1 %vm8440_vm0, %v8441_v1 }
 0x81b   : > { %7756 = vmatprep.subr.bf16.mxu1 %v8439_v0 }
 0x81e   : > { %7758 = vmatpush3.bf16.msra.mxu1 %v8881_v12 }
 0x81f   : > { %7767 = vmatprep.subr.bf16.mxu1 %v8439_v0 }
 0x8e8   : > { %v2451_v21 = vpop.f32.mrb[12].mxu1 }
 0x8e9   : > { %v2452_v23 = vadd.f32 %v2451_v21, %v2378_v53  ;;  %v7306_v25 = vpop.f32.mrb[13].mxu1 }
 0x8eb   : > { %v2525_v26 = vadd.f32 %v2521_v14, %v2452_v23  ;;  %v2727_v14 = vsub.f32 1.0, %v6839_v10 }
 0x8ec   : > { %v2632_v30 = vpop.f32.mrb[14].mxu1 }
 0x8ed   : > { %v2526_v27 = vadd.f32 %v9072_v43, %v2525_v26  ;;  %v7324_v32 = vpop.f32.mrb[15].mxu1  ;;  %v2633_v33 = vadd.f32 %v8887_v13, %v2632_v30 }
 0x8ef   : > { %8078 = vtanh.f32 %v2526_v27  ;;  %v6836_v29 = vmul.f32 -1.442695, %v2526_v27  ;;  %v2636_v35 = vmax.f32 %v2633_v33, 0.0 }
 0x8f1   : > { %8080 = vpow2.f32 %v6836_v29  ;;  %v2637_v39 = vsub.f32 0.0, %v2636_v35  ;;  %v6841_v35 = vld [vmem:[%s9033_s18 + $0x8] sm:$0xf] }
 0x8f3   : > { %v2638_v41 = vmul.f32 1.442695, %v2637_v39 }
 0x8f9   : > { %v8079_v28 = vpop.eup %8078 }
 0x8fa   : > { %2536 = vrot.lane.b32.xlu1 %v8079_v28, %s8443_s22 }
 0x8fb   : > { %v8081_v38 = vpop.eup %8080 }
 0x8fc   : > { %v2530_v36 = vadd.f32 1.0, %v8081_v38 }
 0x8fe   : > { %8082 = vrcp.f32 %v2530_v36 }
 0x8ff   : > { %8084 = vpow2.f32 %v2638_v41 }
 0x908   : > { %v8083_v42 = vpop.eup %8082 }
 0x909   : > { %v8085_v46 = vpop.eup %8084  ;;  %v2534_v48 = vmul.f32 %v8083_v42, %v9078_v8  ;;  %v2642_v8 = vmax.f32 %v2641_v60, 0.0 }
 0x90b   : > { %v2643_v61 = vsub.f32 0.0, %v2642_v8 }
 0x90d   : > { %v2644_v63 = vmul.f32 1.442695, %v2643_v61  ;;  %v6861_v61 = vld [vmem:[%s8861_s19 + $0xc] sm:$0xf] }
 0x96c   : > { %v2537_v44 = vpop.permute.xlu1 %2536 }
 0x96d   : > { %v2539_v45 = vmul.f32 %v8083_v42, %v2537_v44 }
 0x96f   : > { %2541 = vrot.lane.b32.xlu0 %v2539_v45, %s8444_s16 }
 0x973   : > { %2647 = vrot.lane.b32.xlu0 %v8085_v46, %s8445_s0 }
 0x9e1   : > { %v2542_v49 = vpop.permute.xlu0 %2541 }
 0x9e2   : > { %v9159_v50 = vadd.f32 %v2542_v49, %v2534_v48 }
 0x9e4   : > { %8086 = vtanh.f32 %v9159_v50 }
 0x9e5   : > { %v2648_v55 = vpop.permute.xlu0 %2647  ;;  %8088 = vpow2.f32 %v2644_v63 }
 0x9ee   : > { %v8087_v52 = vpop.eup %8086 }
 0x9ef   : > { %2547 = vrot.lane.b32.xlu1 %v8087_v52, %s8443_s22  ;;  %v8089_v7 = vpop.eup %8088 }
 0xa61   : > { %v2548_v53 = vpop.permute.xlu1 %2547 }
 0xa62   : > { %v2550_v56 = vmul.f32 %v8083_v42, %v2548_v53 }
 0xa64   : > { %v2650_v58 = vmul.f32 %v2648_v55, %v2550_v56 }
 0xa66   : > { %2652 = vrot.lane.b32.xlu1 %v2650_v58, %s8444_s16 }
 0xad8   : > { %v2653_v2 = vpop.permute.xlu1 %2652 }
 0xad9   : > { %7334 = vmatmul.mubr.msk.f32.vlgmr.msra.gmra.mrb[16].mxu1 %vm1261_vm5, %v2653_v2 }
 0xada   : > { %7770 = vmatpush3.bf16.msk.msra.mxu1 %vm8853_vm3, %v8920_v34  ;;  %7354 = vmatprep.mubr.msk.f32.mxu1 %vm8440_vm0, %v8441_v1 }
 0xadb   : > { %7775 = vmatprep.subr.bf16.mxu1 %v8439_v0 }
 0xadd   : > { %7355 = vmatmul.mubr.msk.f32.vlgmr.msra.gmra.mrb[18].mxu1 %vm1154_vm4, %v8089_v7 }
 0xade   : > { %7778 = vmatpush3.bf16.msk.msra.mxu1 %vm8853_vm3, %v9015_v62  ;;  %7368 = vmatprep.mubr.msk.f32.mxu1 %vm8440_vm0, %v8441_v1 }
 0xadf   : > { %7785 = vmatprep.subr.bf16.mxu1 %v8439_v0 }
 0xbac   : > { %v2722_v15 = vpop.f32.mrb[16].mxu1 }
 0xbad   : > { %v2723_v16 = vadd.f32 %v8946_v37, %v2722_v15  ;;  %v7335_v18 = vpop.f32.mrb[17].mxu1 }
 0xbaf   : > { %v2728_v20 = vmul.f32 %v2727_v14, %v2723_v16  ;;  %v2956_v44 = vsub.f32 %v6841_v35, %v2723_v16 }
 0xbb0   : > { %v2945_v23 = vpop.f32.mrb[18].mxu1 }
 0xbb1   : > { %v2729_v21 = vadd.f32 %v2728_v20, %v2726_v17  ;;  %v7356_v25 = vpop.f32.mrb[19].mxu1  ;;  %v2957_v49 = vand.u32 2147483647, %v2956_v44  ;;  %v3319_v44 = vmul.f32 %v6861_v61, %v8898_v22  ;;  %v6860_v22 = vld [vmem:[%s8933_s1 + $0xc] sm:$0xf] }
 0xbb3   : > { %7341 = vmatmul.mubr.msk.f32.vlgmr.msra.gmra.mrb[18].mxu0 %vm1154_vm4, %v2729_v21 }
 0xbb4   : > { %7766 = vmatpush3.bf16.msk.msra.mxu0 %vm8853_vm3, %v8967_v47  ;;  %7347 = vmatprep.mubr.msk.f32.mxu0 %vm8440_vm0, %v8441_v1 }
 0xbb5   : > { %7771 = vmatprep.subr.bf16.mxu0 %v8439_v0 }
 0xbb7   : > { %7348 = vmatmul.mubr.msk.f32.vlgmr.msra.gmra.mrb[20].mxu0 %vm1154_vm4, %v6839_v10 }
 0xbb8   : > { %7774 = vmatpush3.bf16.msk.msra.mxu0 %vm8853_vm3, %v8980_v51  ;;  %7361 = vmatprep.mubr.msk.f32.mxu0 %vm8440_vm0, %v8441_v1 }
 0xbb9   : > { %7779 = vmatprep.subr.bf16.mxu0 %v8439_v0 }
 0xbbb   : > { %7362 = vmatmul.mubr.msk.f32.vlgmr.msra.gmra.mrb[22].mxu0 %vm1154_vm4, %v6839_v10 }
 0xbbc   : > { %7781 = vmatpush3.bf16.msra.mxu0 %v8990_v54  ;;  %7379 = vmatprep.mubr.msk.f32.mxu0 %vm8440_vm0, %v8441_v1 }
 0xbbd   : > { %7782 = vmatprep.subr.bf16.mxu0 %v8439_v0 }
 0xbc0   : > { %7784 = vmatpush3.bf16.msra.mxu0 %v8996_v57 }
 0xbc1   : > { %7795 = vmatprep.subr.bf16.mxu0 %v8439_v0 }
 0xbc3   : > { %7380 = vmatmul.mubr.msk.f32.vlgmr.msra.gmra.mrb[24].mxu0 %vm1261_vm5, %v2653_v2 }
 0xbc4   : > { %7798 = vmatpush3.bf16.msk.msra.mxu0 %vm8853_vm3, %v8910_v31  ;;  %7404 = vmatprep.mubr.msk.f32.mxu0 %vm8440_vm0, %v8441_v1 }
 0xbc5   : > { %7799 = vmatprep.subr.bf16.mxu0 %v8439_v0 }
 0xc86   : > { %v2799_v26 = vpop.f32.mrb[18].mxu0 }
 0xc87   : > { %v7342_v27 = vpop.f32.mrb[19].mxu0  ;;  %v2800_v29 = vadd.f32 %v9023_v3, %v2799_v26 }
 0xc89   : > { %v2958_v36 = vsub.f32 %v6841_v35, %v2800_v29 }
 0xc8a   : > { %v2872_v28 = vpop.f32.mrb[20].mxu0 }
 0xc8b   : > { %v2946_v30 = vadd.f32 %v2945_v23, %v2872_v28  ;;  %v7349_v32 = vpop.f32.mrb[21].mxu0  ;;  %v2959_v46 = vand.u32 2147483647, %v2958_v36 }
 0xc8d   : > { %v2949_v33 = vadd.f32 %v9027_v6, %v2946_v30  ;;  %v2960_v56 = vadd.f32 %v2959_v46, %v2957_v49 }
 0xc8e   : > { %v3057_v38 = vpop.f32.mrb[22].mxu0 }
 0xc8f   : > { %v2950_v39 = vmul.f32 %v2949_v33, %v2800_v29  ;;  %v2951_v41 = vsub.f32 1.0, %v2949_v33  ;;  %v7363_v42 = vpop.f32.mrb[23].mxu0 }
 0xc91   : > { %v2952_v45 = vmul.f32 %v2951_v41, %v2723_v16 }
 0xc93   : > { %v2953_v48 = vadd.f32 %v2952_v45, %v2950_v39  ;;  %v3320_v45 = vadd.f32 %v8903_v24, %v3319_v44  ;;  %v6859_v24 = vld [vmem:[%s8939_s23 + $0xc] sm:$0xf] }
 0xc95   : > { %v2954_v52 = vmul.f32 %v2953_v48, %v2727_v14  ;;  %v2961_v53 = vsub.f32 %v6841_v35, %v2953_v48 }
 0xc96   : > { %v3200_v55 = vpop.f32.mrb[24].mxu0 }
 0xc97   : > { %v2955_v58 = vadd.f32 %v2954_v52, %v2726_v17  ;;  %v7381_v59 = vpop.f32.mrb[25].mxu0  ;;  %v2962_v60 = vand.u32 2147483647, %v2961_v53  ;;  %v3406_v53 = vsub.f32 1.0, %v6860_v22 }
 0xc99   : > { %6858 = vst.msk [vmem:[%s9044_s2 + $0x8] sm:$0xf] %vm1595_vm6, %v2955_v58  ;;  %7369 = vmatmul.mubr.msk.f32.vlgmr.msra.gmra.mrb[20].mxu1 %vm1154_vm4, %v2955_v58  ;;  %v9217_v8 = vadd.f32 %v2962_v60, %v2960_v56  ;;  %v3405_v58 = vmul.f32 %v6860_v22, %v6859_v24 }
 0xc9a   : > { %7788 = vmatpush3.bf16.msk.msra.mxu1 %vm8853_vm3, %v8863_v5  ;;  %7386 = vmatprep.mubr.msk.f32.mxu1 %vm8440_vm0, %v8441_v1 }
 0xc9b   : > { %7789 = vmatprep.subr.bf16.mxu1 %v8439_v0 }
 0xc9d   : > { %7387 = vmatmul.mubr.msk.f32.vlgmr.msra.gmra.mrb[22].mxu1 %vm1154_vm4, %v6861_v61 }
 0xc9e   : > { %7791 = vmatpush3.bf16.msra.mxu1 %v8877_v9  ;;  %7397 = vmatprep.mubr.msk.f32.mxu1 %vm8440_vm0, %v8441_v1 }
 0xc9f   : > { %7792 = vmatprep.subr.bf16.mxu1 %v8439_v0 }
 0xca2   : > { %7794 = vmatpush3.bf16.msra.mxu1 %v8881_v12 }
 0xca3   : > { %7803 = vmatprep.subr.bf16.mxu1 %v8439_v0 }
 0xd6c   : > { %v3130_v63 = vpop.f32.mrb[20].mxu1 }
 0xd6d   : > { %v3131_v2 = vadd.f32 %v3130_v63, %v3057_v38  ;;  %v7370_v7 = vpop.f32.mrb[21].mxu1 }
 0xd6f   : > { %v3204_v10 = vadd.f32 %v3200_v55, %v3131_v2 }
 0xd70   : > { %v3311_v16 = vpop.f32.mrb[22].mxu1 }
 0xd71   : > { %v3205_v11 = vadd.f32 %v9072_v43, %v3204_v10  ;;  %v7388_v17 = vpop.f32.mrb[23].mxu1  ;;  %v3312_v18 = vadd.f32 %v8887_v13, %v3311_v16 }
 0xd72   : > { %v6862_v17 = vld [vmem:[%s9033_s18 + $0xc] sm:$0xf] }
 0xd73   : > { %8090 = vtanh.f32 %v3205_v11  ;;  %v6857_v15 = vmul.f32 -1.442695, %v3205_v11  ;;  %v3315_v20 = vmax.f32 %v3312_v18, 0.0 }
 0xd75   : > { %8092 = vpow2.f32 %v6857_v15  ;;  %v3316_v25 = vsub.f32 0.0, %v3315_v20 }
 0xd77   : > { %v3317_v26 = vmul.f32 1.442695, %v3316_v25 }
 0xd7d   : > { %v8091_v14 = vpop.eup %8090 }
 0xd7e   : > { %3215 = vrot.lane.b32.xlu0 %v8091_v14, %s8443_s22 }
 0xd7f   : > { %v8093_v21 = vpop.eup %8092 }
 0xd80   : > { %v3209_v23 = vadd.f32 1.0, %v8093_v21 }
 0xd82   : > { %8094 = vrcp.f32 %v3209_v23 }
 0xd83   : > { %8096 = vpow2.f32 %v3317_v26 }
 0xd8c   : > { %v8095_v27 = vpop.eup %8094 }
 0xd8d   : > { %v8097_v30 = vpop.eup %8096  ;;  %v3213_v32 = vmul.f32 %v8095_v27, %v9159_v50  ;;  %v3321_v50 = vmax.f32 %v3320_v45, 0.0  ;;  %v6882_v45 = vld [vmem:[%s8861_s19 + $0x10] sm:$0xf] }
 0xd8f   : > { %v3322_v46 = vsub.f32 0.0, %v3321_v50 }
 0xd91   : > { %v3323_v48 = vmul.f32 1.442695, %v3322_v46 }
 0xdf0   : > { %v3216_v28 = vpop.permute.xlu0 %3215 }
 0xdf1   : > { %v3218_v29 = vmul.f32 %v8095_v27, %v3216_v28 }
 0xdf3   : > { %3220 = vrot.lane.b32.xlu1 %v3218_v29, %s8444_s16 }
 0xdf7   : > { %3326 = vrot.lane.b32.xlu1 %v8097_v30, %s8445_s0 }
 0xe65   : > { %v3221_v33 = vpop.permute.xlu1 %3220 }
 0xe66   : > { %v9239_v35 = vadd.f32 %v3221_v33, %v3213_v32 }
 0xe68   : > { %8098 = vtanh.f32 %v9239_v35 }
 0xe69   : > { %v3327_v39 = vpop.permute.xlu1 %3326  ;;  %8100 = vpow2.f32 %v3323_v48 }
 0xe72   : > { %v8099_v38 = vpop.eup %8098 }
 0xe73   : > { %3226 = vrot.lane.b32.xlu0 %v8099_v38, %s8443_s22  ;;  %v8101_v52 = vpop.eup %8100 }
 0xee5   : > { %v3227_v36 = vpop.permute.xlu0 %3226 }
 0xee6   : > { %v3229_v41 = vmul.f32 %v8095_v27, %v3227_v36 }
 0xee8   : > { %v3329_v42 = vmul.f32 %v3327_v39, %v3229_v41 }
 0xeea   : > { %3331 = vrot.lane.b32.xlu0 %v3329_v42, %s8444_s16 }
 0xf5c   : > { %v3332_v49 = vpop.permute.xlu0 %3331 }
 0xf5d   : > { %7398 = vmatmul.mubr.msk.f32.vlgmr.msra.gmra.mrb[24].mxu1 %vm1261_vm5, %v3332_v49 }
 0xf5e   : > { %7806 = vmatpush3.bf16.msk.msra.mxu1 %vm8853_vm3, %v8920_v34  ;;  %7418 = vmatprep.mubr.msk.f32.mxu1 %vm8440_vm0, %v8441_v1 }
 0xf5f   : > { %7811 = vmatprep.subr.bf16.mxu1 %v8439_v0 }
 0xf61   : > { %7419 = vmatmul.mubr.msk.f32.vlgmr.msra.gmra.mrb[26].mxu1 %vm1154_vm4, %v8101_v52 }
 0xf62   : > { %7814 = vmatpush3.bf16.msk.msra.mxu1 %vm8853_vm3, %v9015_v62  ;;  %7432 = vmatprep.mubr.msk.f32.mxu1 %vm8440_vm0, %v8441_v1 }
 0xf63   : > { %7821 = vmatprep.subr.bf16.mxu1 %v8439_v0 }
0x1030   : > { %v3401_v55 = vpop.f32.mrb[24].mxu1 }
0x1031   : > { %v3402_v56 = vadd.f32 %v8946_v37, %v3401_v55  ;;  %v7399_v59 = vpop.f32.mrb[25].mxu1 }
0x1033   : > { %v3407_v60 = vmul.f32 %v3406_v53, %v3402_v56  ;;  %v3635_v26 = vsub.f32 %v6862_v17, %v3402_v56 }
0x1034   : > { %v3624_v37 = vpop.f32.mrb[26].mxu1 }
0x1035   : > { %v3408_v61 = vadd.f32 %v3407_v60, %v3405_v58  ;;  %v7420_v63 = vpop.f32.mrb[27].mxu1  ;;  %v3636_v30 = vand.u32 2147483647, %v3635_v26 }
0x1037   : > { %7405 = vmatmul.mubr.msk.f32.vlgmr.msra.gmra.mrb[26].mxu0 %vm1154_vm4, %v3408_v61 }
0x1038   : > { %7802 = vmatpush3.bf16.msk.msra.mxu0 %vm8853_vm3, %v8967_v47  ;;  %7411 = vmatprep.mubr.msk.f32.mxu0 %vm8440_vm0, %v8441_v1 }
0x1039   : > { %7807 = vmatprep.subr.bf16.mxu0 %v8439_v0 }
0x103b   : > { %7412 = vmatmul.mubr.msk.f32.vlgmr.msra.gmra.mrb[28].mxu0 %vm1154_vm4, %v6860_v22 }
0x103c   : > { %7810 = vmatpush3.bf16.msk.msra.mxu0 %vm8853_vm3, %v8980_v51  ;;  %7425 = vmatprep.mubr.msk.f32.mxu0 %vm8440_vm0, %v8441_v1 }
0x103d   : > { %7815 = vmatprep.subr.bf16.mxu0 %v8439_v0 }
0x103f   : > { %7426 = vmatmul.mubr.msk.f32.vlgmr.msra.gmra.mrb[30].mxu0 %vm1154_vm4, %v6860_v22 }
0x1040   : > { %7817 = vmatpush3.bf16.msra.mxu0 %v8990_v54  ;;  %7443 = vmatprep.mubr.msk.f32.mxu0 %vm8440_vm0, %v8441_v1 }
0x1041   : > { %7818 = vmatprep.subr.bf16.mxu0 %v8439_v0 }
0x1044   : > { %7820 = vmatpush3.bf16.msra.mxu0 %v8996_v57 }
0x1045   : > { %7831 = vmatprep.subr.bf16.mxu0 %v8439_v0 }
0x1047   : > { %7444 = vmatmul.mubr.msk.f32.vlgmr.msra.gmra.mrb[32].mxu0 %vm1261_vm5, %v3332_v49 }
0x1048   : > { %7834 = vmatpush3.bf16.msk.msra.mxu0 %vm8853_vm3, %v8910_v31  ;;  %7468 = vmatprep.mubr.msk.f32.mxu0 %vm8440_vm0, %v8441_v1 }
0x1049   : > { %7835 = vmatprep.subr.bf16.mxu0 %v8439_v0 }
0x110a   : > { %v3478_v2 = vpop.f32.mrb[26].mxu0 }
0x110b   : > { %v7406_v7 = vpop.f32.mrb[27].mxu0  ;;  %v3479_v11 = vadd.f32 %v9023_v3, %v3478_v2 }
0x110d   : > { %v3637_v20 = vsub.f32 %v6862_v17, %v3479_v11 }
0x110e   : > { %v3551_v10 = vpop.f32.mrb[28].mxu0 }
0x110f   : > { %v3625_v14 = vadd.f32 %v3624_v37, %v3551_v10  ;;  %v7413_v15 = vpop.f32.mrb[29].mxu0  ;;  %v3638_v28 = vand.u32 2147483647, %v3637_v20 }
0x1111   : > { %v3628_v16 = vadd.f32 %v9027_v6, %v3625_v14  ;;  %v3639_v36 = vadd.f32 %v3638_v28, %v3636_v30 }
0x1112   : > { %v3736_v18 = vpop.f32.mrb[30].mxu0 }
0x1113   : > { %v3629_v21 = vmul.f32 %v3628_v16, %v3479_v11  ;;  %v3630_v23 = vsub.f32 1.0, %v3628_v16  ;;  %v7427_v25 = vpop.f32.mrb[31].mxu0 }
0x1115   : > { %v3631_v27 = vmul.f32 %v3630_v23, %v3402_v56 }
0x1117   : > { %v3632_v29 = vadd.f32 %v3631_v27, %v3629_v21  ;;  %v9326_v21 = vld [vmem:[%s864_s20] ss:$0 sm:$0xff]  ;;  %s9813_s20 = scalar_lea.vmem [#allocation2], %s8806_s30 }
0x1118   : > { %v3998_v23 = vmul.f32 %v9326_v21, %v6882_v45 }
0x1119   : > { %v3633_v32 = vmul.f32 %v3632_v29, %v3406_v53  ;;  %v3640_v33 = vsub.f32 %v6862_v17, %v3632_v29 }
0x111a   : > { %v3879_v38 = vpop.f32.mrb[32].mxu0 }
0x111b   : > { %v3634_v39 = vadd.f32 %v3633_v32, %v3405_v58  ;;  %v7445_v41 = vpop.f32.mrb[33].mxu0  ;;  %v3641_v42 = vand.u32 2147483647, %v3640_v33  ;;  %v6881_v32 = vld [vmem:[%s8933_s1 + $0x10] sm:$0xf] }
0x111c   : > { %v6880_v33 = vld [vmem:[%s8939_s23 + $0x10] sm:$0xf] }
0x111d   : > { %6879 = vst.msk [vmem:[%s9044_s2 + $0xc] sm:$0xf] %vm1595_vm6, %v3634_v39  ;;  %7433 = vmatmul.mubr.msk.f32.vlgmr.msra.gmra.mrb[28].mxu1 %vm1154_vm4, %v3634_v39  ;;  %v9297_v44 = vadd.f32 %v3641_v42, %v3639_v36  ;;  %v9352_v39 = vld [vmem:[%s880_s26] ss:$0 sm:$0xff]  ;;  %v4084_v42 = vmul.f32 %v6881_v32, %v6880_v33 }
0x111e   : > { %7824 = vmatpush3.bf16.msk.msra.mxu1 %vm8853_vm3, %v8863_v5  ;;  %7450 = vmatprep.mubr.msk.f32.mxu1 %vm8440_vm0, %v8441_v1 }
0x111f   : > { %7825 = vmatprep.subr.bf16.mxu1 %v8439_v0 }
0x1121   : > { %7451 = vmatmul.mubr.msk.f32.vlgmr.msra.gmra.mrb[30].mxu1 %vm1154_vm4, %v6882_v45 }
0x1122   : > { %7827 = vmatpush3.bf16.msra.mxu1 %v8877_v9  ;;  %7461 = vmatprep.mubr.msk.f32.mxu1 %vm8440_vm0, %v8441_v1 }
0x1123   : > { %7828 = vmatprep.subr.bf16.mxu1 %v8439_v0 }
0x1126   : > { %7830 = vmatpush3.bf16.msra.mxu1 %v8881_v12 }
0x1127   : > { %7839 = vmatprep.subr.bf16.mxu1 %v8439_v0 }
0x11f0   : > { %v3809_v50 = vpop.f32.mrb[28].mxu1 }
0x11f1   : > { %v3810_v46 = vadd.f32 %v3809_v50, %v3736_v18  ;;  %v7434_v48 = vpop.f32.mrb[29].mxu1 }
0x11f3   : > { %v3883_v49 = vadd.f32 %v3879_v38, %v3810_v46  ;;  %v4085_v38 = vsub.f32 1.0, %v6881_v32 }
0x11f4   : > { %v3990_v53 = vpop.f32.mrb[30].mxu1 }
0x11f5   : > { %v3884_v52 = vadd.f32 %v9072_v43, %v3883_v49  ;;  %v7452_v55 = vpop.f32.mrb[31].mxu1  ;;  %v3991_v56 = vadd.f32 %v8887_v13, %v3990_v53 }
0x11f7   : > { %8102 = vtanh.f32 %v3884_v52  ;;  %v6878_v24 = vmul.f32 -1.442695, %v3884_v52  ;;  %v3994_v58 = vmax.f32 %v3991_v56, 0.0 }
0x11f9   : > { %8104 = vpow2.f32 %v6878_v24  ;;  %v3995_v61 = vsub.f32 0.0, %v3994_v58 }
0x11fb   : > { %v3996_v37 = vmul.f32 1.442695, %v3995_v61 }
0x1201   : > { %v8103_v22 = vpop.eup %8102 }
0x1202   : > { %3894 = vrot.lane.b32.xlu1 %v8103_v22, %s8443_s22 }
0x1203   : > { %v8105_v59 = vpop.eup %8104 }
0x1204   : > { %v3888_v60 = vadd.f32 1.0, %v8105_v59  ;;  %v6883_v59 = vld [vmem:[%s9033_s18 + $0x10] sm:$0xf] }
0x1206   : > { %8106 = vrcp.f32 %v3888_v60 }
0x1207   : > { %8108 = vpow2.f32 %v3996_v37 }
0x1210   : > { %v8107_v63 = vpop.eup %8106 }
0x1211   : > { %v8109_v10 = vpop.eup %8108  ;;  %v3892_v11 = vmul.f32 %v8107_v63, %v9239_v35  ;;  %v9331_v35 = vld [vmem:[%s872_s4] ss:$0 sm:$0xff] }
0x1212   : > { %v3999_v25 = vadd.f32 %v9331_v35, %v3998_v23 }
0x1214   : > { %v4000_v26 = vmax.f32 %v3999_v25, 0.0 }
0x1216   : > { %v4001_v27 = vsub.f32 0.0, %v4000_v26  ;;  %v6903_v26 = vld [vmem:[%s8861_s19 + $0x14] sm:$0xf] }
0x1218   : > { %v4002_v28 = vmul.f32 1.442695, %v4001_v27 }
0x1274   : > { %v3895_v2 = vpop.permute.xlu1 %3894 }
0x1275   : > { %v3897_v7 = vmul.f32 %v8107_v63, %v3895_v2 }
0x1277   : > { %3899 = vrot.lane.b32.xlu0 %v3897_v7, %s8444_s16 }
0x127b   : > { %4005 = vrot.lane.b32.xlu0 %v8109_v10, %s8445_s0 }
0x12e9   : > { %v3900_v13 = vpop.permute.xlu0 %3899 }
0x12ea   : > { %v9319_v14 = vadd.f32 %v3900_v13, %v3892_v11 }
0x12ec   : > { %8110 = vtanh.f32 %v9319_v14 }
0x12ed   : > { %v4006_v17 = vpop.permute.xlu0 %4005  ;;  %8112 = vpow2.f32 %v4002_v28 }
0x12f6   : > { %v8111_v15 = vpop.eup %8110 }
0x12f7   : > { %3905 = vrot.lane.b32.xlu1 %v8111_v15, %s8443_s22  ;;  %v8113_v30 = vpop.eup %8112 }
0x1369   : > { %v3906_v16 = vpop.permute.xlu1 %3905 }
0x136a   : > { %v3908_v18 = vmul.f32 %v8107_v63, %v3906_v16 }
0x136c   : > { %v4008_v20 = vmul.f32 %v4006_v17, %v3908_v18 }
0x136e   : > { %4010 = vrot.lane.b32.xlu1 %v4008_v20, %s8444_s16 }
0x13e0   : > { %v4011_v29 = vpop.permute.xlu1 %4010 }
0x13e1   : > { %7462 = vmatmul.mubr.msk.f32.vlgmr.msra.gmra.mrb[32].mxu1 %vm1261_vm5, %v4011_v29 }
0x13e2   : > { %7842 = vmatpush3.bf16.msk.msra.mxu1 %vm8853_vm3, %v8920_v34  ;;  %7482 = vmatprep.mubr.msk.f32.mxu1 %vm8440_vm0, %v8441_v1 }
0x13e3   : > { %7847 = vmatprep.subr.bf16.mxu1 %v8439_v0 }
0x13e5   : > { %7483 = vmatmul.mubr.msk.f32.vlgmr.msra.gmra.mrb[34].mxu1 %vm1154_vm4, %v8113_v30 }
0x13e6   : > { %7850 = vmatpush3.bf16.msk.msra.mxu1 %vm8853_vm3, %v9015_v62  ;;  %7496 = vmatprep.mubr.msk.f32.mxu1 %vm8440_vm0, %v8441_v1 }
0x13e7   : > { %7857 = vmatprep.subr.bf16.mxu1 %v8439_v0 }
0x14b4   : > { %v4080_v36 = vpop.f32.mrb[32].mxu1 }
0x14b5   : > { %v4081_v41 = vadd.f32 %v9352_v39, %v4080_v36  ;;  %v7463_v45 = vpop.f32.mrb[33].mxu1 }
0x14b7   : > { %v4086_v50 = vmul.f32 %v4085_v38, %v4081_v41  ;;  %v4314_v7 = vsub.f32 %v6883_v59, %v4081_v41 }
0x14b8   : > { %v4303_v48 = vpop.f32.mrb[34].mxu1 }
0x14b9   : > { %v4087_v46 = vadd.f32 %v4086_v50, %v4084_v42  ;;  %v7484_v49 = vpop.f32.mrb[35].mxu1  ;;  %v4315_v15 = vand.u32 2147483647, %v4314_v7 }
0x14bb   : > { %7469 = vmatmul.mubr.msk.f32.vlgmr.msra.gmra.mrb[34].mxu0 %vm1154_vm4, %v4087_v46 }
0x14bc   : > { %7838 = vmatpush3.bf16.msk.msra.mxu0 %vm8853_vm3, %v8967_v47  ;;  %7475 = vmatprep.mubr.msk.f32.mxu0 %vm8440_vm0, %v8441_v1 }
0x14bd   : > { %7843 = vmatprep.subr.bf16.mxu0 %v8439_v0 }
0x14bf   : > { %7476 = vmatmul.mubr.msk.f32.vlgmr.msra.gmra.mrb[36].mxu0 %vm1154_vm4, %v6881_v32 }
0x14c0   : > { %7846 = vmatpush3.bf16.msk.msra.mxu0 %vm8853_vm3, %v8980_v51  ;;  %7489 = vmatprep.mubr.msk.f32.mxu0 %vm8440_vm0, %v8441_v1 }
0x14c1   : > { %7851 = vmatprep.subr.bf16.mxu0 %v8439_v0 }
0x14c3   : > { %7490 = vmatmul.mubr.msk.f32.vlgmr.msra.gmra.mrb[38].mxu0 %vm1154_vm4, %v6881_v32 }
0x14c4   : > { %7853 = vmatpush3.bf16.msra.mxu0 %v8990_v54  ;;  %7507 = vmatprep.mubr.msk.f32.mxu0 %vm8440_vm0, %v8441_v1 }
0x14c5   : > { %7854 = vmatprep.subr.bf16.mxu0 %v8439_v0 }
0x14c8   : > { %7856 = vmatpush3.bf16.msra.mxu0 %v8996_v57 }
0x14c9   : > { %7867 = vmatprep.subr.bf16.mxu0 %v8439_v0 }
0x14cb   : > { %7508 = vmatmul.mubr.msk.f32.vlgmr.msra.gmra.mrb[40].mxu0 %vm1261_vm5, %v4011_v29 }
0x14cc   : > { %7870 = vmatpush3.bf16.msk.msra.mxu0 %vm8853_vm3, %v8910_v31  ;;  %7532 = vmatprep.mubr.msk.f32.mxu0 %vm8440_vm0, %v8441_v1 }
0x14cd   : > { %7871 = vmatprep.subr.bf16.mxu0 %v8439_v0 }
0x158e   : > { %v4157_v52 = vpop.f32.mrb[34].mxu0 }
0x158f   : > { %v7470_v22 = vpop.f32.mrb[35].mxu0  ;;  %v4158_v53 = vadd.f32 %v9023_v3, %v4157_v52 }
0x1591   : > { %v4316_v61 = vsub.f32 %v6883_v59, %v4158_v53 }
0x1592   : > { %v4230_v24 = vpop.f32.mrb[36].mxu0 }
0x1593   : > { %v4304_v55 = vadd.f32 %v4303_v48, %v4230_v24  ;;  %v7477_v56 = vpop.f32.mrb[37].mxu0  ;;  %v4317_v11 = vand.u32 2147483647, %v4316_v61 }
0x1595   : > { %v4307_v58 = vadd.f32 %v9027_v6, %v4304_v55  ;;  %v4318_v18 = vadd.f32 %v4317_v11, %v4315_v15 }
0x1596   : > { %v4415_v60 = vpop.f32.mrb[38].mxu0 }
0x1597   : > { %v4308_v37 = vmul.f32 %v4307_v58, %v4158_v53  ;;  %v4309_v63 = vsub.f32 1.0, %v4307_v58  ;;  %v7491_v2 = vpop.f32.mrb[39].mxu0 }
0x1598   : > { %v4677_v2 = vmul.f32 %v9326_v21, %v6903_v26 }
0x1599   : > { %v4310_v10 = vmul.f32 %v4309_v63, %v4081_v41 }
0x159a   : > { %v4678_v7 = vadd.f32 %v9331_v35, %v4677_v2 }
0x159b   : > { %v4311_v13 = vadd.f32 %v4310_v10, %v4308_v37 }
0x159d   : > { %v4312_v16 = vmul.f32 %v4311_v13, %v4085_v38  ;;  %v4319_v17 = vsub.f32 %v6883_v59, %v4311_v13 }
0x159e   : > { %v4558_v3 = vpop.f32.mrb[40].mxu0 }
0x159f   : > { %v4313_v20 = vadd.f32 %v4312_v16, %v4084_v42  ;;  %v7509_v23 = vpop.f32.mrb[41].mxu0  ;;  %v4320_v6 = vand.u32 2147483647, %v4319_v17  ;;  %v9409_v42 = vld [vmem:[%s9813_s20] ss:$0 sm:$0xff] }
0x15a0   : > { %v6902_v16 = vld [vmem:[%s8933_s1 + $0x14] sm:$0xf] }
0x15a1   : > { %6900 = vst.msk [vmem:[%s9044_s2 + $0x10] sm:$0xf] %vm1595_vm6, %v4313_v20  ;;  %7497 = vmatmul.mubr.msk.f32.vlgmr.msra.gmra.mrb[36].mxu1 %vm1154_vm4, %v4313_v20  ;;  %v9389_v25 = vadd.f32 %v4320_v6, %v4318_v18  ;;  %v6901_v17 = vld [vmem:[%s8939_s23 + $0x14] sm:$0xf] }
0x15a2   : > { %7860 = vmatpush3.bf16.msk.msra.mxu1 %vm8853_vm3, %v8863_v5  ;;  %7514 = vmatprep.mubr.msk.f32.mxu1 %vm8440_vm0, %v8441_v1  ;;  %v4763_v23 = vmul.f32 %v6902_v16, %v6901_v17 }
0x15a3   : > { %7861 = vmatprep.subr.bf16.mxu1 %v8439_v0 }
0x15a5   : > { %7515 = vmatmul.mubr.msk.f32.vlgmr.msra.gmra.mrb[38].mxu1 %vm1154_vm4, %v6903_v26 }
0x15a6   : > { %7863 = vmatpush3.bf16.msra.mxu1 %v8877_v9  ;;  %7525 = vmatprep.mubr.msk.f32.mxu1 %vm8440_vm0, %v8441_v1 }
0x15a7   : > { %7864 = vmatprep.subr.bf16.mxu1 %v8439_v0 }
0x15aa   : > { %7866 = vmatpush3.bf16.msra.mxu1 %v8881_v12 }
0x15ab   : > { %7875 = vmatprep.subr.bf16.mxu1 %v8439_v0 }
0x1674   : > { %v4488_v27 = vpop.f32.mrb[36].mxu1 }
0x1675   : > { %v4489_v28 = vadd.f32 %v4488_v27, %v4415_v60  ;;  %v7498_v29 = vpop.f32.mrb[37].mxu1 }
0x1677   : > { %v4562_v30 = vadd.f32 %v4558_v3, %v4489_v28  ;;  %v4764_v3 = vsub.f32 1.0, %v6902_v16 }
0x1678   : > { %v4669_v36 = vpop.f32.mrb[38].mxu1 }
0x1679   : > { %v4563_v32 = vadd.f32 %v9072_v43, %v4562_v30  ;;  %v7516_v41 = vpop.f32.mrb[39].mxu1  ;;  %v4670_v45 = vadd.f32 %v9409_v42, %v4669_v36 }
0x167b   : > { %8114 = vtanh.f32 %v4563_v32  ;;  %v6899_v38 = vmul.f32 -1.442695, %v4563_v32  ;;  %v4673_v50 = vmax.f32 %v4670_v45, 0.0 }
0x167d   : > { %8116 = vpow2.f32 %v6899_v38  ;;  %v4674_v49 = vsub.f32 0.0, %v4673_v50  ;;  %v9469_v38 = vld [vmem:[%s888_s7] ss:$0 sm:$0xff]  ;;  %s9814_s7 = sld [smem:[#allocation30_spill]] }
0x167e   : > { %v9474_v50 = vld [vmem:[%s896_s29] ss:$0 sm:$0xff] }
0x167f   : > { %v4675_v52 = vmul.f32 1.442695, %v4674_v49 }
0x1683   : > { %s9590_s29 = scalar_lea.vmem %s9814_s7, %s8847_s21  ;;  %s9815_s21 = sld [smem:[#allocation24_spill]] }
0x1685   : > { %v8115_v33 = vpop.eup %8114 }
0x1686   : > { %4573 = vrot.lane.b32.xlu0 %v8115_v33, %s8443_s22 }
0x1687   : > { %v8117_v46 = vpop.eup %8116 }
0x1688   : > { %v4567_v48 = vadd.f32 1.0, %v8117_v46 }
0x1689   : > { %p9817_p10 = scmp.ne.s32.totalorder %s9815_s21, 0 }
0x168a   : > { %8118 = vrcp.f32 %v4567_v48  ;;  %v6904_v48 = vld [vmem:[%s9033_s18 + $0x14] sm:$0xf] }
0x168b   : > { %8120 = vpow2.f32 %v4675_v52 }
0x1694   : > { %v8119_v43 = vpop.eup %8118 }
0x1695   : > { %v8121_v53 = vpop.eup %8120  ;;  %v4571_v55 = vmul.f32 %v8119_v43, %v9319_v14  ;;  %v4679_v14 = vmax.f32 %v4678_v7, 0.0 }
0x1697   : > { %v4680_v10 = vsub.f32 0.0, %v4679_v14 }
0x1699   : > { %v4681_v11 = vmul.f32 1.442695, %v4680_v10 }
0x16f8   : > { %v4574_v22 = vpop.permute.xlu0 %4573 }
0x16f9   : > { %v4576_v24 = vmul.f32 %v8119_v43, %v4574_v22 }
0x16fb   : > { %4578 = vrot.lane.b32.xlu1 %v4576_v24, %s8444_s16 }
0x16ff   : > { %4684 = vrot.lane.b32.xlu1 %v8121_v53, %s8445_s0 }
0x176d   : > { %v4579_v56 = vpop.permute.xlu1 %4578 }
0x176e   : > { %v9415_v58 = vadd.f32 %v4579_v56, %v4571_v55 }
0x1770   : > { %8122 = vtanh.f32 %v9415_v58 }
0x1771   : > { %v4685_v61 = vpop.permute.xlu1 %4684  ;;  %8124 = vpow2.f32 %v4681_v11 }
0x177a   : > { %v8123_v59 = vpop.eup %8122 }
0x177b   : > { %4584 = vrot.lane.b32.xlu0 %v8123_v59, %s8443_s22  ;;  %v8125_v15 = vpop.eup %8124 }
0x17ed   : > { %v4585_v60 = vpop.permute.xlu0 %4584 }
0x17ee   : > { %v4587_v37 = vmul.f32 %v8119_v43, %v4585_v60 }
0x17f0   : > { %v4687_v63 = vmul.f32 %v4685_v61, %v4587_v37 }
0x17f2   : > { %4689 = vrot.lane.b32.xlu0 %v4687_v63, %s8444_s16 }
0x1864   : > { %v4690_v13 = vpop.permute.xlu0 %4689 }
0x1865   : > { %7526 = vmatmul.mubr.msk.f32.vlgmr.msra.gmra.mrb[40].mxu1 %vm1261_vm5, %v4690_v13 }
0x1866   : > { %7878 = vmatpush3.bf16.msk.msra.mxu1 %vm8853_vm3, %v8920_v34  ;;  %7546 = vmatprep.mubr.msk.f32.mxu1 %vm8440_vm0, %v8441_v1 }
0x1867   : > { %7883 = vmatprep.subr.bf16.mxu1 %v8439_v0 }
0x1869   : > { %7547 = vmatmul.mubr.msk.f32.vlgmr.msra.gmra.mrb[42].mxu1 %vm1154_vm4, %v8125_v15 }
0x186a   : > { %7886 = vmatpush3.bf16.msk.msra.mxu1 %vm8853_vm3, %v9015_v62  ;;  %7560 = vmatprep.mubr.msk.f32.mxu1 %vm8440_vm0, %v8441_v1 }
0x186b   : > { %7893 = vmatprep.subr.bf16.mxu1 %v8439_v0 }
0x1938   : > { %v4759_v18 = vpop.f32.mrb[40].mxu1 }
0x1939   : > { %v4760_v20 = vadd.f32 %v9352_v39, %v4759_v18  ;;  %v7527_v6 = vpop.f32.mrb[41].mxu1  ;;  %v9498_v18 = vld [vmem:[%s9069_s5] ss:$0 sm:$0xff] }
0x193b   : > { %v4765_v26 = vmul.f32 %v4764_v3, %v4760_v20  ;;  %v4993_v53 = vsub.f32 %v6904_v48, %v4760_v20 }
0x193c   : > { %v4982_v28 = vpop.f32.mrb[42].mxu1 }
0x193d   : > { %v4766_v27 = vadd.f32 %v4765_v26, %v4763_v23  ;;  %v7548_v29 = vpop.f32.mrb[43].mxu1  ;;  %v4994_v60 = vand.u32 2147483647, %v4993_v53 }
0x193f   : > { %7533 = vmatmul.mubr.msk.f32.vlgmr.msra.gmra.mrb[42].mxu0 %vm1154_vm4, %v4766_v27 }
0x1940   : > { %7874 = vmatpush3.bf16.msk.msra.mxu0 %vm8853_vm3, %v8967_v47  ;;  %7539 = vmatprep.mubr.msk.f32.mxu0 %vm8440_vm0, %v8441_v1 }
0x1941   : > { %7879 = vmatprep.subr.bf16.mxu0 %v8439_v0 }
0x1943   : > { %7540 = vmatmul.mubr.msk.f32.vlgmr.msra.gmra.mrb[44].mxu0 %vm1154_vm4, %v6902_v16 }
0x1944   : > { %7882 = vmatpush3.bf16.msk.msra.mxu0 %vm8853_vm3, %v8980_v51  ;;  %7553 = vmatprep.mubr.msk.f32.mxu0 %vm8440_vm0, %v8441_v1 }
0x1945   : > { %7887 = vmatprep.subr.bf16.mxu0 %v8439_v0 }
0x1947   : > { %7554 = vmatmul.mubr.msk.f32.vlgmr.msra.gmra.mrb[46].mxu0 %vm1154_vm4, %v6902_v16 }
0x1948   : > { %7889 = vmatpush3.bf16.msra.mxu0 %v8990_v54  ;;  %7571 = vmatprep.mubr.msk.f32.mxu0 %vm8440_vm0, %v8441_v1 }
0x1949   : > { %7890 = vmatprep.subr.bf16.mxu0 %v8439_v0 }
0x194c   : > { %7892 = vmatpush3.bf16.msra.mxu0 %v8996_v57 }
0x194d   : > { %7903 = vmatprep.subr.bf16.mxu0 %v8439_v0 }
0x194f   : > { %7572 = vmatmul.mubr.msk.f32.vlgmr.msra.gmra.mrb[48].mxu0 %vm1261_vm5, %v4690_v13  ;;  %v6924_v13 = vld [vmem:[%s8861_s19 + $0x18] sm:$0xf] }
0x1950   : > { %7906 = vmatpush3.bf16.msk.msra.mxu0 %vm8853_vm3, %v8910_v31  ;;  %7596 = vmatprep.mubr.msk.f32.mxu0 %vm8440_vm0, %v8441_v1 }
0x1951   : > { %7907 = vmatprep.subr.bf16.mxu0 %v8439_v0 }
0x1a12   : > { %v4836_v30 = vpop.f32.mrb[42].mxu0 }
0x1a13   : > { %v7534_v32 = vpop.f32.mrb[43].mxu0  ;;  %v4837_v36 = vadd.f32 %v9469_v38, %v4836_v30 }
0x1a15   : > { %v4995_v52 = vsub.f32 %v6904_v48, %v4837_v36 }
0x1a16   : > { %v4909_v33 = vpop.f32.mrb[44].mxu0 }
0x1a17   : > { %v4983_v41 = vadd.f32 %v4982_v28, %v4909_v33  ;;  %v7541_v45 = vpop.f32.mrb[45].mxu0  ;;  %v4996_v56 = vand.u32 2147483647, %v4995_v52 }
0x1a19   : > { %v4986_v46 = vadd.f32 %v9474_v50, %v4983_v41  ;;  %v4997_v2 = vadd.f32 %v4996_v56, %v4994_v60 }
0x1a1a   : > { %v5094_v49 = vpop.f32.mrb[46].mxu0 }
0x1a1b   : > { %v4987_v43 = vmul.f32 %v4986_v46, %v4837_v36  ;;  %v4988_v22 = vsub.f32 1.0, %v4986_v46  ;;  %v7555_v24 = vpop.f32.mrb[47].mxu0 }
0x1a1d   : > { %v4989_v55 = vmul.f32 %v4988_v22, %v4760_v20 }
0x1a1f   : > { %v4990_v59 = vadd.f32 %v4989_v55, %v4987_v43 }
0x1a21   : > { %v4991_v61 = vmul.f32 %v4990_v59, %v4764_v3  ;;  %v4998_v37 = vsub.f32 %v6904_v48, %v4990_v59  ;;  %v5356_v59 = vmul.f32 %v9326_v21, %v6924_v13 }
0x1a22   : > { %v5237_v63 = vpop.f32.mrb[48].mxu0 }
0x1a23   : > { %v4992_v7 = vadd.f32 %v4991_v61, %v4763_v23  ;;  %v7573_v14 = vpop.f32.mrb[49].mxu0  ;;  %v4999_v10 = vand.u32 2147483647, %v4998_v37  ;;  %v5357_v60 = vadd.f32 %v9331_v35, %v5356_v59 }
0x1a24   : > { %v6922_v14 = vld [vmem:[%s8939_s23 + $0x18] sm:$0xf] }
0x1a25   : > { %6921 = vst.msk [vmem:[%s9044_s2 + $0x14] sm:$0xf] %vm1595_vm6, %v4992_v7  ;;  %7561 = vmatmul.mubr.msk.f32.vlgmr.msra.gmra.mrb[44].mxu1 %vm1154_vm4, %v4992_v7  ;;  %v9481_v11 = vadd.f32 %v4999_v10, %v4997_v2  ;;  %v6923_v7 = vld [vmem:[%s8933_s1 + $0x18] sm:$0xf] }
0x1a26   : > { %7896 = vmatpush3.bf16.msk.msra.mxu1 %vm8853_vm3, %v8863_v5  ;;  %7578 = vmatprep.mubr.msk.f32.mxu1 %vm8440_vm0, %v8441_v1  ;;  %v5443_v10 = vsub.f32 1.0, %v6923_v7 }
0x1a27   : > { %7897 = vmatprep.subr.bf16.mxu1 %v8439_v0 }
0x1a29   : > { %7579 = vmatmul.mubr.msk.f32.vlgmr.msra.gmra.mrb[46].mxu1 %vm1154_vm4, %v6924_v13 }
0x1a2a   : > { %7899 = vmatpush3.bf16.msra.mxu1 %v8877_v9  ;;  %7589 = vmatprep.mubr.msk.f32.mxu1 %vm8440_vm0, %v8441_v1 }
0x1a2b   : > { %7900 = vmatprep.subr.bf16.mxu1 %v8439_v0 }
0x1a2e   : > { %7902 = vmatpush3.bf16.msra.mxu1 %v8881_v12 }
0x1a2f   : > { %7911 = vmatprep.subr.bf16.mxu1 %v8439_v0 }
0x1af8   : > { %v5167_v15 = vpop.f32.mrb[44].mxu1 }
0x1af9   : > { %v5168_v16 = vadd.f32 %v5167_v15, %v5094_v49  ;;  %v7562_v17 = vpop.f32.mrb[45].mxu1 }
0x1afb   : > { %v5241_v3 = vadd.f32 %v5237_v63, %v5168_v16  ;;  %v5442_v16 = vmul.f32 %v6923_v7, %v6922_v14 }
0x1afc   : > { %v5348_v26 = vpop.f32.mrb[46].mxu1 }
0x1afd   : > { %v5242_v20 = vadd.f32 %v9498_v18, %v5241_v3  ;;  %v7580_v27 = vpop.f32.mrb[47].mxu1  ;;  %v5349_v28 = vadd.f32 %v9409_v42, %v5348_v26 }
0x1aff   : > { %8126 = vtanh.f32 %v5242_v20  ;;  %v6920_v6 = vmul.f32 -1.442695, %v5242_v20  ;;  %v5352_v29 = vmax.f32 %v5349_v28, 0.0 }
0x1b01   : > { %8128 = vpow2.f32 %v6920_v6  ;;  %v5353_v33 = vsub.f32 0.0, %v5352_v29  ;;  %v6925_v29 = vld [vmem:[%s9033_s18 + $0x18] sm:$0xf] }
0x1b03   : > { %v5354_v36 = vmul.f32 1.442695, %v5353_v33 }
0x1b09   : > { %v8127_v23 = vpop.eup %8126 }
0x1b0a   : > { %5252 = vrot.lane.b32.xlu1 %v8127_v23, %s8443_s22 }
0x1b0b   : > { %v8129_v30 = vpop.eup %8128 }
0x1b0c   : > { %v5246_v32 = vadd.f32 1.0, %v8129_v30 }
0x1b0e   : > { %8130 = vrcp.f32 %v5246_v32 }
0x1b0f   : > { %8132 = vpow2.f32 %v5354_v36 }
0x1b18   : > { %v8131_v41 = vpop.eup %8130 }
0x1b19   : > { %v8133_v48 = vpop.eup %8132  ;;  %v5250_v49 = vmul.f32 %v8131_v41, %v9415_v58  ;;  %v5358_v58 = vmax.f32 %v5357_v60, 0.0 }
0x1b1b   : > { %v5359_v61 = vsub.f32 0.0, %v5358_v58  ;;  %v9570_v58 = vld [vmem:[%s8861_s19 + $0x1c] sm:$0xf]  ;;  %s6976_s19 = sshll.u32 %s8579_s3, 9 }
0x1b1c   : > { %s9655_s24 = scalar_lea.hbm %s9816_s28, %s6976_s19 }
0x1b1d   : > { %v5360_v37 = vmul.f32 1.442695, %v5359_v61 }
0x1b7c   : > { %v5253_v45 = vpop.permute.xlu1 %5252 }
0x1b7d   : > { %v5255_v46 = vmul.f32 %v8131_v41, %v5253_v45 }
0x1b7f   : > { %5257 = vrot.lane.b32.xlu0 %v5255_v46, %s8444_s16 }
0x1b83   : > { %5363 = vrot.lane.b32.xlu0 %v8133_v48, %s8445_s0 }
0x1bf1   : > { %v5258_v52 = vpop.permute.xlu0 %5257 }
0x1bf2   : > { %v9506_v43 = vadd.f32 %v5258_v52, %v5250_v49 }
0x1bf4   : > { %8134 = vtanh.f32 %v9506_v43 }
0x1bf5   : > { %v5364_v53 = vpop.permute.xlu0 %5363  ;;  %8136 = vpow2.f32 %v5360_v37 }
0x1bfe   : > { %v8135_v22 = vpop.eup %8134 }
0x1bff   : > { %5263 = vrot.lane.b32.xlu1 %v8135_v22, %s8443_s22  ;;  %v8137_v2 = vpop.eup %8136 }
0x1c71   : > { %v5264_v24 = vpop.permute.xlu1 %5263 }
0x1c72   : > { %v5266_v55 = vmul.f32 %v8131_v41, %v5264_v24 }
0x1c74   : > { %v5366_v56 = vmul.f32 %v5364_v53, %v5266_v55 }
0x1c76   : > { %5368 = vrot.lane.b32.xlu1 %v5366_v56, %s8444_s16 }
0x1ce8   : > { %v5369_v63 = vpop.permute.xlu1 %5368 }
0x1ce9   : > { %7590 = vmatmul.mubr.msk.f32.vlgmr.msra.gmra.mrb[48].mxu1 %vm1261_vm5, %v5369_v63 }
0x1cea   : > { %7914 = vmatpush3.bf16.msk.msra.mxu1 %vm8853_vm3, %v8920_v34  ;;  %7610 = vmatprep.mubr.msk.f32.mxu1 %vm8440_vm0, %v8441_v1 }
0x1ceb   : > { %7919 = vmatprep.subr.bf16.mxu1 %v8439_v0 }
0x1ced   : > { %7611 = vmatmul.mubr.msk.f32.vlgmr.msra.gmra.mrb[50].mxu1 %vm1154_vm4, %v8137_v2 }
0x1cee   : > { %7922 = vmatpush3.bf16.msk.msra.mxu1 %vm8853_vm3, %v9015_v62  ;;  %7624 = vmatprep.mubr.msk.f32.mxu1 %vm8440_vm0, %v8441_v1 }
0x1cef   : > { %7929 = vmatprep.subr.bf16.mxu1 %v8439_v0 }
0x1dbc   : > { %v5438_v13 = vpop.f32.mrb[48].mxu1 }
0x1dbd   : > { %v5439_v15 = vadd.f32 %v9352_v39, %v5438_v13  ;;  %v7591_v17 = vpop.f32.mrb[49].mxu1 }
0x1dbf   : > { %v5444_v3 = vmul.f32 %v5443_v10, %v5439_v15  ;;  %v5672_v41 = vsub.f32 %v6925_v29, %v5439_v15 }
0x1dc1   : > { %v5445_v20 = vadd.f32 %v5444_v3, %v5442_v16  ;;  %v5673_v49 = vand.u32 2147483647, %v5672_v41 }
0x1dc3   : > { %7597 = vmatmul.mubr.msk.f32.vlgmr.msra.gmra.mrb[50].mxu0 %vm1154_vm4, %v5445_v20 }
0x1dc4   : > { %7910 = vmatpush3.bf16.msk.msra.mxu0 %vm8853_vm3, %v8967_v47  ;;  %7603 = vmatprep.mubr.msk.f32.mxu0 %vm8440_vm0, %v8441_v1 }
0x1dc5   : > { %7915 = vmatprep.subr.bf16.mxu0 %v8439_v0 }
0x1dc7   : > { %7604 = vmatmul.mubr.msk.f32.vlgmr.msra.gmra.mrb[52].mxu0 %vm1154_vm4, %v6923_v7 }
0x1dc8   : > { %7918 = vmatpush3.bf16.msk.msra.mxu0 %vm8853_vm3, %v8980_v51  ;;  %7617 = vmatprep.mubr.msk.f32.mxu0 %vm8440_vm0, %v8441_v1  ;;  %v5661_v51 = vpop.f32.mrb[50].mxu1 }
0x1dc9   : > { %7923 = vmatprep.subr.bf16.mxu0 %v8439_v0 }
0x1dcb   : > { %7618 = vmatmul.mubr.msk.f32.vlgmr.msra.gmra.mrb[54].mxu0 %vm1154_vm4, %v6923_v7 }
0x1dcc   : > { %7925 = vmatpush3.bf16.msra.mxu0 %v8990_v54  ;;  %7635 = vmatprep.mubr.msk.f32.mxu0 %vm8440_vm0, %v8441_v1  ;;  %v7612_v54 = vpop.f32.mrb[51].mxu1 }
0x1dcd   : > { %7926 = vmatprep.subr.bf16.mxu0 %v8439_v0  ;;  %v6821_v54 = vld [vmem:[%s9590_s29 + $0x4] sm:$0xf] }
0x1dd0   : > { %7928 = vmatpush3.bf16.msra.mxu0 %v8996_v57 }
0x1dd1   : > { %7939 = vmatprep.subr.bf16.mxu0 %v8439_v0 }
0x1dd3   : > { %7636 = vmatmul.mubr.msk.f32.vlgmr.msra.gmra.mrb[56].mxu0 %vm1261_vm5, %v5369_v63 }
0x1dd4   : > { %7942 = vmatpush3.bf16.msk.msra.mxu0 %vm8853_vm3, %v8910_v31  ;;  %7660 = vmatprep.mubr.msk.f32.mxu0 %vm8440_vm0, %v8441_v1 }
0x1dd5   : > { %7943 = vmatprep.subr.bf16.mxu0 %v8439_v0 }
0x1e96   : > { %v5515_v62 = vpop.f32.mrb[50].mxu0 }
0x1e97   : > { %v7598_v23 = vpop.f32.mrb[51].mxu0  ;;  %v5516_v57 = vadd.f32 %v9469_v38, %v5515_v62 }
0x1e98   : > { %v2285_v23 = vmul.f32 %v6821_v54, %v9137_v19  ;;  %v6905_v19 = vld [vmem:[%s9590_s29 + $0x14] sm:$0xf] }
0x1e99   : > { %v5674_v32 = vsub.f32 %v6925_v29, %v5516_v57 }
0x1e9a   : > { %v5588_v6 = vpop.f32.mrb[52].mxu0 }
0x1e9b   : > { %v5662_v26 = vadd.f32 %v5661_v51, %v5588_v6  ;;  %v7605_v27 = vpop.f32.mrb[53].mxu0  ;;  %v5675_v46 = vand.u32 2147483647, %v5674_v32  ;;  %v6842_v6 = vld [vmem:[%s9590_s29 + $0x8] sm:$0xf] }
0x1e9c   : > { %v6863_v27 = vld [vmem:[%s9590_s29 + $0xc] sm:$0xf] }
0x1e9d   : > { %v5665_v28 = vadd.f32 %v9474_v50, %v5662_v26  ;;  %v5676_v53 = vadd.f32 %v5675_v46, %v5673_v49  ;;  %v2964_v26 = vmul.f32 %v6842_v6, %v9217_v8  ;;  %v6926_v8 = vld [vmem:[%s9590_s29 + $0x18] sm:$0xf] }
0x1e9e   : > { %v5773_v30 = vpop.f32.mrb[54].mxu0 }
0x1e9f   : > { %v5666_v31 = vmul.f32 %v5665_v28, %v5516_v57  ;;  %v5667_v33 = vsub.f32 1.0, %v5665_v28  ;;  %v7619_v36 = vpop.f32.mrb[55].mxu0  ;;  %v2298_v57 = vsel %vm1595_vm6, %v2285_v23, 0.0  ;;  %v2977_v28 = vsel %vm1595_vm6, %v2964_v26, 0.0 }
0x1ea0   : > { %v5001_v36 = vmul.f32 %v6905_v19, %v9481_v11 }
0x1ea1   : > { %v5668_v45 = vmul.f32 %v5667_v33, %v5439_v15 }
0x1ea2   : > { %v5014_v41 = vsel %vm1595_vm6, %v5001_v36, 0.0 }
0x1ea3   : > { %v5669_v48 = vadd.f32 %v5668_v45, %v5666_v31 }
0x1ea5   : > { %v5670_v52 = vmul.f32 %v5669_v48, %v5443_v10  ;;  %v5677_v22 = vsub.f32 %v6925_v29, %v5669_v48  ;;  %v3643_v29 = vmul.f32 %v6863_v27, %v9297_v44 }
0x1ea6   : > { %v5916_v24 = vpop.f32.mrb[56].mxu0 }
0x1ea7   : > { %v5671_v55 = vadd.f32 %v5670_v52, %v5442_v16  ;;  %v7637_v56 = vpop.f32.mrb[57].mxu0  ;;  %v5678_v59 = vand.u32 2147483647, %v5677_v22  ;;  %v3656_v32 = vsel %vm1595_vm6, %v3643_v29, 0.0 }
0x1ea9   : > { %6942 = vst.msk [vmem:[%s9044_s2 + $0x18] sm:$0xf] %vm1595_vm6, %v5671_v55  ;;  %7625 = vmatmul.mubr.msk.f32.vlgmr.msra.gmra.mrb[52].mxu1 %vm1154_vm4, %v5671_v55  ;;  %v5679_v60 = vadd.f32 %v5678_v59, %v5676_v53 }
0x1eaa   : > { %7932 = vmatpush3.bf16.msk.msra.mxu1 %vm8853_vm3, %v8863_v5  ;;  %7642 = vmatprep.mubr.msk.f32.mxu1 %vm8440_vm0, %v8441_v1 }
0x1eab   : > { %7933 = vmatprep.subr.bf16.mxu1 %v8439_v0  ;;  %v5680_v45 = vmul.f32 %v6926_v8, %v5679_v60 }
0x1ead   : > { %7643 = vmatmul.mubr.msk.f32.vlgmr.msra.gmra.mrb[54].mxu1 %vm1154_vm4, %v9570_v58  ;;  %v5693_v44 = vsel %vm1595_vm6, %v5680_v45, 0.0 }
0x1eae   : > { %7935 = vmatpush3.bf16.msra.mxu1 %v8877_v9  ;;  %7653 = vmatprep.mubr.msk.f32.mxu1 %vm8440_vm0, %v8441_v1 }
0x1eaf   : > { %7936 = vmatprep.subr.bf16.mxu1 %v8439_v0 }
0x1eb2   : > { %7938 = vmatpush3.bf16.msra.mxu1 %v8881_v12 }
0x1eb3   : > { %7947 = vmatprep.subr.bf16.mxu1 %v8439_v0 }
0x1f7c   : > { %v5846_v5 = vpop.f32.mrb[52].mxu1 }
0x1f7d   : > { %v5847_v61 = vadd.f32 %v5846_v5, %v5773_v30  ;;  %v7626_v37 = vpop.f32.mrb[53].mxu1  ;;  %v6884_v30 = vld [vmem:[%s9590_s29 + $0x10] sm:$0xf] }
0x1f7e   : > { %v4322_v31 = vmul.f32 %v6884_v30, %v9389_v25 }
0x1f7f   : > { %v5920_v63 = vadd.f32 %v5916_v24, %v5847_v61 }
0x1f80   : > { %v6027_v2 = vpop.f32.mrb[54].mxu1  ;;  %v4335_v33 = vsel %vm1595_vm6, %v4322_v31, 0.0 }
0x1f81   : > { %v5921_v7 = vadd.f32 %v9498_v18, %v5920_v63  ;;  %v7644_v14 = vpop.f32.mrb[55].mxu1  ;;  %v6028_v13 = vadd.f32 %v9409_v42, %v6027_v2  ;;  %v1147_v42 = vld [vmem:[%s9590_s29] sm:$0xf]  ;;  %v2286_v63 = vsel %vm1595_vm6, %v6821_v54, 0.0  ;;  %v2965_v2 = vsel %vm1595_vm6, %v6842_v6, 0.0 }
0x1f82   : > { %v1596_v62 = vsel %vm1595_vm6, %v1147_v42, 0.0  ;;  %v4323_v14 = vsel %vm1595_vm6, %v6884_v30, 0.0 }
0x1f83   : > { %8138 = vtanh.f32 %v5921_v7  ;;  %v6941_v9 = vmul.f32 -1.442695, %v5921_v7  ;;  %v6031_v12 = vmax.f32 %v6028_v13, 0.0  ;;  %v3644_v7 = vsel %vm1595_vm6, %v6863_v27, 0.0 }
0x1f85   : > { %8140 = vpow2.f32 %v6941_v9  ;;  %v6032_v16 = vsub.f32 0.0, %v6031_v12  ;;  %v6035_v9 = vmul.f32 %v9326_v21, %v9570_v58 }
0x1f87   : > { %v6033_v17 = vmul.f32 1.442695, %v6032_v16  ;;  %v6036_v13 = vadd.f32 %v9331_v35, %v6035_v9 }
0x1f89   : > { %v6037_v12 = vmax.f32 %v6036_v13, 0.0 }
0x1f8d   : > { %v8139_v10 = vpop.eup %8138 }
0x1f8e   : > { %5931 = vrot.lane.b32.xlu0 %v8139_v10, %s8443_s22  ;;  %v5002_v10 = vsel %vm1595_vm6, %v6905_v19, 0.0 }
0x1f8f   : > { %v8141_v15 = vpop.eup %8140 }
0x1f90   : > { %v5925_v0 = vadd.f32 1.0, %v8141_v15  ;;  %v6038_v15 = vsub.f32 0.0, %v6037_v12 }
0x1f92   : > { %8142 = vrcp.f32 %v5925_v0  ;;  %v6039_v0 = vmul.f32 1.442695, %v6038_v15 }
0x1f93   : > { %8144 = vpow2.f32 %v6033_v17 }
0x1f9c   : > { %v8143_v3 = vpop.eup %8142 }
0x1f9d   : > { %v8145_v51 = vpop.eup %8144  ;;  %v5929_v46 = vmul.f32 %v8143_v3, %v9506_v43  ;;  %v1594_v43 = vmul.f32 %v9049_v40, %v1147_v42  ;;  %v5681_v40 = vsel %vm1595_vm6, %v6926_v8, 0.0 }
0x1f9f   : > { %v1608_v37 = vsel %vm1595_vm6, %v1594_v43, 0.0 }
0x2000   : > { %v5932_v20 = vpop.permute.xlu0 %5931 }
0x2001   : > { %v5934_v18 = vmul.f32 %v8143_v3, %v5932_v20 }
0x2003   : > { %5936 = vrot.lane.b32.xlu1 %v5934_v18, %s8444_s16 }
0x2007   : > { %6042 = vrot.lane.b32.xlu1 %v8145_v51, %s8445_s0 }
0x202b   : > { %1597 = vadd.xlane.f32.xlu1 %v1596_v62 }
0x202f   : > { %2299 = vadd.xlane.f32.xlu1 %v2298_v57 }
0x2033   : > { %2978 = vadd.xlane.f32.xlu1 %v2977_v28 }
0x2037   : > { %3657 = vadd.xlane.f32.xlu1 %v3656_v32 }
0x203b   : > { %4336 = vadd.xlane.f32.xlu1 %v4335_v33 }
0x203f   : > { %5015 = vadd.xlane.f32.xlu1 %v5014_v41 }
0x2043   : > { %5694 = vadd.xlane.f32.xlu1 %v5693_v44 }
0x2075   : > { %v5937_v48 = vpop.permute.xlu1 %5936 }
0x2076   : > { %v5939_v49 = vadd.f32 %v5937_v48, %v5929_v46 }
0x2078   : > { %8146 = vtanh.f32 %v5939_v49 }
0x2079   : > { %v6043_v52 = vpop.permute.xlu1 %6042  ;;  %8148 = vpow2.f32 %v6039_v0 }
0x2082   : > { %v8147_v25 = vpop.eup %8146 }
0x2083   : > { %5942 = vrot.lane.b32.xlu0 %v8147_v25, %s8443_s22  ;;  %v8149_v17 = vpop.eup %8148 }
0x20b8   : > { %v1598_v22 = vpop.xlane.xlu1 %1597 }
0x20b9   : > { %v1599_v11 = vrot.slane %v1598_v22, 4 }
0x20bb   : > { %v1600_v24 = vadd.f32 %v1599_v11, %v1598_v22 }
0x20bc   : > { %v2300_v21 = vpop.xlane.xlu1 %2299 }
0x20bd   : > { %v1601_v53 = vrot.slane %v1600_v24, 2  ;;  %v2301_v35 = vrot.slane %v2300_v21, 4 }
0x20bf   : > { %v1602_v55 = vadd.f32 %v1601_v53, %v1600_v24  ;;  %v2302_v20 = vadd.f32 %v2301_v35, %v2300_v21 }
0x20c0   : > { %v2979_v58 = vpop.xlane.xlu1 %2978 }
0x20c1   : > { %v1603_v56 = vrot.slane %v1602_v55, 1  ;;  %v2980_v18 = vrot.slane %v2979_v58, 4  ;;  %v2303_v62 = vrot.slane %v2302_v20, 2 }
0x20c3   : > { %v1604_v59 = vadd.f32 %v1603_v56, %v1602_v55  ;;  %v2981_v23 = vadd.f32 %v2980_v18, %v2979_v58  ;;  %v2304_v28 = vadd.f32 %v2303_v62, %v2302_v20 }
0x20c5   : > { %7951 = vpush %v1604_v59  ;;  %v2982_v29 = vrot.slane %v2981_v23, 2  ;;  %v2305_v44 = vrot.slane %v2304_v28, 1 }
0x20c7   : > { %v2983_v25 = vadd.f32 %v2982_v29, %v2981_v23 }
0x20f5   : > { %v5943_v60 = vpop.permute.xlu0 %5942 }
0x20f6   : > { %v5945_v5 = vmul.f32 %v8143_v3, %v5943_v60  ;;  %v3658_v3 = vpop.xlane.xlu1 %3657  ;;  %v2306_v60 = vadd.f32 %v2305_v44, %v2304_v28 }
0x20f7   : > { %v3659_v57 = vrot.slane %v3658_v3, 4 }
0x20f8   : > { %v6045_v61 = vmul.f32 %v6043_v52, %v5945_v5 }
0x20f9   : > { %v3660_v19 = vadd.f32 %v3659_v57, %v3658_v3 }
0x20fa   : > { %6047 = vrot.lane.b32.xlu0 %v6045_v61, %s8444_s16  ;;  %v4337_v42 = vpop.xlane.xlu1 %4336  ;;  %s8446_s16 = smov [#allocation13]  }
0x20fb   : > { %v4338_v33 = vrot.slane %v4337_v42, 4  ;;  %v3661_v52 = vrot.slane %v3660_v19, 2  ;;  %s8357_s0 = sshll.u32 %s8446_s16, 4  ;;  %s8358_s0 = int_to_ptr.vmem [resolvable:$false] %s8357_s0 }
0x20fc   : > { %s8359_s3 = scalar_lea.vmem %s8358_s0, 1024 }
0x20fd   : > { %v4339_v22 = vadd.f32 %v4338_v33, %v4337_v42 }
0x20fe   : > { %v5016_v30 = vpop.xlane.xlu1 %5015 }
0x20ff   : > { %v5017_v11 = vrot.slane %v5016_v30, 4 }
0x2102   : > { %v5695_v53 = vpop.xlane.xlu1 %5694 }
0x2119   : > { %1609 = vadd.xlane.f32.xlu0 %v1608_v37  ;;  %v2984_v37 = vrot.slane %v2983_v25, 1 }
0x211b   : > { %v2985_v0 = vadd.f32 %v2984_v37, %v2983_v25 }
0x211d   : > { %2287 = vadd.xlane.f32.xlu0 %v2286_v63  ;;  %v4340_v63 = vrot.slane %v4339_v22, 2 }
0x211f   : > { %v4341_v3 = vadd.f32 %v4340_v63, %v4339_v22  ;;  %v6944_v22 = vld [vmem:[%s8933_s1 + $0x1c] sm:$0xf]  ;;  %s6407_s1 = sshll.u32 %s9044_s2, 4  ;;  %s9657_s1 = int_to_ptr.vmem [resolvable:$true] %s6407_s1 }
0x2120   : > { %s8353_s5 = scalar_lea.vmem %s9657_s1, 512  ;;  %p8360_p4 = scmp.lt.s32.totalorder %s9657_s1, %s8358_s0 }
0x2121   : > { %2966 = vadd.xlane.f32.xlu0 %v2965_v2  ;;  %v5018_v2 = vadd.f32 %v5017_v11, %v5016_v30  ;;  %v6943_v11 = vld [vmem:[%s8939_s23 + $0x1c] sm:$0xf]  ;;  %p8354_p2 = scmp.ne.s32.totalorder %s9657_s1, %s8353_s5  ;;  %p8361_p7 = scmp.lt.s32.totalorder %s8359_s3, %s8353_s5 }
0x2123   : > { %p8355_p12 = pnand %p8354_p2, %p9817_p10  ;;  %p8362_p6 = por %p8361_p7, %p8360_p4 }
0x2125   : > { %3645 = vadd.xlane.f32.xlu0 %v3644_v7  ;;  %v5696_v7 = vrot.slane %v5695_v53, 4  ;;  %p8356_p8 = pneg %p8355_p12 }
0x2127   : > { %v5697_v21 = vadd.f32 %v5696_v7, %v5695_v53  ;;  %p8363_p9 = pnand %p8362_p6, %p8356_p8 }
0x2129   : > { %4324 = vadd.xlane.f32.xlu0 %v4323_v14  ;;  %v5698_v23 = vrot.slane %v5697_v21, 2 }
0x212d   : > { %5003 = vadd.xlane.f32.xlu0 %v5002_v10  ;;  %v3662_v10 = vadd.f32 %v3661_v52, %v3660_v19 }
0x212f   : > { %v3663_v35 = vrot.slane %v3662_v10, 1 }
0x2131   : > { %5682 = vadd.xlane.f32.xlu0 %v5681_v40  ;;  %v3664_v57 = vadd.f32 %v3663_v35, %v3662_v10 }
0x216c   : > { %v6048_v16 = vpop.permute.xlu0 %6047 }
0x216d   : > { %7654 = vmatmul.mubr.msk.f32.vlgmr.msra.gmra.mrb[56].mxu1 %vm1261_vm5, %v6048_v16 }
0x216e   : > { %7950 = vmatpush3.bf16.msk.msra.mxu1 %vm8853_vm3, %v8920_v34  ;;  %7674 = vmatprep.mubr.msk.f32.mxu1 %vm8440_vm0, %v8441_v1 }
0x2171   : > { %7675 = vmatmul.mubr.msk.f32.vlgmr.msra.gmra.mrb[58].mxu1 %vm1154_vm4, %v8149_v17  ;;  %v5019_v17 = vrot.slane %v5018_v2, 2 }
0x21a6   : > { %v1610_v51 = vpop.xlane.xlu0 %1609 }
0x21a7   : > { %v1611_v54 = vrot.slane %v1610_v51, 4 }
0x21a9   : > { %v1612_v6 = vadd.f32 %v1611_v54, %v1610_v51 }
0x21aa   : > { %v2288_v26 = vpop.xlane.xlu0 %2287 }
0x21ab   : > { %v1613_v34 = vrot.slane %v1612_v6, 2  ;;  %v2289_v27 = vrot.slane %v2288_v26, 4 }
0x21ad   : > { %v2290_v32 = vadd.f32 %v2289_v27, %v2288_v26  ;;  %v1614_v31 = vadd.f32 %v1613_v34, %v1612_v6  ;;  %v4342_v26 = vrot.slane %v4341_v3, 1  ;;  %v5020_v34 = vadd.f32 %v5019_v17, %v5018_v2 }
0x21ae   : > { %v2967_v36 = vpop.xlane.xlu0 %2966 }
0x21af   : > { %v2291_v8 = vrot.slane %v2290_v32, 2  ;;  %v2968_v41 = vrot.slane %v2967_v36, 4  ;;  %v1615_v45 = vrot.slane %v1614_v31, 1  ;;  %v4343_v19 = vadd.f32 %v4342_v26, %v4341_v3 }
0x21b0   : > { %v5021_v33 = vrot.slane %v5020_v34, 1 }
0x21b1   : > { %v2969_v46 = vadd.f32 %v2968_v41, %v2967_v36  ;;  %v1616_v48 = vadd.f32 %v1615_v45, %v1614_v31  ;;  %v2292_v49 = vadd.f32 %v2291_v8, %v2290_v32  ;;  %v5699_v36 = vadd.f32 %v5698_v23, %v5697_v21 }
0x21b2   : > { %v3646_v24 = vpop.xlane.xlu0 %3645 }
0x21b3   : > { %v2970_v55 = vrot.slane %v2969_v46, 2  ;;  %v3647_v56 = vrot.slane %v3646_v24, 4  ;;  %7953 = vpush %v1616_v48  ;;  %v2293_v59 = vrot.slane %v2292_v49, 1  ;;  %v5700_v48 = vrot.slane %v5699_v36, 1 }
0x21b5   : > { %v3648_v5 = vadd.f32 %v3647_v56, %v3646_v24  ;;  %v2294_v61 = vadd.f32 %v2293_v59, %v2292_v49  ;;  %v2971_v43 = vadd.f32 %v2970_v55, %v2969_v46  ;;  %v5022_v46 = vadd.f32 %v5021_v33, %v5020_v34 }
0x21b6   : > { %v4325_v14 = vpop.xlane.xlu0 %4324  ;;  %v5701_v52 = vadd.f32 %v5700_v48, %v5699_v36  ;;  %v6122_v24 = vsub.f32 1.0, %v6944_v22  ;;  %v6121_v56 = vmul.f32 %v6944_v22, %v6943_v11 }
0x21b7   : > { %v3649_v40 = vrot.slane %v3648_v5, 2  ;;  %v4326_v9 = vrot.slane %v4325_v14, 4  ;;  %7955 = vpush %v2294_v61  ;;  %v2972_v13 = vrot.slane %v2971_v43, 1 }
0x21b8   : > { %7957 = vpush %v2306_v60 }
0x21b9   : > { %v4327_v12 = vadd.f32 %v4326_v9, %v4325_v14  ;;  %v2973_v15 = vadd.f32 %v2972_v13, %v2971_v43  ;;  %v3650_v16 = vadd.f32 %v3649_v40, %v3648_v5  ;;  %v6947_v43 = vld [vmem:[%s9590_s29 + $0x1c] sm:$0xf] }
0x21ba   : > { %v5004_v58 = vpop.xlane.xlu0 %5003  ;;  %v6946_v40 = vld [vmem:[%s9033_s18 + $0x1c] sm:$0xf] }
0x21bb   : > { %v4328_v20 = vrot.slane %v4327_v12, 2  ;;  %v5005_v18 = vrot.slane %v5004_v58, 4  ;;  %7959 = vpush %v2973_v15  ;;  %v3651_v51 = vrot.slane %v3650_v16, 1 }
0x21bc   : > { %7961 = vpush %v2985_v0 }
0x21bd   : > { %v5006_v42 = vadd.f32 %v5005_v18, %v5004_v58  ;;  %v3652_v54 = vadd.f32 %v3651_v51, %v3650_v16  ;;  %v4329_v62 = vadd.f32 %v4328_v20, %v4327_v12 }
0x21be   : > { %v5683_v6 = vpop.xlane.xlu0 %5682 }
0x21bf   : > { %v5007_v27 = vrot.slane %v5006_v42, 2  ;;  %v5684_v28 = vrot.slane %v5683_v6, 4  ;;  %7963 = vpush %v3652_v54  ;;  %v4330_v29 = vrot.slane %v4329_v62, 1 }
0x21c0   : > { %7965 = vpush %v3664_v57 }
0x21c1   : > { %v5685_v30 = vadd.f32 %v5684_v28, %v5683_v6  ;;  %v4331_v32 = vadd.f32 %v4330_v29, %v4329_v62  ;;  %v5008_v31 = vadd.f32 %v5007_v27, %v5006_v42 }
0x21c3   : > { %v5686_v8 = vrot.slane %v5685_v30, 2  ;;  %7967 = vpush %v4331_v32  ;;  %v5009_v41 = vrot.slane %v5008_v31, 1 }
0x21c4   : > { %7969 = vpush %v4343_v19 }
0x21c5   : > { %v5010_v45 = vadd.f32 %v5009_v41, %v5008_v31  ;;  %v5687_v44 = vadd.f32 %v5686_v8, %v5685_v30 }
0x21c7   : > { %7971 = vpush %v5010_v45  ;;  %v5688_v49 = vrot.slane %v5687_v44, 1 }
0x21c8   : > { %7973 = vpush %v5022_v46 }
0x21c9   : > { %v5689_v25 = vadd.f32 %v5688_v49, %v5687_v44 }
0x21cb   : > { %7975 = vpush %v5689_v25 }
0x21cc   : > { %7977 = vpush %v5701_v52 }
0x2240   : > { %v6117_v53 = vpop.f32.mrb[56].mxu1 }
0x2241   : > { %v6118_v55 = vadd.f32 %v9352_v39, %v6117_v53  ;;  %v7655_v59 = vpop.f32.mrb[57].mxu1  ;;  %v6360_v39 = vsel %vm1595_vm6, %v6947_v43, 0.0 }
0x2242   : > { %6361 = vadd.xlane.f32.xlu0 %v6360_v39 }
0x2243   : > { %v6123_v60 = vmul.f32 %v6122_v24, %v6118_v55  ;;  %v6351_v12 = vsub.f32 %v6946_v40, %v6118_v55 }
0x2244   : > { %v6340_v61 = vpop.f32.mrb[58].mxu1 }
0x2245   : > { %v6124_v5 = vadd.f32 %v6123_v60, %v6121_v56  ;;  %v7676_v37 = vpop.f32.mrb[59].mxu1  ;;  %v6352_v17 = vand.u32 2147483647, %v6351_v12 }
0x2247   : > { %7661 = vmatmul.mubr.msk.f32.vlgmr.msra.gmra.mrb[58].mxu0 %vm1154_vm4, %v6124_v5 }
0x2248   : > { %7946 = vmatpush3.bf16.msk.msra.mxu0 %vm8853_vm3, %v8967_v47  ;;  %7667 = vmatprep.mubr.msk.f32.mxu0 %vm8440_vm0, %v8441_v1 }
0x224b   : > { %7668 = vmatmul.mubr.msk.f32.vlgmr.msra.gmra.mrb[60].mxu0 %vm1154_vm4, %v6944_v22 }
0x231a   : > { %v6194_v63 = vpop.f32.mrb[58].mxu0 }
0x231b   : > { %v7662_v2 = vpop.f32.mrb[59].mxu0  ;;  %v6195_v14 = vadd.f32 %v9469_v38, %v6194_v63 }
0x231d   : > { %v6353_v1 = vsub.f32 %v6946_v40, %v6195_v14 }
0x231e   : > { %v6267_v7 = vpop.f32.mrb[60].mxu0 }
0x231f   : > { %v6341_v10 = vadd.f32 %v6340_v61, %v6267_v7  ;;  %v7669_v4 = vpop.f32.mrb[61].mxu0  ;;  %v6354_v0 = vand.u32 2147483647, %v6353_v1 }
0x2321   : > { %v6344_v47 = vadd.f32 %v9474_v50, %v6341_v10  ;;  %v6355_v35 = vadd.f32 %v6354_v0, %v6352_v17  ;;  %v6362_v50 = vpop.xlane.xlu0 %6361 }
0x2322   : > { %v6363_v18 = vrot.slane %v6362_v50, 4 }
0x2323   : > { %v6345_v9 = vmul.f32 %v6344_v47, %v6195_v14  ;;  %v6346_v13 = vsub.f32 1.0, %v6344_v47 }
0x2324   : > { %v6364_v42 = vadd.f32 %v6363_v18, %v6362_v50 }
0x2325   : > { %v6347_v15 = vmul.f32 %v6346_v13, %v6118_v55 }
0x2326   : > { %v6365_v62 = vrot.slane %v6364_v42, 2 }
0x2327   : > { %v6348_v16 = vadd.f32 %v6347_v15, %v6345_v9 }
0x2328   : > { %v6366_v23 = vadd.f32 %v6365_v62, %v6364_v42 }
0x2329   : > { %v6349_v21 = vmul.f32 %v6348_v16, %v6122_v24  ;;  %v6356_v58 = vsub.f32 %v6946_v40, %v6348_v16 }
0x232a   : > { %v6367_v6 = vrot.slane %v6366_v23, 1 }
0x232b   : > { %v6350_v3 = vadd.f32 %v6349_v21, %v6121_v56  ;;  %v6357_v38 = vand.u32 2147483647, %v6356_v58 }
0x232c   : > { %v6368_v57 = vadd.f32 %v6367_v6, %v6366_v23 }
0x232d   : > { %6957 = vst.msk [vmem:[%s9044_s2 + $0x1c] sm:$0xf] %vm1595_vm6, %v6350_v3  ;;  %v6358_v20 = vadd.f32 %v6357_v38, %v6355_v35 }
0x232e   : > { %7979 = vpush %v6368_v57 }
0x232f   : > { %v6359_v51 = vmul.f32 %v6947_v43, %v6358_v20 }
0x2331   : > { %v6372_v54 = vsel %vm1595_vm6, %v6359_v51, 0.0 }
0x2332   : > { %6373 = vadd.xlane.f32.xlu1 %v6372_v54 }
0x2333   : > { %8366 = shalt.err (!%p8363_p9)
}
0x2334   : > { %s8367_s2 = scalar_lea.hbm %s9655_s24, 512  ;;  %s8371_s26 = scalar_lea.hbm %s9816_s28, 1024 }
0x2335   : > { %p8368_p0 = scmp.ne.s32.totalorder %s9655_s24, %s8367_s2  ;;  %p8372_p5 = scmp.lt.u32.totalorder %s9655_s24, %s9816_s28 }
0x2336   : > { %p8373_p3 = scmp.lt.u32.totalorder %s8371_s26, %s8367_s2  ;;  %p8375_p2 = scmp.lt.u32.totalorder %s8367_s2, %s9655_s24 }
0x2337   : > { %p8369_p1 = pnand %p8368_p0, %p9817_p10 }
0x2338   : > { %p8374_p11 = por %p8373_p3, %p8372_p5 }
0x2339   : > { %p8370_p13 = pneg %p8369_p1 }
0x233a   : > { %p8376_p12 = por %p8375_p2, %p8374_p11 }
0x233c   : > { %p8377_p8 = pnand %p8376_p12, %p8370_p13 }
0x233e   : > { %8380 = shalt.err (!%p8377_p8)
}
0x233f   : > { %s8447_s19 = smov 4   ;;  %s7952_s23 = spop %7951  ;;  %vm6388_vm7 = vcmask 0  }
0x2340   : > { %7995 = dma.vmem_to_hbm [thread:$0]  (%p9817_p10), %s9657_s1, 512, %s9655_s24, %s6391_s10, %s8443_s22, %s8443_s22, %s8447_s19  }
0x2341   : > { %s9685_s18 = spop %7953  ;;  %v1606_v19 = vstv %s7952_s23  ;;  %s9818_s19 = sld [smem:[#allocation38_spill]] }
0x2342   : > { %s7956_s5 = spop %7955  ;;  %v1607_v8 = vadd.f32 1e-05, %v1606_v19  ;;  %v1618_v56 = vstv %s9685_s18 }
0x2343   : > { %s9687_s21 = spop %7957  ;;  %v2296_v31 = vstv %s7956_s5 }
0x2344   : > { %s7960_s16 = spop %7959  ;;  %v2297_v36 = vadd.f32 1e-05, %v2296_v31  ;;  %v2308_v59 = vstv %s9687_s21 }
0x2345   : > { %s9689_s0 = spop %7961  ;;  %v2975_v33 = vstv %s7960_s16 }
0x2346   : > { %s7964_s30 = spop %7963  ;;  %v2976_v45 = vadd.f32 1e-05, %v2975_v33  ;;  %8150 = vrcp.f32 %v2297_v36  ;;  %v2987_v43 = vstv %s9689_s0 }
0x2347   : > { %s9691_s22 = spop %7965  ;;  %v3654_v41 = vstv %s7964_s30  ;;  %8152 = vrcp.f32 %v1607_v8  ;;  %s1115_s23 = scalar_lea.vmem %s9818_s19, %s8837_s27 }
0x2348   : > { %s7968_s1 = spop %7967  ;;  %v3655_v46 = vadd.f32 1e-05, %v3654_v41  ;;  %8154 = vrcp.f32 %v2976_v45  ;;  %v3666_v2 = vstv %s9691_s22 }
0x2349   : > { %s9693_s24 = spop %7969  ;;  %v4333_v44 = vstv %s7968_s1 }
0x234a   : > { %s7972_s10 = spop %7971  ;;  %v4334_v49 = vadd.f32 1e-05, %v4333_v44  ;;  %8156 = vrcp.f32 %v3655_v46  ;;  %v4345_v4 = vstv %s9693_s24 }
0x234b   : > { %s9695_s3 = spop %7973  ;;  %v5012_v48 = vstv %s7972_s10 }
0x234c   : > { %s7976_s2 = spop %7975  ;;  %v5013_v52 = vadd.f32 1e-05, %v5012_v48  ;;  %8158 = vrcp.f32 %v4334_v49  ;;  %v5024_v9 = vstv %s9695_s3 }
0x234d   : > { %v5691_v25 = vstv %s7976_s2  ;;  %s9697_s20 = spop %7977 }
0x234e   : > { %v5692_v22 = vadd.f32 1e-05, %v5691_v25  ;;  %8160 = vrcp.f32 %v5013_v52  ;;  %v5703_v15 = vstv %s9697_s20 }
0x2350   : > { %v8151_v24 = vpop.eup %8150  ;;  %8162 = vrcp.f32 %v5692_v22 }
0x2351   : > { %v8153_v53 = vpop.eup %8152  ;;  %v2310_v5 = vmul.f32 %v8151_v24, %v2308_v59 }
0x2352   : > { %v8155_v55 = vpop.eup %8154  ;;  %v1620_v37 = vmul.f32 %v8153_v53, %v1618_v56 }
0x2353   : > { %v2989_v39 = vmul.f32 %v8155_v55, %v2987_v43 }
0x2354   : > { %v8157_v61 = vpop.eup %8156  ;;  %v2311_v7 = vadd.f32 %v2310_v5, %v1620_v37 }
0x2355   : > { %v3668_v14 = vmul.f32 %v8157_v61, %v3666_v2 }
0x2356   : > { %v8159_v63 = vpop.eup %8158  ;;  %v2990_v47 = vadd.f32 %v2989_v39, %v2311_v7 }
0x2357   : > { %v4347_v40 = vmul.f32 %v8159_v63, %v4345_v4 }
0x2358   : > { %v8161_v10 = vpop.eup %8160  ;;  %v3669_v13 = vadd.f32 %v3668_v14, %v2990_v47 }
0x2359   : > { %v5026_v12 = vmul.f32 %v8161_v10, %v5024_v9 }
0x235a   : > { %v8163_v1 = vpop.eup %8162  ;;  %v4348_v0 = vadd.f32 %v4347_v40, %v3669_v13 }
0x235b   : > { %v5705_v16 = vmul.f32 %v8163_v1, %v5703_v15 }
0x235c   : > { %v5027_v17 = vadd.f32 %v5026_v12, %v4348_v0 }
0x235e   : > { %v5706_v35 = vadd.f32 %v5705_v16, %v5027_v17 }
0x235f   : > { %s7980_s4 = spop %7979 }
0x2360   : > { %v6370_v11 = vstv %s7980_s4 }
0x2361   : > { %v6371_v60 = vadd.f32 1e-05, %v6370_v11 }
0x2363   : > { %8164 = vrcp.f32 %v6371_v60 }
0x236d   : > { %v8165_v21 = vpop.eup %8164 }
0x23bf   : > { %v6374_v26 = vpop.xlane.xlu1 %6373 }
0x23c0   : > { %v6375_v34 = vrot.slane %v6374_v26, 4 }
0x23c2   : > { %v6376_v27 = vadd.f32 %v6375_v34, %v6374_v26 }
0x23c4   : > { %v6377_v28 = vrot.slane %v6376_v27, 2 }
0x23c6   : > { %v6378_v29 = vadd.f32 %v6377_v28, %v6376_v27 }
0x23c8   : > { %v6379_v30 = vrot.slane %v6378_v29, 1 }
0x23ca   : > { %v6380_v32 = vadd.f32 %v6379_v30, %v6378_v29 }
0x23cc   : > { %7981 = vpush %v6380_v32 }
0x23fd   : > { %s7982_s26 = spop %7981 }
0x23fe   : > { %v6382_v58 = vstv %s7982_s26 }
0x23ff   : > { %v6384_v3 = vmul.f32 %v8165_v21, %v6382_v58 }
0x2401   : > { %v6385_v38 = vadd.f32 %v6384_v3, %v5706_v35 }
0x2403   : > { %6389 = vst.msk [vmem:[%s1115_s23] sm:$0x1] %vm6388_vm7, %v6385_v38 }
0x2404 PF: > { %s9819_s18 = sld [smem:[#allocation19_spill]]  ;;  %s9820_s5 = sld [smem:[#allocation25_spill]] }
0x2405   : > { %s9821_s21 = sld [smem:[#allocation21_spill]] }
0x240a   : > { %s6425_s16 = sand.u32 1, %s9819_s18   ;;  %p9822_p10 = scmp.ne.s32.totalorder %s9820_s5, 0 }
0x240b   : > { %p9823_p4 = scmp.ge.s32.totalorder %s9821_s21, 2  ;;  %s6426_s0 = scalar_lea.sflag [#allocation4], %s6425_s16 }
0x240d   : > { %p8017_p7 = pnand %p9823_p4, %p9822_p10 }
0x240f   : > { %8414 = dma.done.wait (!%p8017_p7), %s6426_s0, 512  }
0x2410   : > { %8416 = vsyncadd (!%p8017_p7), %s6426_s0, 4294966784  ;;  %s9824_s27 = sld [smem:[#allocation22_spill]]  ;;  %s9825_s30 = sld [smem:[#allocation20_spill]] }
0x2411   : > { %s9826_s26 = sld [smem:[#allocation23_spill]]  ;;  %s9827_s2 = smov %s8423_s25 }
0x2416   : > { %p44_p6 = scmp.ge.s32.totalorder %s9824_s27, 4   ;;  %s9828_s25 = smov %s9825_s30 }
0x2418   :  { %46 = sbr.rel (!%p44_p6) target bundleno = 25 (0x19), region = 302 }
0x241f   :  { %6437 = vsyncpa [#allocation3], 1 }
0x2420   :  { %6439 = vsyncpa [#allocation3 + $0x1], 1 }
0x2421   :  { %6440 = vsyncpa [#allocation6], 1 }
0x2422   :  { %6442 = vsyncpa [#allocation6 + $0x1], 1 }
0x2423   :  { %6443 = vsyncpa [#allocation9], 1 }
0x2424   :  { %6445 = vsyncpa [#allocation9 + $0x1], 1 }
0x2425   :  { %6446 = vsyncpa [#allocation12], 1 }
0x2426   :  { %6448 = vsyncpa [#allocation12 + $0x1], 1 }
0x2427   :  { %6449 = vsyncpa [#allocation4], 1 }
0x2428   :  { %6451 = vsyncpa [#allocation4 + $0x1], 1 }

</bundles_post_ra>
